<compile_context>
chip_gen: v7x
topology: tpu7x:2x2x1
jax: 0.10.0
libtpu: 0.0.40
codegen_flags: <defaults>
</compile_context>

<pallas_src>
import jax
import jax.numpy as jnp
from jax import lax
from jax.experimental import pallas as pl
from jax.experimental.pallas import tpu as pltpu

EPS = 1e-5

# Explicit scoped-VMEM budget: >= the 16/32 MiB defaults on v5e/v6e, and
# comfortably below v7x's 64 MiB physical VMEM.  Per-grid-step resident set at
# these shapes is only a few hundred KiB.
_VMEM_LIMIT = 32 * 1024 * 1024


# --------------------------------------------------------------------------
# conv3x3 (+ fused previous BN+ReLU) + partial BN stats, one image per grid step
# --------------------------------------------------------------------------
def _make_conv_kernel(H, W, Cin, Co, apply_prev):
    def kernel(x_ref, w_ref, scale_ref, shift_ref, y_ref, stats_ref, pad_ref):
        # Zero ONLY the 1-pixel halo ring; the interior is fully overwritten
        # below every grid step (re-zeroed each step so the kernel stays
        # correct when the "parallel" batch axis is split across cores).
        zrow = jnp.zeros((1, W + 2, Cin), jnp.float32)
        zcol = jnp.zeros((H + 2, 1, Cin), jnp.float32)
        pad_ref[0:1, :, :] = zrow
        pad_ref[H + 1:H + 2, :, :] = zrow
        pad_ref[:, 0:1, :] = zcol
        pad_ref[:, W + 1:W + 2, :] = zcol

        x = x_ref[0]                                        # (H, W, Cin) f32
        if apply_prev:
            # Previous layer's BatchNorm folded into one per-channel FMA + ReLU:
            # scale = gamma*rsqrt(var+eps), shift = beta - mean*scale.
            x = jnp.maximum(
                x * scale_ref[...].reshape(1, 1, Cin)
                + shift_ref[...].reshape(1, 1, Cin), 0.0)
        pad_ref[1:H + 1, 1:W + 1, :] = x

        # im2col: ONE (H*W, 9*Cin) x (9*Cin, Co) matmul (bf16 operands, f32 acc)
        # instead of 9 tiny-K matmuls.  No conv bias (cancelled by BN mean).
        cols = [pad_ref[ky:ky + H, kx:kx + W, :]
                for ky in range(3) for kx in range(3)]
        patches = jnp.concatenate(cols, axis=-1).reshape(H * W, 9 * Cin)
        y = jnp.dot(patches.astype(jnp.bfloat16), w_ref[...],
                    preferred_element_type=jnp.float32)     # (H*W, Co) f32

        # Per-image partial BN statistics in a single pass (sum, sum of squares);
        # the cross-batch reduction and scale/shift fold happen in the wrapper.
        s = jnp.sum(y, axis=0, keepdims=True)               # (1, Co)
        ss = jnp.sum(y * y, axis=0, keepdims=True)          # (1, Co)
        stats_ref[...] = jnp.concatenate([s, ss], axis=0).reshape(1, 2, Co)

        y_ref[...] = y.reshape(1, H, W, Co)                 # raw conv output

    return kernel


def _conv_bn_stats_pass(x_nhwc, w_flat_bf16, scale_in, shift_in, *, apply_prev, Co):
    N, H, W, Cin = x_nhwc.shape
    y, stats = pl.pallas_call(
        _make_conv_kernel(H, W, Cin, Co, apply_prev),
        out_shape=(jax.ShapeDtypeStruct((N, H, W, Co), jnp.float32),
                   jax.ShapeDtypeStruct((N, 2, Co), jnp.float32)),
        grid=(N,),
        in_specs=[
            pl.BlockSpec((1, H, W, Cin), lambda n: (n, 0, 0, 0)),
            pl.BlockSpec((9 * Cin, Co), lambda n: (0, 0)),
            pl.BlockSpec((1, Cin), lambda n: (0, 0)),
            pl.BlockSpec((1, Cin), lambda n: (0, 0)),
        ],
        out_specs=(pl.BlockSpec((1, H, W, Co), lambda n: (n, 0, 0, 0)),
                   pl.BlockSpec((1, 2, Co), lambda n: (n, 0, 0))),
        scratch_shapes=[pltpu.VMEM((H + 2, W + 2, Cin), jnp.float32)],
        compiler_params=pltpu.CompilerParams(
            dimension_semantics=("parallel",),
            vmem_limit_bytes=_VMEM_LIMIT),
    )(x_nhwc, w_flat_bf16, scale_in, shift_in)
    return y, stats


# --------------------------------------------------------------------------
# epilogue: out = relu( bn3(y3) + relu(bn1(y1)) ), one image per grid step
# --------------------------------------------------------------------------
def _make_fuse_kernel(Co):
    def kernel(y1_ref, y3_ref, s1_ref, b1_ref, s3_ref, b3_ref, o_ref):
        s1 = s1_ref[...].reshape(1, 1, 1, Co)
        b1 = b1_ref[...].reshape(1, 1, 1, Co)
        s3 = s3_ref[...].reshape(1, 1, 1, Co)
        b3 = b3_ref[...].reshape(1, 1, 1, Co)
        identity = jnp.maximum(y1_ref[...] * s1 + b1, 0.0)   # relu(bn1(conv1(x)))
        o_ref[...] = jnp.maximum(y3_ref[...] * s3 + b3 + identity, 0.0)
    return kernel


# --------------------------------------------------------------------------
# tiny glue: per-channel one-pass BN fold (biased variance, eps=1e-5)
# --------------------------------------------------------------------------
def _bn_scale_shift(stats, gamma, beta, count):
    sums = jnp.sum(stats[:, 0, :], axis=0)                  # (Co,)
    sqs = jnp.sum(stats[:, 1, :], axis=0)                   # (Co,)
    mean = sums / count
    var = jnp.maximum(sqs / count - mean * mean, 0.0)       # E[y^2] - mean^2
    scale = gamma.reshape(-1) * lax.rsqrt(var + EPS)
    shift = beta.reshape(-1) - mean * scale
    return scale.reshape(1, -1), shift.reshape(1, -1)


# --------------------------------------------------------------------------
# wrapper
# --------------------------------------------------------------------------
def unet_res_conv_block(x_nchw, params):
    """UNetResConvBlock.forward (padding=1, batch_norm=True, use_cbam=False).
    x_nchw: (N, Ci, H, W) f32 -> (N, Co, H, W) f32 (BatchNorm in training mode)."""
    N, Ci, H, W = x_nchw.shape
    Co = params["w1"].shape[-1]

    # TODO(synk): NCHW<->NHWC boundary transposes kept only because the spec is
    # a PyTorch NCHW module; in an end-to-end NHWC model they would be dropped.
    x = jnp.transpose(x_nchw, (0, 2, 3, 1)).astype(jnp.float32)

    # Weights pre-flattened for im2col ((ky,kx,ci) row-major -> (9*Ci, Co)) and
    # pre-cast to bf16 for the MXU.  Conv biases are intentionally unused: the
    # training-mode BN mean subtraction cancels them exactly.
    w1 = params["w1"].reshape(9 * Ci, Co).astype(jnp.bfloat16)
    w2 = params["w2"].reshape(9 * Co, Co).astype(jnp.bfloat16)
    w3 = params["w3"].reshape(9 * Co, Co).astype(jnp.bfloat16)

    ones_ci = jnp.ones((1, Ci), jnp.float32)    # placeholders (unused, layer 1)
    zeros_ci = jnp.zeros((1, Ci), jnp.float32)
    count = float(N * H * W)

    y1, st1 = _conv_bn_stats_pass(x, w1, ones_ci, zeros_ci, apply_prev=False, Co=Co)
    sc1, sh1 = _bn_scale_shift(st1, params["g1"], params["be1"], count)

    y2, st2 = _conv_bn_stats_pass(y1, w2, sc1, sh1, apply_prev=True, Co=Co)
    sc2, sh2 = _bn_scale_shift(st2, params["g2"], params["be2"], count)

    y3, st3 = _conv_bn_stats_pass(y2, w3, sc2, sh2, apply_prev=True, Co=Co)
    sc3, sh3 = _bn_scale_shift(st3, params["g3"], params["be3"], count)

    out = pl.pallas_call(
        _make_fuse_kernel(Co),
        out_shape=jax.ShapeDtypeStruct((N, H, W, Co), jnp.float32),
        grid=(N,),
        in_specs=[pl.BlockSpec((1, H, W, Co), lambda n: (n, 0, 0, 0)),
                  pl.BlockSpec((1, H, W, Co), lambda n: (n, 0, 0, 0)),
                  pl.BlockSpec((1, Co), lambda n: (0, 0)),
                  pl.BlockSpec((1, Co), lambda n: (0, 0)),
                  pl.BlockSpec((1, Co), lambda n: (0, 0)),
                  pl.BlockSpec((1, Co), lambda n: (0, 0))],
        out_specs=pl.BlockSpec((1, H, W, Co), lambda n: (n, 0, 0, 0)),
        compiler_params=pltpu.CompilerParams(
            dimension_semantics=("parallel",),
            vmem_limit_bytes=_VMEM_LIMIT),
    )(y1, y3, sc1, sh1, sc3, sh3)

    return jnp.transpose(out, (0, 3, 1, 2))


# ---------------- pure-JAX references (for correctness checks) --------------
def _ref_block(x_nchw, params):
    """Faithful f32 reference (conv bias included, two-pass BN)."""
    x = jnp.transpose(x_nchw, (0, 2, 3, 1)).astype(jnp.float32)

    def conv(h, w, b):
        y = lax.conv_general_dilated(h, w, (1, 1), ((1, 1), (1, 1)),
                                     dimension_numbers=("NHWC", "HWIO", "NHWC"))
        return y + b.reshape(1, 1, 1, -1)

    def bn(y, g, bt):
        m = jnp.mean(y, axis=(0, 1, 2), keepdims=True)
        v = jnp.mean((y - m) ** 2, axis=(0, 1, 2), keepdims=True)
        return (y - m) * lax.rsqrt(v + EPS) * g.reshape(1, 1, 1, -1) + bt.reshape(1, 1, 1, -1)

    h = jnp.maximum(bn(conv(x, params["w1"], params["b1"]), params["g1"], params["be1"]), 0.0)
    identity = h
    h = jnp.maximum(bn(conv(h, params["w2"], params["b2"]), params["g2"], params["be2"]), 0.0)
    h = bn(conv(h, params["w3"], params["b3"]), params["g3"], params["be3"])
    out = jnp.maximum(h + identity, 0.0)
    return jnp.transpose(out, (0, 3, 1, 2))


def _ref_block_bf16(x_nchw, params):
    """Reference mirroring the kernel's numerics (bf16 conv operands, f32 acc,
    bias-free convs, one-pass variance, scale/shift BN) for a tight check."""
    x = jnp.transpose(x_nchw, (0, 2, 3, 1)).astype(jnp.float32)

    def conv(h, w):
        return lax.conv_general_dilated(
            h.astype(jnp.bfloat16), w.astype(jnp.bfloat16), (1, 1),
            ((1, 1), (1, 1)), dimension_numbers=("NHWC", "HWIO", "NHWC"),
            preferred_element_type=jnp.float32)

    def bn_affine(y, g, b):
        m = jnp.mean(y, axis=(0, 1, 2))
        v = jnp.maximum(jnp.mean(y * y, axis=(0, 1, 2)) - m * m, 0.0)
        scale = g.reshape(-1) * lax.rsqrt(v + EPS)
        shift = b.reshape(-1) - m * scale
        return y * scale + shift

    y1 = conv(x, params["w1"])
    h1 = jnp.maximum(bn_affine(y1, params["g1"], params["be1"]), 0.0)
    y2 = conv(h1, params["w2"])
    h2 = jnp.maximum(bn_affine(y2, params["g2"], params["be2"]), 0.0)
    y3 = conv(h2, params["w3"])
    out = jnp.maximum(bn_affine(y3, params["g3"], params["be3"]) + h1, 0.0)
    return jnp.transpose(out, (0, 3, 1, 2))


def _init_params(key, in_size, out_size):
    """Deterministic synthetic init (shapes match nn.Conv2d / nn.BatchNorm2d)."""
    ks = jax.random.split(key, 6)
    params = {}
    fan1 = in_size * 9
    fan2 = out_size * 9

    def uconv(k, ci, co, fan):
        s = 1.0 / jnp.sqrt(fan)
        return jax.random.uniform(k, (3, 3, ci, co), jnp.float32, -s, s)  # HWIO

    def ubias(k, co, fan):
        s = 1.0 / jnp.sqrt(fan)
        return jax.random.uniform(k, (1, co), jnp.float32, -s, s)

    params["w1"], params["b1"] = uconv(ks[0], in_size, out_size, fan1), ubias(ks[1], out_size, fan1)
    params["w2"], params["b2"] = uconv(ks[2], out_size, out_size, fan2), ubias(ks[3], out_size, fan2)
    params["w3"], params["b3"] = uconv(ks[4], out_size, out_size, fan2), ubias(ks[5], out_size, fan2)
    for i in (1, 2, 3):
        params[f"g{i}"] = jnp.ones((1, out_size), jnp.float32)    # BN gamma init
        params[f"be{i}"] = jnp.zeros((1, out_size), jnp.float32)  # BN beta init
    return params


if __name__ == "__main__":
    key = jax.random.PRNGKey(0)
    kx, kp = jax.random.split(key)

    N, Ci, Co, H, W = 2, 4, 8, 16, 16
    x = jax.random.normal(kx, (N, Ci, H, W), jnp.float32)          # NCHW like PyTorch
    params = _init_params(kp, Ci, Co)

    out = jax.block_until_ready(jax.jit(unet_res_conv_block)(x, params))
    assert out.shape == (N, Co, H, W)

    # Tight check vs a reference that mirrors the kernel's bf16-operand math.
    ref_bf16 = jax.block_until_ready(_ref_block_bf16(x, params))
    err_tight = float(jnp.max(jnp.abs(out - ref_bf16)))
    assert err_tight < 5e-3, f"mismatch vs bf16-operand reference: {err_tight}"

    # Loose sanity check vs the faithful f32 PyTorch-style reference
    # (difference is only bf16 operand quantization in the convs, ~1e-2).
    ref_f32 = jax.block_until_ready(_ref_block(x, params))
    err_loose = float(jnp.max(jnp.abs(out - ref_f32)))
    assert err_loose < 1e-1, f"mismatch vs f32 reference: {err_loose}"

    print("KERNEL_OK")
</pallas_src>

<mosaic_0001>
module attributes {stable_mosaic.version = 11 : i64} {
  func.func @kernel(%arg0: i32, %arg1: memref<1x16x16x4xf32, #tpu.memory_space<vmem>>, %arg2: memref<36x8xbf16, #tpu.memory_space<vmem>>, %arg3: memref<1x4xf32, #tpu.memory_space<vmem>>, %arg4: memref<1x4xf32, #tpu.memory_space<vmem>>, %arg5: memref<1x16x16x8xf32, #tpu.memory_space<vmem>>, %arg6: memref<1x2x8xf32, #tpu.memory_space<vmem>>, %arg7: memref<18x18x4xf32, #tpu.memory_space<vmem>>) attributes {dimension_semantics = [#tpu.dimension_semantics<parallel>], iteration_bounds = array<i64: 2>, scalar_prefetch = 0 : i64, scratch_operands = 1 : i64, tpu.core_type = #tpu.core_type<tc>, window_params = [{transform_indices = @transform_0, window_bounds = array<i64: 1, 16, 16, 4>}, {pipeline_mode = #tpu.pipeline_mode<synchronous>, transform_indices = @transform_1, window_bounds = array<i64: 36, 8>}, {pipeline_mode = #tpu.pipeline_mode<synchronous>, transform_indices = @transform_2, window_bounds = array<i64: 1, 4>}, {pipeline_mode = #tpu.pipeline_mode<synchronous>, transform_indices = @transform_3, window_bounds = array<i64: 1, 4>}, {transform_indices = @transform_4, window_bounds = array<i64: 1, 16, 16, 8>}, {transform_indices = @transform_5, window_bounds = array<i64: 1, 2, 8>}]} {
    %cst = arith.constant 0.000000e+00 : f32
    %0 = vector.broadcast %cst : f32 to vector<1x18x4xf32>
    %cst_0 = arith.constant 0.000000e+00 : f32
    %1 = vector.broadcast %cst_0 : f32 to vector<18x1x4xf32>
    %c0 = arith.constant 0 : index
    %c0_1 = arith.constant 0 : index
    %c0_2 = arith.constant 0 : index
    %2 = vector.load %arg7[%c0, %c0_1, %c0_2] : memref<18x18x4xf32, #tpu.memory_space<vmem>>, vector<1x18x4xf32>
    tpu.vector_store %arg7[%c0, %c0_1, %c0_2], %0 {strides = array<i32>} : memref<18x18x4xf32, #tpu.memory_space<vmem>>, vector<1x18x4xf32>,
    %c17 = arith.constant 17 : index
    %c0_3 = arith.constant 0 : index
    %c0_4 = arith.constant 0 : index
    %3 = vector.load %arg7[%c17, %c0_3, %c0_4] : memref<18x18x4xf32, #tpu.memory_space<vmem>>, vector<1x18x4xf32>
    tpu.vector_store %arg7[%c17, %c0_3, %c0_4], %0 {strides = array<i32>} : memref<18x18x4xf32, #tpu.memory_space<vmem>>, vector<1x18x4xf32>,
    %c0_5 = arith.constant 0 : index
    %c0_6 = arith.constant 0 : index
    %c0_7 = arith.constant 0 : index
    %4 = vector.load %arg7[%c0_5, %c0_6, %c0_7] : memref<18x18x4xf32, #tpu.memory_space<vmem>>, vector<18x1x4xf32>
    tpu.vector_store %arg7[%c0_5, %c0_6, %c0_7], %1 {strides = array<i32>} : memref<18x18x4xf32, #tpu.memory_space<vmem>>, vector<18x1x4xf32>,
    %c0_8 = arith.constant 0 : index
    %c17_9 = arith.constant 17 : index
    %c0_10 = arith.constant 0 : index
    %5 = vector.load %arg7[%c0_8, %c17_9, %c0_10] : memref<18x18x4xf32, #tpu.memory_space<vmem>>, vector<18x1x4xf32>
    tpu.vector_store %arg7[%c0_8, %c17_9, %c0_10], %1 {strides = array<i32>} : memref<18x18x4xf32, #tpu.memory_space<vmem>>, vector<18x1x4xf32>,
    %c0_11 = arith.constant 0 : index
    %c0_12 = arith.constant 0 : index
    %c0_13 = arith.constant 0 : index
    %c0_14 = arith.constant 0 : index
    %6 = vector.load %arg1[%c0_11, %c0_12, %c0_13, %c0_14] : memref<1x16x16x4xf32, #tpu.memory_space<vmem>>, vector<1x16x16x4xf32>
    %7 = vector.shape_cast %6 : vector<1x16x16x4xf32> to vector<16x16x4xf32>
    %c1 = arith.constant 1 : index
    %c1_15 = arith.constant 1 : index
    %c0_16 = arith.constant 0 : index
    %8 = vector.load %arg7[%c1, %c1_15, %c0_16] : memref<18x18x4xf32, #tpu.memory_space<vmem>>, vector<16x16x4xf32>
    tpu.vector_store %arg7[%c1, %c1_15, %c0_16], %7 {strides = array<i32>} : memref<18x18x4xf32, #tpu.memory_space<vmem>>, vector<16x16x4xf32>,
    %c0_17 = arith.constant 0 : index
    %c0_18 = arith.constant 0 : index
    %c0_19 = arith.constant 0 : index
    %9 = vector.load %arg7[%c0_17, %c0_18, %c0_19] : memref<18x18x4xf32, #tpu.memory_space<vmem>>, vector<16x16x4xf32>
    %c0_20 = arith.constant 0 : index
    %c1_21 = arith.constant 1 : index
    %c0_22 = arith.constant 0 : index
    %10 = vector.load %arg7[%c0_20, %c1_21, %c0_22] : memref<18x18x4xf32, #tpu.memory_space<vmem>>, vector<16x16x4xf32>
    %c0_23 = arith.constant 0 : index
    %c2 = arith.constant 2 : index
    %c0_24 = arith.constant 0 : index
    %11 = vector.load %arg7[%c0_23, %c2, %c0_24] : memref<18x18x4xf32, #tpu.memory_space<vmem>>, vector<16x16x4xf32>
    %c1_25 = arith.constant 1 : index
    %c0_26 = arith.constant 0 : index
    %c0_27 = arith.constant 0 : index
    %12 = vector.load %arg7[%c1_25, %c0_26, %c0_27] : memref<18x18x4xf32, #tpu.memory_space<vmem>>, vector<16x16x4xf32>
    %c1_28 = arith.constant 1 : index
    %c1_29 = arith.constant 1 : index
    %c0_30 = arith.constant 0 : index
    %13 = vector.load %arg7[%c1_28, %c1_29, %c0_30] : memref<18x18x4xf32, #tpu.memory_space<vmem>>, vector<16x16x4xf32>
    %c1_31 = arith.constant 1 : index
    %c2_32 = arith.constant 2 : index
    %c0_33 = arith.constant 0 : index
    %14 = vector.load %arg7[%c1_31, %c2_32, %c0_33] : memref<18x18x4xf32, #tpu.memory_space<vmem>>, vector<16x16x4xf32>
    %c2_34 = arith.constant 2 : index
    %c0_35 = arith.constant 0 : index
    %c0_36 = arith.constant 0 : index
    %15 = vector.load %arg7[%c2_34, %c0_35, %c0_36] : memref<18x18x4xf32, #tpu.memory_space<vmem>>, vector<16x16x4xf32>
    %c2_37 = arith.constant 2 : index
    %c1_38 = arith.constant 1 : index
    %c0_39 = arith.constant 0 : index
    %16 = vector.load %arg7[%c2_37, %c1_38, %c0_39] : memref<18x18x4xf32, #tpu.memory_space<vmem>>, vector<16x16x4xf32>
    %c2_40 = arith.constant 2 : index
    %c2_41 = arith.constant 2 : index
    %c0_42 = arith.constant 0 : index
    %17 = vector.load %arg7[%c2_40, %c2_41, %c0_42] : memref<18x18x4xf32, #tpu.memory_space<vmem>>, vector<16x16x4xf32>
    %18 = tpu.concatenate %9, %10, %11, %12, %13, %14, %15, %16, %17 in 2 : vector<16x16x4xf32>, vector<16x16x4xf32>, vector<16x16x4xf32>, vector<16x16x4xf32>, vector<16x16x4xf32>, vector<16x16x4xf32>, vector<16x16x4xf32>, vector<16x16x4xf32>, vector<16x16x4xf32> -> vector<16x16x36xf32>
    %19 = vector.shape_cast %18 : vector<16x16x36xf32> to vector<256x36xf32>
    %20 = arith.truncf %19 : vector<256x36xf32> to vector<256x36xbf16>
    %c0_43 = arith.constant 0 : index
    %c0_44 = arith.constant 0 : index
    %21 = vector.load %arg2[%c0_43, %c0_44] : memref<36x8xbf16, #tpu.memory_space<vmem>>, vector<36x8xbf16>
    %cst_45 = arith.constant dense<0.000000e+00> : vector<256x8xf32>
    %22 = tpu.matmul %20, %21, %cst_45 {dimension_numbers = #tpu.dot_dimension_numbers<[1], [0], [0], [1], [0, 0, 1, 1], [], []>} : vector<256x36xbf16>, vector<36x8xbf16>, vector<256x8xf32> -> vector<256x8xf32>
    %cst_46 = arith.constant dense<0.000000e+00> : vector<8xf32>
    %23 = vector.multi_reduction <add>, %22, %cst_46 [0] : vector<256x8xf32> to vector<8xf32>
    %24 = vector.shape_cast %23 : vector<8xf32> to vector<1x8xf32>
    %25 = arith.mulf %22, %22 : vector<256x8xf32>
    %cst_47 = arith.constant dense<0.000000e+00> : vector<8xf32>
    %26 = vector.multi_reduction <add>, %25, %cst_47 [0] : vector<256x8xf32> to vector<8xf32>
    %27 = vector.shape_cast %26 : vector<8xf32> to vector<1x8xf32>
    %28 = tpu.concatenate %24, %27 in 0 : vector<1x8xf32>, vector<1x8xf32> -> vector<2x8xf32>
    %29 = vector.shape_cast %28 : vector<2x8xf32> to vector<1x2x8xf32>
    %c0_48 = arith.constant 0 : index
    %c0_49 = arith.constant 0 : index
    %c0_50 = arith.constant 0 : index
    %30 = vector.load %arg6[%c0_48, %c0_49, %c0_50] : memref<1x2x8xf32, #tpu.memory_space<vmem>>, vector<1x2x8xf32>
    tpu.vector_store %arg6[%c0_48, %c0_49, %c0_50], %29 {strides = array<i32>} : memref<1x2x8xf32, #tpu.memory_space<vmem>>, vector<1x2x8xf32>,
    %31 = vector.shape_cast %22 : vector<256x8xf32> to vector<1x16x16x8xf32>
    %c0_51 = arith.constant 0 : index
    %c0_52 = arith.constant 0 : index
    %c0_53 = arith.constant 0 : index
    %c0_54 = arith.constant 0 : index
    %32 = vector.load %arg5[%c0_51, %c0_52, %c0_53, %c0_54] : memref<1x16x16x8xf32, #tpu.memory_space<vmem>>, vector<1x16x16x8xf32>
    tpu.vector_store %arg5[%c0_51, %c0_52, %c0_53, %c0_54], %31 {strides = array<i32>} : memref<1x16x16x8xf32, #tpu.memory_space<vmem>>, vector<1x16x16x8xf32>,
    return
  }
  func.func @transform_0(%arg0: i32) -> (i32, i32, i32, i32) {
    %c0_i32 = arith.constant 0 : i32
    %c0_i32_0 = arith.constant 0 : i32
    %c0_i32_1 = arith.constant 0 : i32
    %c0_i32_2 = arith.constant 0 : i32
    return %arg0, %c0_i32, %c0_i32_0, %c0_i32_1 : i32, i32, i32, i32
  }
  func.func @transform_1(%arg0: i32) -> (i32, i32) {
    %c0_i32 = arith.constant 0 : i32
    %c0_i32_0 = arith.constant 0 : i32
    %c0_i32_1 = arith.constant 0 : i32
    return %c0_i32, %c0_i32_0 : i32, i32
  }
  func.func @transform_2(%arg0: i32) -> (i32, i32) {
    %c0_i32 = arith.constant 0 : i32
    %c0_i32_0 = arith.constant 0 : i32
    %c0_i32_1 = arith.constant 0 : i32
    return %c0_i32, %c0_i32_0 : i32, i32
  }
  func.func @transform_3(%arg0: i32) -> (i32, i32) {
    %c0_i32 = arith.constant 0 : i32
    %c0_i32_0 = arith.constant 0 : i32
    %c0_i32_1 = arith.constant 0 : i32
    return %c0_i32, %c0_i32_0 : i32, i32
  }
  func.func @transform_4(%arg0: i32) -> (i32, i32, i32, i32) {
    %c0_i32 = arith.constant 0 : i32
    %c0_i32_0 = arith.constant 0 : i32
    %c0_i32_1 = arith.constant 0 : i32
    %c0_i32_2 = arith.constant 0 : i32
    return %arg0, %c0_i32, %c0_i32_0, %c0_i32_1 : i32, i32, i32, i32
  }
  func.func @transform_5(%arg0: i32) -> (i32, i32, i32) {
    %c0_i32 = arith.constant 0 : i32
    %c0_i32_0 = arith.constant 0 : i32
    %c0_i32_1 = arith.constant 0 : i32
    return %arg0, %c0_i32, %c0_i32_0 : i32, i32, i32
  }
}

module attributes {stable_mosaic.version = 11 : i64} {
  func.func @kernel(%arg0: i32, %arg1: memref<1x16x16x8xf32, #tpu.memory_space<vmem>>, %arg2: memref<1x16x16x8xf32, #tpu.memory_space<vmem>>, %arg3: memref<1x8xf32, #tpu.memory_space<vmem>>, %arg4: memref<1x8xf32, #tpu.memory_space<vmem>>, %arg5: memref<1x8xf32, #tpu.memory_space<vmem>>, %arg6: memref<1x8xf32, #tpu.memory_space<vmem>>, %arg7: memref<1x16x16x8xf32, #tpu.memory_space<vmem>>) attributes {dimension_semantics = [#tpu.dimension_semantics<parallel>], iteration_bounds = array<i64: 2>, scalar_prefetch = 0 : i64, scratch_operands = 0 : i64, tpu.core_type = #tpu.core_type<tc>, window_params = [{transform_indices = @transform_0, window_bounds = array<i64: 1, 16, 16, 8>}, {transform_indices = @transform_1, window_bounds = array<i64: 1, 16, 16, 8>}, {pipeline_mode = #tpu.pipeline_mode<synchronous>, transform_indices = @transform_2, window_bounds = array<i64: 1, 8>}, {pipeline_mode = #tpu.pipeline_mode<synchronous>, transform_indices = @transform_3, window_bounds = array<i64: 1, 8>}, {pipeline_mode = #tpu.pipeline_mode<synchronous>, transform_indices = @transform_4, window_bounds = array<i64: 1, 8>}, {pipeline_mode = #tpu.pipeline_mode<synchronous>, transform_indices = @transform_5, window_bounds = array<i64: 1, 8>}, {transform_indices = @transform_6, window_bounds = array<i64: 1, 16, 16, 8>}]} {
    %c0 = arith.constant 0 : index
    %c0_0 = arith.constant 0 : index
    %0 = vector.load %arg3[%c0, %c0_0] : memref<1x8xf32, #tpu.memory_space<vmem>>, vector<1x8xf32>
    %1 = vector.shape_cast %0 : vector<1x8xf32> to vector<1x1x1x8xf32>
    %c0_1 = arith.constant 0 : index
    %c0_2 = arith.constant 0 : index
    %2 = vector.load %arg4[%c0_1, %c0_2] : memref<1x8xf32, #tpu.memory_space<vmem>>, vector<1x8xf32>
    %3 = vector.shape_cast %2 : vector<1x8xf32> to vector<1x1x1x8xf32>
    %c0_3 = arith.constant 0 : index
    %c0_4 = arith.constant 0 : index
    %4 = vector.load %arg5[%c0_3, %c0_4] : memref<1x8xf32, #tpu.memory_space<vmem>>, vector<1x8xf32>
    %5 = vector.shape_cast %4 : vector<1x8xf32> to vector<1x1x1x8xf32>
    %c0_5 = arith.constant 0 : index
    %c0_6 = arith.constant 0 : index
    %6 = vector.load %arg6[%c0_5, %c0_6] : memref<1x8xf32, #tpu.memory_space<vmem>>, vector<1x8xf32>
    %7 = vector.shape_cast %6 : vector<1x8xf32> to vector<1x1x1x8xf32>
    %c0_7 = arith.constant 0 : index
    %c0_8 = arith.constant 0 : index
    %c0_9 = arith.constant 0 : index
    %c0_10 = arith.constant 0 : index
    %8 = vector.load %arg1[%c0_7, %c0_8, %c0_9, %c0_10] : memref<1x16x16x8xf32, #tpu.memory_space<vmem>>, vector<1x16x16x8xf32>
    %9 = vector.broadcast %1 : vector<1x1x1x8xf32> to vector<1x16x16x8xf32>
    %10 = arith.mulf %8, %9 : vector<1x16x16x8xf32>
    %11 = vector.broadcast %3 : vector<1x1x1x8xf32> to vector<1x16x16x8xf32>
    %12 = arith.addf %10, %11 : vector<1x16x16x8xf32>
    %cst = arith.constant 0.000000e+00 : f32
    %13 = vector.broadcast %cst : f32 to vector<1x16x16x8xf32>
    %14 = arith.maximumf %12, %13 : vector<1x16x16x8xf32>
    %c0_11 = arith.constant 0 : index
    %c0_12 = arith.constant 0 : index
    %c0_13 = arith.constant 0 : index
    %c0_14 = arith.constant 0 : index
    %15 = vector.load %arg2[%c0_11, %c0_12, %c0_13, %c0_14] : memref<1x16x16x8xf32, #tpu.memory_space<vmem>>, vector<1x16x16x8xf32>
    %16 = vector.broadcast %5 : vector<1x1x1x8xf32> to vector<1x16x16x8xf32>
    %17 = arith.mulf %15, %16 : vector<1x16x16x8xf32>
    %18 = vector.broadcast %7 : vector<1x1x1x8xf32> to vector<1x16x16x8xf32>
    %19 = arith.addf %17, %18 : vector<1x16x16x8xf32>
    %20 = arith.addf %19, %14 : vector<1x16x16x8xf32>
    %cst_15 = arith.constant 0.000000e+00 : f32
    %21 = vector.broadcast %cst_15 : f32 to vector<1x16x16x8xf32>
    %22 = arith.maximumf %20, %21 : vector<1x16x16x8xf32>
    %c0_16 = arith.constant 0 : index
    %c0_17 = arith.constant 0 : index
    %c0_18 = arith.constant 0 : index
    %c0_19 = arith.constant 0 : index
    %23 = vector.load %arg7[%c0_16, %c0_17, %c0_18, %c0_19] : memref<1x16x16x8xf32, #tpu.memory_space<vmem>>, vector<1x16x16x8xf32>
    tpu.vector_store %arg7[%c0_16, %c0_17, %c0_18, %c0_19], %22 {strides = array<i32>} : memref<1x16x16x8xf32, #tpu.memory_space<vmem>>, vector<1x16x16x8xf32>,
    return
  }
  func.func @transform_0(%arg0: i32) -> (i32, i32, i32, i32) {
    %c0_i32 = arith.constant 0 : i32
    %c0_i32_0 = arith.constant 0 : i32
    %c0_i32_1 = arith.constant 0 : i32
    %c0_i32_2 = arith.constant 0 : i32
    return %arg0, %c0_i32, %c0_i32_0, %c0_i32_1 : i32, i32, i32, i32
  }
  func.func @transform_1(%arg0: i32) -> (i32, i32, i32, i32) {
    %c0_i32 = arith.constant 0 : i32
    %c0_i32_0 = arith.constant 0 : i32
    %c0_i32_1 = arith.constant 0 : i32
    %c0_i32_2 = arith.constant 0 : i32
    return %arg0, %c0_i32, %c0_i32_0, %c0_i32_1 : i32, i32, i32, i32
  }
  func.func @transform_2(%arg0: i32) -> (i32, i32) {
    %c0_i32 = arith.constant 0 : i32
    %c0_i32_0 = arith.constant 0 : i32
    %c0_i32_1 = arith.constant 0 : i32
    return %c0_i32, %c0_i32_0 : i32, i32
  }
  func.func @transform_3(%arg0: i32) -> (i32, i32) {
    %c0_i32 = arith.constant 0 : i32
    %c0_i32_0 = arith.constant 0 : i32
    %c0_i32_1 = arith.constant 0 : i32
    return %c0_i32, %c0_i32_0 : i32, i32
  }
  func.func @transform_4(%arg0: i32) -> (i32, i32) {
    %c0_i32 = arith.constant 0 : i32
    %c0_i32_0 = arith.constant 0 : i32
    %c0_i32_1 = arith.constant 0 : i32
    return %c0_i32, %c0_i32_0 : i32, i32
  }
  func.func @transform_5(%arg0: i32) -> (i32, i32) {
    %c0_i32 = arith.constant 0 : i32
    %c0_i32_0 = arith.constant 0 : i32
    %c0_i32_1 = arith.constant 0 : i32
    return %c0_i32, %c0_i32_0 : i32, i32
  }
  func.func @transform_6(%arg0: i32) -> (i32, i32, i32, i32) {
    %c0_i32 = arith.constant 0 : i32
    %c0_i32_0 = arith.constant 0 : i32
    %c0_i32_1 = arith.constant 0 : i32
    %c0_i32_2 = arith.constant 0 : i32
    return %arg0, %c0_i32, %c0_i32_0, %c0_i32_1 : i32, i32, i32, i32
  }
}

module attributes {stable_mosaic.version = 11 : i64} {
  func.func @kernel(%arg0: i32, %arg1: memref<1x16x16x8xf32, #tpu.memory_space<vmem>>, %arg2: memref<72x8xbf16, #tpu.memory_space<vmem>>, %arg3: memref<1x8xf32, #tpu.memory_space<vmem>>, %arg4: memref<1x8xf32, #tpu.memory_space<vmem>>, %arg5: memref<1x16x16x8xf32, #tpu.memory_space<vmem>>, %arg6: memref<1x2x8xf32, #tpu.memory_space<vmem>>, %arg7: memref<18x18x8xf32, #tpu.memory_space<vmem>>) attributes {dimension_semantics = [#tpu.dimension_semantics<parallel>], iteration_bounds = array<i64: 2>, scalar_prefetch = 0 : i64, scratch_operands = 1 : i64, tpu.core_type = #tpu.core_type<tc>, window_params = [{transform_indices = @transform_0, window_bounds = array<i64: 1, 16, 16, 8>}, {pipeline_mode = #tpu.pipeline_mode<synchronous>, transform_indices = @transform_1, window_bounds = array<i64: 72, 8>}, {pipeline_mode = #tpu.pipeline_mode<synchronous>, transform_indices = @transform_2, window_bounds = array<i64: 1, 8>}, {pipeline_mode = #tpu.pipeline_mode<synchronous>, transform_indices = @transform_3, window_bounds = array<i64: 1, 8>}, {transform_indices = @transform_4, window_bounds = array<i64: 1, 16, 16, 8>}, {transform_indices = @transform_5, window_bounds = array<i64: 1, 2, 8>}]} {
    %cst = arith.constant 0.000000e+00 : f32
    %0 = vector.broadcast %cst : f32 to vector<1x18x8xf32>
    %cst_0 = arith.constant 0.000000e+00 : f32
    %1 = vector.broadcast %cst_0 : f32 to vector<18x1x8xf32>
    %c0 = arith.constant 0 : index
    %c0_1 = arith.constant 0 : index
    %c0_2 = arith.constant 0 : index
    %2 = vector.load %arg7[%c0, %c0_1, %c0_2] : memref<18x18x8xf32, #tpu.memory_space<vmem>>, vector<1x18x8xf32>
    tpu.vector_store %arg7[%c0, %c0_1, %c0_2], %0 {strides = array<i32>} : memref<18x18x8xf32, #tpu.memory_space<vmem>>, vector<1x18x8xf32>,
    %c17 = arith.constant 17 : index
    %c0_3 = arith.constant 0 : index
    %c0_4 = arith.constant 0 : index
    %3 = vector.load %arg7[%c17, %c0_3, %c0_4] : memref<18x18x8xf32, #tpu.memory_space<vmem>>, vector<1x18x8xf32>
    tpu.vector_store %arg7[%c17, %c0_3, %c0_4], %0 {strides = array<i32>} : memref<18x18x8xf32, #tpu.memory_space<vmem>>, vector<1x18x8xf32>,
    %c0_5 = arith.constant 0 : index
    %c0_6 = arith.constant 0 : index
    %c0_7 = arith.constant 0 : index
    %4 = vector.load %arg7[%c0_5, %c0_6, %c0_7] : memref<18x18x8xf32, #tpu.memory_space<vmem>>, vector<18x1x8xf32>
    tpu.vector_store %arg7[%c0_5, %c0_6, %c0_7], %1 {strides = array<i32>} : memref<18x18x8xf32, #tpu.memory_space<vmem>>, vector<18x1x8xf32>,
    %c0_8 = arith.constant 0 : index
    %c17_9 = arith.constant 17 : index
    %c0_10 = arith.constant 0 : index
    %5 = vector.load %arg7[%c0_8, %c17_9, %c0_10] : memref<18x18x8xf32, #tpu.memory_space<vmem>>, vector<18x1x8xf32>
    tpu.vector_store %arg7[%c0_8, %c17_9, %c0_10], %1 {strides = array<i32>} : memref<18x18x8xf32, #tpu.memory_space<vmem>>, vector<18x1x8xf32>,
    %c0_11 = arith.constant 0 : index
    %c0_12 = arith.constant 0 : index
    %c0_13 = arith.constant 0 : index
    %c0_14 = arith.constant 0 : index
    %6 = vector.load %arg1[%c0_11, %c0_12, %c0_13, %c0_14] : memref<1x16x16x8xf32, #tpu.memory_space<vmem>>, vector<1x16x16x8xf32>
    %7 = vector.shape_cast %6 : vector<1x16x16x8xf32> to vector<16x16x8xf32>
    %c0_15 = arith.constant 0 : index
    %c0_16 = arith.constant 0 : index
    %8 = vector.load %arg3[%c0_15, %c0_16] : memref<1x8xf32, #tpu.memory_space<vmem>>, vector<1x8xf32>
    %9 = vector.shape_cast %8 : vector<1x8xf32> to vector<1x1x8xf32>
    %10 = vector.broadcast %9 : vector<1x1x8xf32> to vector<16x16x8xf32>
    %11 = arith.mulf %7, %10 : vector<16x16x8xf32>
    %c0_17 = arith.constant 0 : index
    %c0_18 = arith.constant 0 : index
    %12 = vector.load %arg4[%c0_17, %c0_18] : memref<1x8xf32, #tpu.memory_space<vmem>>, vector<1x8xf32>
    %13 = vector.shape_cast %12 : vector<1x8xf32> to vector<1x1x8xf32>
    %14 = vector.broadcast %13 : vector<1x1x8xf32> to vector<16x16x8xf32>
    %15 = arith.addf %11, %14 : vector<16x16x8xf32>
    %cst_19 = arith.constant 0.000000e+00 : f32
    %16 = vector.broadcast %cst_19 : f32 to vector<16x16x8xf32>
    %17 = arith.maximumf %15, %16 : vector<16x16x8xf32>
    %c1 = arith.constant 1 : index
    %c1_20 = arith.constant 1 : index
    %c0_21 = arith.constant 0 : index
    %18 = vector.load %arg7[%c1, %c1_20, %c0_21] : memref<18x18x8xf32, #tpu.memory_space<vmem>>, vector<16x16x8xf32>
    tpu.vector_store %arg7[%c1, %c1_20, %c0_21], %17 {strides = array<i32>} : memref<18x18x8xf32, #tpu.memory_space<vmem>>, vector<16x16x8xf32>,
    %c0_22 = arith.constant 0 : index
    %c0_23 = arith.constant 0 : index
    %c0_24 = arith.constant 0 : index
    %19 = vector.load %arg7[%c0_22, %c0_23, %c0_24] : memref<18x18x8xf32, #tpu.memory_space<vmem>>, vector<16x16x8xf32>
    %c0_25 = arith.constant 0 : index
    %c1_26 = arith.constant 1 : index
    %c0_27 = arith.constant 0 : index
    %20 = vector.load %arg7[%c0_25, %c1_26, %c0_27] : memref<18x18x8xf32, #tpu.memory_space<vmem>>, vector<16x16x8xf32>
    %c0_28 = arith.constant 0 : index
    %c2 = arith.constant 2 : index
    %c0_29 = arith.constant 0 : index
    %21 = vector.load %arg7[%c0_28, %c2, %c0_29] : memref<18x18x8xf32, #tpu.memory_space<vmem>>, vector<16x16x8xf32>
    %c1_30 = arith.constant 1 : index
    %c0_31 = arith.constant 0 : index
    %c0_32 = arith.constant 0 : index
    %22 = vector.load %arg7[%c1_30, %c0_31, %c0_32] : memref<18x18x8xf32, #tpu.memory_space<vmem>>, vector<16x16x8xf32>
    %c1_33 = arith.constant 1 : index
    %c1_34 = arith.constant 1 : index
    %c0_35 = arith.constant 0 : index
    %23 = vector.load %arg7[%c1_33, %c1_34, %c0_35] : memref<18x18x8xf32, #tpu.memory_space<vmem>>, vector<16x16x8xf32>
    %c1_36 = arith.constant 1 : index
    %c2_37 = arith.constant 2 : index
    %c0_38 = arith.constant 0 : index
    %24 = vector.load %arg7[%c1_36, %c2_37, %c0_38] : memref<18x18x8xf32, #tpu.memory_space<vmem>>, vector<16x16x8xf32>
    %c2_39 = arith.constant 2 : index
    %c0_40 = arith.constant 0 : index
    %c0_41 = arith.constant 0 : index
    %25 = vector.load %arg7[%c2_39, %c0_40, %c0_41] : memref<18x18x8xf32, #tpu.memory_space<vmem>>, vector<16x16x8xf32>
    %c2_42 = arith.constant 2 : index
    %c1_43 = arith.constant 1 : index
    %c0_44 = arith.constant 0 : index
    %26 = vector.load %arg7[%c2_42, %c1_43, %c0_44] : memref<18x18x8xf32, #tpu.memory_space<vmem>>, vector<16x16x8xf32>
    %c2_45 = arith.constant 2 : index
    %c2_46 = arith.constant 2 : index
    %c0_47 = arith.constant 0 : index
    %27 = vector.load %arg7[%c2_45, %c2_46, %c0_47] : memref<18x18x8xf32, #tpu.memory_space<vmem>>, vector<16x16x8xf32>
    %28 = tpu.concatenate %19, %20, %21, %22, %23, %24, %25, %26, %27 in 2 : vector<16x16x8xf32>, vector<16x16x8xf32>, vector<16x16x8xf32>, vector<16x16x8xf32>, vector<16x16x8xf32>, vector<16x16x8xf32>, vector<16x16x8xf32>, vector<16x16x8xf32>, vector<16x16x8xf32> -> vector<16x16x72xf32>
    %29 = vector.shape_cast %28 : vector<16x16x72xf32> to vector<256x72xf32>
    %30 = arith.truncf %29 : vector<256x72xf32> to vector<256x72xbf16>
    %c0_48 = arith.constant 0 : index
    %c0_49 = arith.constant 0 : index
    %31 = vector.load %arg2[%c0_48, %c0_49] : memref<72x8xbf16, #tpu.memory_space<vmem>>, vector<72x8xbf16>
    %cst_50 = arith.constant dense<0.000000e+00> : vector<256x8xf32>
    %32 = tpu.matmul %30, %31, %cst_50 {dimension_numbers = #tpu.dot_dimension_numbers<[1], [0], [0], [1], [0, 0, 1, 1], [], []>} : vector<256x72xbf16>, vector<72x8xbf16>, vector<256x8xf32> -> vector<256x8xf32>
    %cst_51 = arith.constant dense<0.000000e+00> : vector<8xf32>
    %33 = vector.multi_reduction <add>, %32, %cst_51 [0] : vector<256x8xf32> to vector<8xf32>
    %34 = vector.shape_cast %33 : vector<8xf32> to vector<1x8xf32>
    %35 = arith.mulf %32, %32 : vector<256x8xf32>
    %cst_52 = arith.constant dense<0.000000e+00> : vector<8xf32>
    %36 = vector.multi_reduction <add>, %35, %cst_52 [0] : vector<256x8xf32> to vector<8xf32>
    %37 = vector.shape_cast %36 : vector<8xf32> to vector<1x8xf32>
    %38 = tpu.concatenate %34, %37 in 0 : vector<1x8xf32>, vector<1x8xf32> -> vector<2x8xf32>
    %39 = vector.shape_cast %38 : vector<2x8xf32> to vector<1x2x8xf32>
    %c0_53 = arith.constant 0 : index
    %c0_54 = arith.constant 0 : index
    %c0_55 = arith.constant 0 : index
    %40 = vector.load %arg6[%c0_53, %c0_54, %c0_55] : memref<1x2x8xf32, #tpu.memory_space<vmem>>, vector<1x2x8xf32>
    tpu.vector_store %arg6[%c0_53, %c0_54, %c0_55], %39 {strides = array<i32>} : memref<1x2x8xf32, #tpu.memory_space<vmem>>, vector<1x2x8xf32>,
    %41 = vector.shape_cast %32 : vector<256x8xf32> to vector<1x16x16x8xf32>
    %c0_56 = arith.constant 0 : index
    %c0_57 = arith.constant 0 : index
    %c0_58 = arith.constant 0 : index
    %c0_59 = arith.constant 0 : index
    %42 = vector.load %arg5[%c0_56, %c0_57, %c0_58, %c0_59] : memref<1x16x16x8xf32, #tpu.memory_space<vmem>>, vector<1x16x16x8xf32>
    tpu.vector_store %arg5[%c0_56, %c0_57, %c0_58, %c0_59], %41 {strides = array<i32>} : memref<1x16x16x8xf32, #tpu.memory_space<vmem>>, vector<1x16x16x8xf32>,
    return
  }
  func.func @transform_0(%arg0: i32) -> (i32, i32, i32, i32) {
    %c0_i32 = arith.constant 0 : i32
    %c0_i32_0 = arith.constant 0 : i32
    %c0_i32_1 = arith.constant 0 : i32
    %c0_i32_2 = arith.constant 0 : i32
    return %arg0, %c0_i32, %c0_i32_0, %c0_i32_1 : i32, i32, i32, i32
  }
  func.func @transform_1(%arg0: i32) -> (i32, i32) {
    %c0_i32 = arith.constant 0 : i32
    %c0_i32_0 = arith.constant 0 : i32
    %c0_i32_1 = arith.constant 0 : i32
    return %c0_i32, %c0_i32_0 : i32, i32
  }
  func.func @transform_2(%arg0: i32) -> (i32, i32) {
    %c0_i32 = arith.constant 0 : i32
    %c0_i32_0 = arith.constant 0 : i32
    %c0_i32_1 = arith.constant 0 : i32
    return %c0_i32, %c0_i32_0 : i32, i32
  }
  func.func @transform_3(%arg0: i32) -> (i32, i32) {
    %c0_i32 = arith.constant 0 : i32
    %c0_i32_0 = arith.constant 0 : i32
    %c0_i32_1 = arith.constant 0 : i32
    return %c0_i32, %c0_i32_0 : i32, i32
  }
  func.func @transform_4(%arg0: i32) -> (i32, i32, i32, i32) {
    %c0_i32 = arith.constant 0 : i32
    %c0_i32_0 = arith.constant 0 : i32
    %c0_i32_1 = arith.constant 0 : i32
    %c0_i32_2 = arith.constant 0 : i32
    return %arg0, %c0_i32, %c0_i32_0, %c0_i32_1 : i32, i32, i32, i32
  }
  func.func @transform_5(%arg0: i32) -> (i32, i32, i32) {
    %c0_i32 = arith.constant 0 : i32
    %c0_i32_0 = arith.constant 0 : i32
    %c0_i32_1 = arith.constant 0 : i32
    return %arg0, %c0_i32, %c0_i32_0 : i32, i32, i32
  }
}

</mosaic_0001>

<bundles_post_ra>
// kernel: unet_res_conv_block.7
= control target key start
LH: loop header
LB: loop body
LE: loop exit
PB: predicated region body
PF: predicated region fallthrough
CT: control target
= control target key end

     0   :  { %s759_s21 = smov 0   ;;  %s1066_s0 = inlined_call_operand.vmem [shape: f32[2,16,16,8], index: 0, kind: input, shape index: {}]   ;;  %s1067_s1 = inlined_call_operand.vmem [shape: f32[2,16,16,8], index: 1, kind: input, shape index: {}]   ;;  %s1068_s2 = inlined_call_operand.vmem [shape: f32[1,8], index: 2, kind: input, shape index: {}]   ;;  %s1069_s3 = inlined_call_operand.vmem [shape: f32[1,8], index: 3, kind: input, shape index: {}]   ;;  %s1070_s4 = inlined_call_operand.vmem [shape: f32[1,8], index: 4, kind: input, shape index: {}]   ;;  %s1071_s5 = inlined_call_operand.vmem [shape: f32[1,8], index: 5, kind: input, shape index: {}]   ;;  %s1072_s6 = inlined_call_operand.vmem [shape: f32[2,16,16,8], index: 6, kind: output, shape index: {}]  }
   0x1 LB: > { %s688_s22 = sadd.s32 4294967295, %s722_s21   ;;  %p692_p0 = scmp.ge.s32.totalorder %s722_s21, 1  ;;  %s722_s21 = sphi %s759_s21, %s16_s21  }
   0x2   : > { %p222_p1 = scmp.lt.s32.totalorder %s722_s21, 3 }
   0x4   : > { %p223_p2 = pnand %p692_p0, %p222_p1 }
   0x5   : > { %p257_p3 = scmp.lt.s32.totalorder (!%p223_p2), %s688_s22, 1  ;;  %v772_v0 = vld [vmem:[%s1068_s2] ss:$0 sm:$0xff] (!%p223_p2)  ;;  %vm588_vm0 = vcmask (!%p223_p2), 64512  }
   0x6   : > { %226 = sbr.rel (%p223_p2) target bundleno = 80 (0x50), region = 44  ;;  %v777_v1 = vld [vmem:[%s1070_s4] ss:$0 sm:$0xff] (!%p223_p2) }
   0x7   : > { %v794_v2 = vld [vmem:[%s1069_s3] ss:$0 sm:$0xff] (!%p223_p2) }
   0x8   : > { %v799_v3 = vld [vmem:[%s1071_s5] ss:$0 sm:$0xff] (!%p223_p2) }
   0xd   : > { %s1074_s22 = smov (!%p257_p3, %s688_s22), 1 }
   0xe   : > { %s767_s23 = sshll.u32 %s1074_s22, 8 }
   0xf   : > { %s783_s30 = scalar_lea.vmem %s1066_s0, %s767_s23  ;;  %s789_s9 = scalar_lea.vmem %s1067_s1, %s767_s23 }
  0x10   : > { %v276_v4 = vld [vmem:[%s783_s30] sm:$0xff]  ;;  %v277_v6 = vld [vmem:[%s783_s30 + $0x8] sm:$0xff]  ;;  %v278_v11 = vld [vmem:[%s783_s30 + $0x10] sm:$0xff]  ;;  %s838_s16 = scalar_lea.vmem %s1072_s6, %s767_s23 }
  0x11   : > { %v416_v5 = vld [vmem:[%s789_s9] sm:$0xff]  ;;  %v314_v7 = vmul.f32 %v772_v0, %v276_v4  ;;  %v315_v9 = vmul.f32 %v772_v0, %v277_v6  ;;  %v417_v10 = vld [vmem:[%s789_s9 + $0x8] sm:$0xff]  ;;  %v418_v12 = vld [vmem:[%s789_s9 + $0x10] sm:$0xff]  ;;  %v316_v14 = vmul.f32 %v772_v0, %v278_v11 }
  0x12   : > { %v454_v8 = vmul.f32 %v777_v1, %v416_v5  ;;  %v455_v13 = vmul.f32 %v777_v1, %v417_v10  ;;  %v456_v15 = vmul.f32 %v777_v1, %v418_v12  ;;  %v279_v16 = vld [vmem:[%s783_s30 + $0x18] sm:$0xff]  ;;  %v280_v18 = vld [vmem:[%s783_s30 + $0x20] sm:$0xff]  ;;  %v281_v24 = vld [vmem:[%s783_s30 + $0x28] sm:$0xff] }
  0x13   : > { %v419_v17 = vld [vmem:[%s789_s9 + $0x18] sm:$0xff]  ;;  %v352_v19 = vadd.f32 %v794_v2, %v314_v7  ;;  %v353_v21 = vadd.f32 %v794_v2, %v315_v9  ;;  %v317_v22 = vmul.f32 %v772_v0, %v279_v16  ;;  %v420_v23 = vld [vmem:[%s789_s9 + $0x20] sm:$0xff]  ;;  %v354_v26 = vadd.f32 %v794_v2, %v316_v14  ;;  %v421_v33 = vld [vmem:[%s789_s9 + $0x28] sm:$0xff] }
  0x14   : > { %v492_v20 = vadd.f32 %v799_v3, %v454_v8  ;;  %v493_v25 = vadd.f32 %v799_v3, %v455_v13  ;;  %v494_v27 = vadd.f32 %v799_v3, %v456_v15  ;;  %v457_v28 = vmul.f32 %v777_v1, %v419_v17  ;;  %v282_v42 = vld [vmem:[%s783_s30 + $0x30] sm:$0xff]  ;;  %v283_v48 = vld [vmem:[%s783_s30 + $0x38] sm:$0xff]  ;;  %v284_v54 = vld [vmem:[%s783_s30 + $0x40] sm:$0xff] }
  0x15   : > { %v384_v29 = vmax.f32 %v352_v19, 0.0  ;;  %v385_v30 = vmax.f32 %v353_v21, 0.0  ;;  %v355_v31 = vadd.f32 %v794_v2, %v317_v22  ;;  %v318_v32 = vmul.f32 %v772_v0, %v280_v18  ;;  %v422_v47 = vld [vmem:[%s789_s9 + $0x30] sm:$0xff]  ;;  %v423_v53 = vld [vmem:[%s789_s9 + $0x38] sm:$0xff]  ;;  %v424_v59 = vld [vmem:[%s789_s9 + $0x40] sm:$0xff] }
  0x16   : > { %v386_v34 = vmax.f32 %v354_v26, 0.0  ;;  %v495_v35 = vadd.f32 %v799_v3, %v457_v28  ;;  %v458_v36 = vmul.f32 %v777_v1, %v420_v23  ;;  %v319_v37 = vmul.f32 %v772_v0, %v281_v24  ;;  %v285_v8 = vld [vmem:[%s783_s30 + $0x48] sm:$0xff]  ;;  %v286_v14 = vld [vmem:[%s783_s30 + $0x50] sm:$0xff] }
  0x17   : > { %v524_v38 = vadd.f32 %v492_v20, %v384_v29  ;;  %v525_v39 = vadd.f32 %v493_v25, %v385_v30  ;;  %v387_v40 = vmax.f32 %v355_v31, 0.0  ;;  %v356_v41 = vadd.f32 %v794_v2, %v318_v32  ;;  %v425_v9 = vld [vmem:[%s789_s9 + $0x48] sm:$0xff]  ;;  %v426_v15 = vld [vmem:[%s789_s9 + $0x50] sm:$0xff]  ;;  %v287_v20 = vld [vmem:[%s783_s30 + $0x58] sm:$0xff] }
  0x18   : > { %v526_v43 = vadd.f32 %v494_v27, %v386_v34  ;;  %v496_v44 = vadd.f32 %v799_v3, %v458_v36  ;;  %v357_v45 = vadd.f32 %v794_v2, %v319_v37  ;;  %v459_v46 = vmul.f32 %v777_v1, %v421_v33  ;;  %v427_v29 = vld [vmem:[%s789_s9 + $0x58] sm:$0xff]  ;;  %v288_v34 = vld [vmem:[%s783_s30 + $0x60] sm:$0xff] }
  0x19   : > { %v556_v49 = vmax.f32 %v524_v38, 0.0  ;;  %v557_v50 = vmax.f32 %v525_v39, 0.0  ;;  %v527_v51 = vadd.f32 %v495_v35, %v387_v40  ;;  %v388_v52 = vmax.f32 %v356_v41, 0.0  ;;  %v428_v35 = vld [vmem:[%s789_s9 + $0x60] sm:$0xff]  ;;  %v289_v40 = vld [vmem:[%s783_s30 + $0x68] sm:$0xff] }
  0x1a   : > { %v558_v55 = vmax.f32 %v526_v43, 0.0  ;;  %v389_v56 = vmax.f32 %v357_v45, 0.0  ;;  %v497_v57 = vadd.f32 %v799_v3, %v459_v46  ;;  %v320_v58 = vmul.f32 %v772_v0, %v282_v42  ;;  %v429_v45 = vld [vmem:[%s789_s9 + $0x68] sm:$0xff] }
  0x1b   : > { %589 = vst.msk [vmem:[%s838_s16] sm:$0xff] %vm588_vm0, %v556_v49  ;;  %590 = vst.msk [vmem:[%s838_s16 + $0x8] sm:$0xff] %vm588_vm0, %v557_v50  ;;  %v559_v60 = vmax.f32 %v527_v51, 0.0  ;;  %v528_v61 = vadd.f32 %v496_v44, %v388_v52  ;;  %v460_v62 = vmul.f32 %v777_v1, %v422_v47  ;;  %v321_v63 = vmul.f32 %v772_v0, %v283_v48  ;;  %v290_v50 = vld [vmem:[%s783_s30 + $0x70] sm:$0xff] }
  0x1c   : > { %591 = vst.msk [vmem:[%s838_s16 + $0x10] sm:$0xff] %vm588_vm0, %v558_v55  ;;  %v529_v4 = vadd.f32 %v497_v57, %v389_v56  ;;  %v358_v5 = vadd.f32 %v794_v2, %v320_v58  ;;  %v461_v6 = vmul.f32 %v777_v1, %v423_v53  ;;  %v322_v7 = vmul.f32 %v772_v0, %v284_v54  ;;  %v430_v55 = vld [vmem:[%s789_s9 + $0x70] sm:$0xff] }
  0x1d   : > { %592 = vst.msk [vmem:[%s838_s16 + $0x18] sm:$0xff] %vm588_vm0, %v559_v60  ;;  %v560_v10 = vmax.f32 %v528_v61, 0.0  ;;  %v498_v11 = vadd.f32 %v799_v3, %v460_v62  ;;  %v359_v12 = vadd.f32 %v794_v2, %v321_v63  ;;  %v462_v13 = vmul.f32 %v777_v1, %v424_v59  ;;  %v291_v60 = vld [vmem:[%s783_s30 + $0x78] sm:$0xff] }
  0x1e   : > { %v561_v16 = vmax.f32 %v529_v4, 0.0  ;;  %v390_v17 = vmax.f32 %v358_v5, 0.0  ;;  %v499_v18 = vadd.f32 %v799_v3, %v461_v6  ;;  %v360_v19 = vadd.f32 %v794_v2, %v322_v7  ;;  %v431_v5 = vld [vmem:[%s789_s9 + $0x78] sm:$0xff]  ;;  %v292_v6 = vld [vmem:[%s783_s30 + $0x80] sm:$0xff] }
  0x1f   : > { %593 = vst.msk [vmem:[%s838_s16 + $0x20] sm:$0xff] %vm588_vm0, %v560_v10  ;;  %v391_v21 = vmax.f32 %v359_v12, 0.0  ;;  %v500_v22 = vadd.f32 %v799_v3, %v462_v13  ;;  %v323_v23 = vmul.f32 %v772_v0, %v285_v8  ;;  %v463_v24 = vmul.f32 %v777_v1, %v425_v9 }
  0x20   : > { %594 = vst.msk [vmem:[%s838_s16 + $0x28] sm:$0xff] %vm588_vm0, %v561_v16  ;;  %v530_v25 = vadd.f32 %v498_v11, %v390_v17  ;;  %v392_v26 = vmax.f32 %v360_v19, 0.0  ;;  %v324_v27 = vmul.f32 %v772_v0, %v286_v14  ;;  %v464_v28 = vmul.f32 %v777_v1, %v426_v15  ;;  %v432_v11 = vld [vmem:[%s789_s9 + $0x80] sm:$0xff]  ;;  %v293_v16 = vld [vmem:[%s783_s30 + $0x88] sm:$0xff] }
  0x21   : > { %v531_v30 = vadd.f32 %v499_v18, %v391_v21  ;;  %v361_v31 = vadd.f32 %v794_v2, %v323_v23  ;;  %v501_v32 = vadd.f32 %v799_v3, %v463_v24  ;;  %v325_v33 = vmul.f32 %v772_v0, %v287_v20 }
  0x22   : > { %v562_v36 = vmax.f32 %v530_v25, 0.0  ;;  %v532_v37 = vadd.f32 %v500_v22, %v392_v26  ;;  %v362_v38 = vadd.f32 %v794_v2, %v324_v27  ;;  %v502_v39 = vadd.f32 %v799_v3, %v464_v28  ;;  %v433_v25 = vld [vmem:[%s789_s9 + $0x88] sm:$0xff]  ;;  %v294_v26 = vld [vmem:[%s783_s30 + $0x90] sm:$0xff] }
  0x23   : > { %v563_v41 = vmax.f32 %v531_v30, 0.0  ;;  %v393_v42 = vmax.f32 %v361_v31, 0.0  ;;  %v363_v43 = vadd.f32 %v794_v2, %v325_v33  ;;  %v465_v44 = vmul.f32 %v777_v1, %v427_v29  ;;  %v434_v31 = vld [vmem:[%s789_s9 + $0x90] sm:$0xff] }
  0x24   : > { %595 = vst.msk [vmem:[%s838_s16 + $0x30] sm:$0xff] %vm588_vm0, %v562_v36  ;;  %v564_v46 = vmax.f32 %v532_v37, 0.0  ;;  %v394_v47 = vmax.f32 %v362_v38, 0.0  ;;  %v326_v48 = vmul.f32 %v772_v0, %v288_v34  ;;  %v466_v49 = vmul.f32 %v777_v1, %v428_v35 }
  0x25   : > { %596 = vst.msk [vmem:[%s838_s16 + $0x38] sm:$0xff] %vm588_vm0, %v563_v41  ;;  %v533_v51 = vadd.f32 %v501_v32, %v393_v42  ;;  %v395_v52 = vmax.f32 %v363_v43, 0.0  ;;  %v503_v53 = vadd.f32 %v799_v3, %v465_v44  ;;  %v327_v54 = vmul.f32 %v772_v0, %v289_v40  ;;  %v295_v32 = vld [vmem:[%s783_s30 + $0x98] sm:$0xff] }
  0x26   : > { %597 = vst.msk [vmem:[%s838_s16 + $0x40] sm:$0xff] %vm588_vm0, %v564_v46  ;;  %v534_v56 = vadd.f32 %v502_v39, %v394_v47  ;;  %v364_v57 = vadd.f32 %v794_v2, %v326_v48  ;;  %v504_v58 = vadd.f32 %v799_v3, %v466_v49  ;;  %v467_v59 = vmul.f32 %v777_v1, %v429_v45  ;;  %v435_v41 = vld [vmem:[%s789_s9 + $0x98] sm:$0xff]  ;;  %v296_v46 = vld [vmem:[%s783_s30 + $0xa0] sm:$0xff] }
  0x27   : > { %v565_v61 = vmax.f32 %v533_v51, 0.0  ;;  %v535_v62 = vadd.f32 %v503_v53, %v395_v52  ;;  %v365_v63 = vadd.f32 %v794_v2, %v327_v54  ;;  %v328_v4 = vmul.f32 %v772_v0, %v290_v50  ;;  %v436_v51 = vld [vmem:[%s789_s9 + $0xa0] sm:$0xff]  ;;  %v297_v52 = vld [vmem:[%s783_s30 + $0xa8] sm:$0xff] }
  0x28   : > { %v566_v7 = vmax.f32 %v534_v56, 0.0  ;;  %v396_v8 = vmax.f32 %v364_v57, 0.0  ;;  %v505_v9 = vadd.f32 %v799_v3, %v467_v59  ;;  %v468_v10 = vmul.f32 %v777_v1, %v430_v55  ;;  %v437_v57 = vld [vmem:[%s789_s9 + $0xa8] sm:$0xff] }
  0x29   : > { %598 = vst.msk [vmem:[%s838_s16 + $0x48] sm:$0xff] %vm588_vm0, %v565_v61  ;;  %v567_v12 = vmax.f32 %v535_v62, 0.0  ;;  %v397_v13 = vmax.f32 %v365_v63, 0.0  ;;  %v366_v14 = vadd.f32 %v794_v2, %v328_v4  ;;  %v329_v15 = vmul.f32 %v772_v0, %v291_v60  ;;  %v298_v62 = vld [vmem:[%s783_s30 + $0xb0] sm:$0xff] }
  0x2a   : > { %599 = vst.msk [vmem:[%s838_s16 + $0x50] sm:$0xff] %vm588_vm0, %v566_v7  ;;  %v536_v17 = vadd.f32 %v504_v58, %v396_v8  ;;  %v506_v18 = vadd.f32 %v799_v3, %v468_v10  ;;  %v469_v19 = vmul.f32 %v777_v1, %v431_v5  ;;  %v330_v20 = vmul.f32 %v772_v0, %v292_v6  ;;  %v438_v7 = vld [vmem:[%s789_s9 + $0xb0] sm:$0xff] }
  0x2b   : > { %600 = vst.msk [vmem:[%s838_s16 + $0x58] sm:$0xff] %vm588_vm0, %v567_v12  ;;  %v537_v21 = vadd.f32 %v505_v9, %v397_v13  ;;  %v398_v22 = vmax.f32 %v366_v14, 0.0  ;;  %v367_v23 = vadd.f32 %v794_v2, %v329_v15  ;;  %v470_v24 = vmul.f32 %v777_v1, %v432_v11  ;;  %v299_v12 = vld [vmem:[%s783_s30 + $0xb8] sm:$0xff] }
  0x2c   : > { %v568_v27 = vmax.f32 %v536_v17, 0.0  ;;  %v507_v28 = vadd.f32 %v799_v3, %v469_v19  ;;  %v368_v29 = vadd.f32 %v794_v2, %v330_v20  ;;  %v331_v30 = vmul.f32 %v772_v0, %v293_v16  ;;  %v439_v17 = vld [vmem:[%s789_s9 + $0xb8] sm:$0xff] }
  0x2d   : > { %v569_v33 = vmax.f32 %v537_v21, 0.0  ;;  %v538_v34 = vadd.f32 %v506_v18, %v398_v22  ;;  %v399_v35 = vmax.f32 %v367_v23, 0.0  ;;  %v508_v36 = vadd.f32 %v799_v3, %v470_v24  ;;  %v300_v18 = vld [vmem:[%s783_s30 + $0xc0] sm:$0xff] }
  0x2e   : > { %601 = vst.msk [vmem:[%s838_s16 + $0x60] sm:$0xff] %vm588_vm0, %v568_v27  ;;  %v400_v37 = vmax.f32 %v368_v29, 0.0  ;;  %v369_v38 = vadd.f32 %v794_v2, %v331_v30  ;;  %v471_v39 = vmul.f32 %v777_v1, %v433_v25  ;;  %v332_v40 = vmul.f32 %v772_v0, %v294_v26  ;;  %v440_v23 = vld [vmem:[%s789_s9 + $0xc0] sm:$0xff] }
  0x2f   : > { %602 = vst.msk [vmem:[%s838_s16 + $0x68] sm:$0xff] %vm588_vm0, %v569_v33  ;;  %v570_v42 = vmax.f32 %v538_v34, 0.0  ;;  %v539_v43 = vadd.f32 %v507_v28, %v399_v35  ;;  %v472_v44 = vmul.f32 %v777_v1, %v434_v31  ;;  %v333_v45 = vmul.f32 %v772_v0, %v295_v32  ;;  %v301_v28 = vld [vmem:[%s783_s30 + $0xc8] sm:$0xff] }
  0x30   : > { %v540_v47 = vadd.f32 %v508_v36, %v400_v37  ;;  %v401_v48 = vmax.f32 %v369_v38, 0.0  ;;  %v509_v49 = vadd.f32 %v799_v3, %v471_v39  ;;  %v370_v50 = vadd.f32 %v794_v2, %v332_v40  ;;  %v441_v37 = vld [vmem:[%s789_s9 + $0xc8] sm:$0xff]  ;;  %v302_v38 = vld [vmem:[%s783_s30 + $0xd0] sm:$0xff] }
  0x31   : > { %603 = vst.msk [vmem:[%s838_s16 + $0x70] sm:$0xff] %vm588_vm0, %v570_v42  ;;  %v571_v53 = vmax.f32 %v539_v43, 0.0  ;;  %v510_v54 = vadd.f32 %v799_v3, %v472_v44  ;;  %v371_v55 = vadd.f32 %v794_v2, %v333_v45  ;;  %v473_v56 = vmul.f32 %v777_v1, %v435_v41  ;;  %v442_v43 = vld [vmem:[%s789_s9 + $0xd0] sm:$0xff]  ;;  %v303_v44 = vld [vmem:[%s783_s30 + $0xd8] sm:$0xff] }
  0x32   : > { %v572_v58 = vmax.f32 %v540_v47, 0.0  ;;  %v541_v59 = vadd.f32 %v509_v49, %v401_v48  ;;  %v402_v60 = vmax.f32 %v370_v50, 0.0  ;;  %v334_v61 = vmul.f32 %v772_v0, %v296_v46 }
  0x33   : > { %604 = vst.msk [vmem:[%s838_s16 + $0x78] sm:$0xff] %vm588_vm0, %v571_v53  ;;  %v403_v63 = vmax.f32 %v371_v55, 0.0  ;;  %v511_v4 = vadd.f32 %v799_v3, %v473_v56  ;;  %v474_v5 = vmul.f32 %v777_v1, %v436_v51  ;;  %v335_v6 = vmul.f32 %v772_v0, %v297_v52  ;;  %v443_v53 = vld [vmem:[%s789_s9 + $0xd8] sm:$0xff] }
  0x34   : > { %605 = vst.msk [vmem:[%s838_s16 + $0x80] sm:$0xff] %vm588_vm0, %v572_v58  ;;  %v573_v8 = vmax.f32 %v541_v59, 0.0  ;;  %v542_v9 = vadd.f32 %v510_v54, %v402_v60  ;;  %v372_v10 = vadd.f32 %v794_v2, %v334_v61  ;;  %v475_v11 = vmul.f32 %v777_v1, %v437_v57  ;;  %v304_v58 = vld [vmem:[%s783_s30 + $0xe0] sm:$0xff] }
  0x35   : > { %v543_v13 = vadd.f32 %v511_v4, %v403_v63  ;;  %v512_v14 = vadd.f32 %v799_v3, %v474_v5  ;;  %v373_v15 = vadd.f32 %v794_v2, %v335_v6  ;;  %v336_v16 = vmul.f32 %v772_v0, %v298_v62  ;;  %v444_v63 = vld [vmem:[%s789_s9 + $0xe0] sm:$0xff]  ;;  %v305_v4 = vld [vmem:[%s783_s30 + $0xe8] sm:$0xff] }
  0x36   : > { %606 = vst.msk [vmem:[%s838_s16 + $0x88] sm:$0xff] %vm588_vm0, %v573_v8  ;;  %v574_v19 = vmax.f32 %v542_v9, 0.0  ;;  %v404_v20 = vmax.f32 %v372_v10, 0.0  ;;  %v513_v21 = vadd.f32 %v799_v3, %v475_v11  ;;  %v476_v22 = vmul.f32 %v777_v1, %v438_v7  ;;  %v445_v9 = vld [vmem:[%s789_s9 + $0xe8] sm:$0xff] }
  0x37   : > { %v575_v24 = vmax.f32 %v543_v13, 0.0  ;;  %v405_v25 = vmax.f32 %v373_v15, 0.0  ;;  %v374_v26 = vadd.f32 %v794_v2, %v336_v16  ;;  %v337_v27 = vmul.f32 %v772_v0, %v299_v12 }
  0x38   : > { %607 = vst.msk [vmem:[%s838_s16 + $0x90] sm:$0xff] %vm588_vm0, %v574_v19  ;;  %v544_v29 = vadd.f32 %v512_v14, %v404_v20  ;;  %v514_v30 = vadd.f32 %v799_v3, %v476_v22  ;;  %v477_v31 = vmul.f32 %v777_v1, %v439_v17  ;;  %v338_v32 = vmul.f32 %v772_v0, %v300_v18  ;;  %v306_v14 = vld [vmem:[%s783_s30 + $0xf0] sm:$0xff] }
  0x39   : > { %608 = vst.msk [vmem:[%s838_s16 + $0x98] sm:$0xff] %vm588_vm0, %v575_v24  ;;  %v545_v33 = vadd.f32 %v513_v21, %v405_v25  ;;  %v406_v34 = vmax.f32 %v374_v26, 0.0  ;;  %v375_v35 = vadd.f32 %v794_v2, %v337_v27  ;;  %v478_v36 = vmul.f32 %v777_v1, %v440_v23  ;;  %v446_v19 = vld [vmem:[%s789_s9 + $0xf0] sm:$0xff]  ;;  %v307_v24 = vld [vmem:[%s783_s30 + $0xf8] sm:$0xff] }
  0x3a   : > { %v576_v39 = vmax.f32 %v544_v29, 0.0  ;;  %v515_v40 = vadd.f32 %v799_v3, %v477_v31  ;;  %v376_v41 = vadd.f32 %v794_v2, %v338_v32  ;;  %v339_v42 = vmul.f32 %v772_v0, %v301_v28  ;;  %v447_v29 = vld [vmem:[%s789_s9 + $0xf8] sm:$0xff] }
  0x3b   : > { %v577_v45 = vmax.f32 %v545_v33, 0.0  ;;  %v546_v46 = vadd.f32 %v514_v30, %v406_v34  ;;  %v407_v47 = vmax.f32 %v375_v35, 0.0  ;;  %v516_v48 = vadd.f32 %v799_v3, %v478_v36 }
  0x3c   : > { %609 = vst.msk [vmem:[%s838_s16 + $0xa0] sm:$0xff] %vm588_vm0, %v576_v39  ;;  %v408_v49 = vmax.f32 %v376_v41, 0.0  ;;  %v377_v50 = vadd.f32 %v794_v2, %v339_v42  ;;  %v479_v51 = vmul.f32 %v777_v1, %v441_v37  ;;  %v340_v52 = vmul.f32 %v772_v0, %v302_v38 }
  0x3d   : > { %610 = vst.msk [vmem:[%s838_s16 + $0xa8] sm:$0xff] %vm588_vm0, %v577_v45  ;;  %v578_v54 = vmax.f32 %v546_v46, 0.0  ;;  %v547_v55 = vadd.f32 %v515_v40, %v407_v47  ;;  %v480_v56 = vmul.f32 %v777_v1, %v442_v43  ;;  %v341_v57 = vmul.f32 %v772_v0, %v303_v44 }
  0x3e   : > { %v548_v59 = vadd.f32 %v516_v48, %v408_v49  ;;  %v409_v60 = vmax.f32 %v377_v50, 0.0  ;;  %v517_v61 = vadd.f32 %v799_v3, %v479_v51  ;;  %v378_v62 = vadd.f32 %v794_v2, %v340_v52 }
  0x3f   : > { %611 = vst.msk [vmem:[%s838_s16 + $0xb0] sm:$0xff] %vm588_vm0, %v578_v54  ;;  %v579_v5 = vmax.f32 %v547_v55, 0.0  ;;  %v518_v6 = vadd.f32 %v799_v3, %v480_v56  ;;  %v379_v7 = vadd.f32 %v794_v2, %v341_v57  ;;  %v481_v8 = vmul.f32 %v777_v1, %v443_v53 }
  0x40   : > { %v580_v10 = vmax.f32 %v548_v59, 0.0  ;;  %v549_v11 = vadd.f32 %v517_v61, %v409_v60  ;;  %v410_v12 = vmax.f32 %v378_v62, 0.0  ;;  %v342_v13 = vmul.f32 %v772_v0, %v304_v58 }
  0x41   : > { %612 = vst.msk [vmem:[%s838_s16 + $0xb8] sm:$0xff] %vm588_vm0, %v579_v5  ;;  %v411_v15 = vmax.f32 %v379_v7, 0.0  ;;  %v519_v16 = vadd.f32 %v799_v3, %v481_v8  ;;  %v482_v17 = vmul.f32 %v777_v1, %v444_v63  ;;  %v343_v18 = vmul.f32 %v772_v0, %v305_v4 }
  0x42   : > { %613 = vst.msk [vmem:[%s838_s16 + $0xc0] sm:$0xff] %vm588_vm0, %v580_v10  ;;  %v581_v20 = vmax.f32 %v549_v11, 0.0  ;;  %v550_v21 = vadd.f32 %v518_v6, %v410_v12  ;;  %v380_v22 = vadd.f32 %v794_v2, %v342_v13  ;;  %v483_v23 = vmul.f32 %v777_v1, %v445_v9 }
  0x43   : > { %v551_v25 = vadd.f32 %v519_v16, %v411_v15  ;;  %v520_v26 = vadd.f32 %v799_v3, %v482_v17  ;;  %v381_v27 = vadd.f32 %v794_v2, %v343_v18  ;;  %v344_v28 = vmul.f32 %v772_v0, %v306_v14 }
  0x44   : > { %614 = vst.msk [vmem:[%s838_s16 + $0xc8] sm:$0xff] %vm588_vm0, %v581_v20  ;;  %v582_v30 = vmax.f32 %v550_v21, 0.0  ;;  %v412_v31 = vmax.f32 %v380_v22, 0.0  ;;  %v521_v32 = vadd.f32 %v799_v3, %v483_v23  ;;  %v484_v33 = vmul.f32 %v777_v1, %v446_v19 }
  0x45   : > { %v583_v34 = vmax.f32 %v551_v25, 0.0  ;;  %v413_v35 = vmax.f32 %v381_v27, 0.0  ;;  %v382_v36 = vadd.f32 %v794_v2, %v344_v28  ;;  %v345_v37 = vmul.f32 %v772_v0, %v307_v24 }
  0x46   : > { %615 = vst.msk [vmem:[%s838_s16 + $0xd0] sm:$0xff] %vm588_vm0, %v582_v30  ;;  %v552_v38 = vadd.f32 %v520_v26, %v412_v31  ;;  %v522_v39 = vadd.f32 %v799_v3, %v484_v33  ;;  %v485_v40 = vmul.f32 %v777_v1, %v447_v29 }
  0x47   : > { %616 = vst.msk [vmem:[%s838_s16 + $0xd8] sm:$0xff] %vm588_vm0, %v583_v34  ;;  %v553_v41 = vadd.f32 %v521_v32, %v413_v35  ;;  %v414_v42 = vmax.f32 %v382_v36, 0.0  ;;  %v383_v43 = vadd.f32 %v794_v2, %v345_v37 }
  0x48   : > { %v584_v44 = vmax.f32 %v552_v38, 0.0  ;;  %v523_v45 = vadd.f32 %v799_v3, %v485_v40 }
  0x49   : > { %v585_v46 = vmax.f32 %v553_v41, 0.0  ;;  %v554_v0 = vadd.f32 %v522_v39, %v414_v42  ;;  %v415_v47 = vmax.f32 %v383_v43, 0.0 }
  0x4a   : > { %617 = vst.msk [vmem:[%s838_s16 + $0xe0] sm:$0xff] %vm588_vm0, %v584_v44 }
  0x4b   : > { %618 = vst.msk [vmem:[%s838_s16 + $0xe8] sm:$0xff] %vm588_vm0, %v585_v46  ;;  %v586_v48 = vmax.f32 %v554_v0, 0.0  ;;  %v555_v49 = vadd.f32 %v523_v45, %v415_v47 }
  0x4d   : > { %619 = vst.msk [vmem:[%s838_s16 + $0xf0] sm:$0xff] %vm588_vm0, %v586_v48  ;;  %v587_v1 = vmax.f32 %v555_v49, 0.0 }
  0x4f   : > { %620 = vst.msk [vmem:[%s838_s16 + $0xf8] sm:$0xff] %vm588_vm0, %v587_v1 }
  0x50 PF: > { %s16_s21 = sadd.s32 1, %s722_s21  }
  0x51   : > { %p13_p4 = scmp.ge.s32.totalorder %s16_s21, 4  }
  0x53   :  { %15 = sbr.rel (!%p13_p4) target bundleno = 1 (0x1), region = 77 }

// kernel: unet_res_conv_block.4
= control target key start
LH: loop header
LB: loop body
LE: loop exit
PB: predicated region body
PF: predicated region fallthrough
CT: control target
= control target key end

     0   :  { %s3282_s18 = smov 0   ;;  %s4401_s0 = inlined_call_operand.vmem [shape: f32[2,16,16,4], index: 0, kind: input, shape index: {}]   ;;  %s4402_s1 = inlined_call_operand.vmem [shape: bf16[36,8], index: 1, kind: input, shape index: {}]   ;;  %s4403_s2 = inlined_call_operand.vmem [shape: f32[1,4], index: 2, kind: input, shape index: {}]   ;;  %s4404_s3 = inlined_call_operand.vmem [shape: f32[1,4], index: 3, kind: input, shape index: {}]   ;;  %s4405_s4 = inlined_call_operand.vmem [shape: f32[2,16,16,8], index: 4, kind: output, shape index: {0}]   ;;  %s4406_s5 = inlined_call_operand.vmem [shape: f32[2,2,8], index: 5, kind: output, shape index: {1}]  }
   0x1 LB: > { %s2466_s2 = sadd.s32 4294967295, %s3241_s18   ;;  %p2470_p0 = scmp.ge.s32.totalorder %s3241_s18, 1  ;;  %s3241_s18 = sphi %s3282_s18, %s16_s18  }
   0x2   : > { %p190_p1 = scmp.lt.s32.totalorder %s3241_s18, 3 }
   0x4   : > { %p191_p2 = pnand %p2470_p0, %p190_p1 }
   0x6   : > { %194 = sbr.rel (%p191_p2) target bundleno = 655 (0x28f), region = 36 }
   0xd   : > { %vm237_vm0 = vcmask 31744   ;;  %vm240_vm1 = vcmask 25600   ;;  %vm246_vm2 = vcmask 24576   ;;  %p3292_p3 = scmp.lt.s32.totalorder %s2466_s2, 1  ;;  %v3243_v0 = vmov 0.0   ;;  %s3244_s23 = smov 4  }
   0xe   : > { %238 = vst.msk [vmem:[#allocation2] sm:$0xff] %vm237_vm0, %v3243_v0  ;;  %239 = vst.msk [vmem:[#allocation2 + $0x8] sm:$0xff] %vm237_vm0, %v3243_v0  ;;  %s3245_s24 = smov 8   ;;  %s3246_s25 = smov 12   ;;  %vm2009_vm3 = vcmask 1041408   ;;  %vm1693_vm4 = vcmask 64512  }
   0xf   : > { %241 = vst.msk [vmem:[#allocation2 + $0x10] sm:$0x3] %vm240_vm1, %v3243_v0  ;;  %245 = vst.msk [vmem:[#allocation2 + $0x1a8] sm:$0x3] %vm240_vm1, %v3243_v0  ;;  %s4465_s2 = smov (!%p3292_p3, %s2466_s2), 1  ;;  %s3247_s28 = smov 16  }
  0x10   : > { %243 = vst.msk [vmem:[#allocation2 + $0x198] sm:$0xff] %vm237_vm0, %v3243_v0  ;;  %244 = vst.msk [vmem:[#allocation2 + $0x1a0] sm:$0xff] %vm237_vm0, %v3243_v0  ;;  %s2497_s19 = sshll.u32 %s4465_s2, 8  ;;  %s3248_s6 = smov 20   ;;  %vm1726_vm5 = vcmask 97280   ;;  %vm1759_vm6 = vcmask 130048  }
  0x11   : > { %248 = vst.msk [vmem:[#allocation2 + $0x18] sm:$0x1] %vm246_vm2, %v3243_v0  ;;  %249 = vst.msk [vmem:[#allocation2 + $0x30] sm:$0x1] %vm246_vm2, %v3243_v0  ;;  %s3348_s22 = scalar_lea.vmem %s4401_s0, %s2497_s19  ;;  %s3249_s9 = smov 24   ;;  %vm1792_vm7 = vcmask 162816  }
  0x12   : > { %250 = vst.msk [vmem:[#allocation2 + $0x48] sm:$0x1] %vm246_vm2, %v3243_v0  ;;  %251 = vst.msk [vmem:[#allocation2 + $0x60] sm:$0x1] %vm246_vm2, %v3243_v0  ;;  %v285_v1 = vld [vmem:[%s3348_s22 + $0x10] sm:$0xff]  ;;  %v286_v2 = vld [vmem:[%s3348_s22 + $0x18] sm:$0xff]  ;;  %s4264_s14 = scalar_lea.vmem %s4405_s4, %s2497_s19 }
  0x13   : > { %252 = vst.msk [vmem:[#allocation2 + $0x78] sm:$0x1] %vm246_vm2, %v3243_v0  ;;  %253 = vst.msk [vmem:[#allocation2 + $0x90] sm:$0x1] %vm246_vm2, %v3243_v0  ;;  %v283_v3 = vld [vmem:[%s3348_s22] sm:$0xff]  ;;  %v284_v4 = vld [vmem:[%s3348_s22 + $0x8] sm:$0xff] }
  0x14   : > { %254 = vst.msk [vmem:[#allocation2 + $0xa8] sm:$0x1] %vm246_vm2, %v3243_v0  ;;  %255 = vst.msk [vmem:[#allocation2 + $0xc0] sm:$0x1] %vm246_vm2, %v3243_v0  ;;  %v287_v5 = vld [vmem:[%s3348_s22 + $0x20] sm:$0xff]  ;;  %v288_v6 = vld [vmem:[%s3348_s22 + $0x28] sm:$0xff] }
  0x15   : > { %256 = vst.msk [vmem:[#allocation2 + $0xd8] sm:$0x1] %vm246_vm2, %v3243_v0  ;;  %257 = vst.msk [vmem:[#allocation2 + $0xf0] sm:$0x1] %vm246_vm2, %v3243_v0  ;;  %v380_v7 = vld [vmem:[#allocation2 + $0x1] sm:$0xff]  ;;  %v289_v9 = vld [vmem:[%s3348_s22 + $0x30] sm:$0xff] }
  0x16   : > { %258 = vst.msk [vmem:[#allocation2 + $0x108] sm:$0x1] %vm246_vm2, %v3243_v0  ;;  %259 = vst.msk [vmem:[#allocation2 + $0x120] sm:$0x1] %vm246_vm2, %v3243_v0  ;;  %v381_v8 = vld [vmem:[#allocation2 + $0x9] sm:$0xff]  ;;  %v290_v11 = vld [vmem:[%s3348_s22 + $0x38] sm:$0xff] }
  0x17   : > { %260 = vst.msk [vmem:[#allocation2 + $0x138] sm:$0x1] %vm246_vm2, %v3243_v0  ;;  %261 = vst.msk [vmem:[#allocation2 + $0x150] sm:$0x1] %vm246_vm2, %v3243_v0  ;;  %v2581_v10 = vpack.i.bf16 %v381_v8, %v380_v7  ;;  %v291_v12 = vld [vmem:[%s3348_s22 + $0x40] sm:$0xff]  ;;  %v292_v13 = vld [vmem:[%s3348_s22 + $0x48] sm:$0xff] }
  0x18   : > { %262 = vst.msk [vmem:[#allocation2 + $0x168] sm:$0x1] %vm246_vm2, %v3243_v0  ;;  %263 = vst.msk [vmem:[#allocation2 + $0x180] sm:$0x1] %vm246_vm2, %v3243_v0  ;;  %v293_v14 = vld [vmem:[%s3348_s22 + $0x50] sm:$0xff]  ;;  %v294_v15 = vld [vmem:[%s3348_s22 + $0x58] sm:$0xff] }
  0x19   : > { %266 = vst.msk [vmem:[#allocation2 + $0x29] sm:$0x1] %vm246_vm2, %v3243_v0  ;;  %267 = vst.msk [vmem:[#allocation2 + $0x41] sm:$0x1] %vm246_vm2, %v3243_v0  ;;  %v295_v16 = vld [vmem:[%s3348_s22 + $0x60] sm:$0xff]  ;;  %2582 = vrot.lane.b32.xlu0 %v2581_v10, %s3244_s23  ;;  %v296_v17 = vld [vmem:[%s3348_s22 + $0x68] sm:$0xff] }
  0x1a   : > { %268 = vst.msk [vmem:[#allocation2 + $0x59] sm:$0x1] %vm246_vm2, %v3243_v0  ;;  %269 = vst.msk [vmem:[#allocation2 + $0x71] sm:$0x1] %vm246_vm2, %v3243_v0  ;;  %v297_v18 = vld [vmem:[%s3348_s22 + $0x70] sm:$0xff]  ;;  %v298_v19 = vld [vmem:[%s3348_s22 + $0x78] sm:$0xff] }
  0x1b   : > { %270 = vst.msk [vmem:[#allocation2 + $0x89] sm:$0x1] %vm246_vm2, %v3243_v0  ;;  %271 = vst.msk [vmem:[#allocation2 + $0xa1] sm:$0x1] %vm246_vm2, %v3243_v0  ;;  %v299_v20 = vld [vmem:[%s3348_s22 + $0x80] sm:$0xff]  ;;  %v300_v21 = vld [vmem:[%s3348_s22 + $0x88] sm:$0xff] }
  0x1c   : > { %272 = vst.msk [vmem:[#allocation2 + $0xb9] sm:$0x1] %vm246_vm2, %v3243_v0  ;;  %273 = vst.msk [vmem:[#allocation2 + $0xd1] sm:$0x1] %vm246_vm2, %v3243_v0  ;;  %v301_v22 = vld [vmem:[%s3348_s22 + $0x90] sm:$0xff]  ;;  %v302_v23 = vld [vmem:[%s3348_s22 + $0x98] sm:$0xff] }
  0x1d   : > { %274 = vst.msk [vmem:[#allocation2 + $0xe9] sm:$0x1] %vm246_vm2, %v3243_v0  ;;  %275 = vst.msk [vmem:[#allocation2 + $0x101] sm:$0x1] %vm246_vm2, %v3243_v0  ;;  %v303_v24 = vld [vmem:[%s3348_s22 + $0xa0] sm:$0xff]  ;;  %v304_v25 = vld [vmem:[%s3348_s22 + $0xa8] sm:$0xff] }
  0x1e   : > { %276 = vst.msk [vmem:[#allocation2 + $0x119] sm:$0x1] %vm246_vm2, %v3243_v0  ;;  %277 = vst.msk [vmem:[#allocation2 + $0x131] sm:$0x1] %vm246_vm2, %v3243_v0  ;;  %v305_v35 = vld [vmem:[%s3348_s22 + $0xb0] sm:$0xff]  ;;  %v306_v36 = vld [vmem:[%s3348_s22 + $0xb8] sm:$0xff] }
  0x1f   : > { %278 = vst.msk [vmem:[#allocation2 + $0x149] sm:$0x1] %vm246_vm2, %v3243_v0  ;;  %279 = vst.msk [vmem:[#allocation2 + $0x161] sm:$0x1] %vm246_vm2, %v3243_v0  ;;  %v307_v50 = vld [vmem:[%s3348_s22 + $0xc0] sm:$0xff]  ;;  %v308_v51 = vld [vmem:[%s3348_s22 + $0xc8] sm:$0xff] }
  0x20   : > { %280 = vst.msk [vmem:[#allocation2 + $0x179] sm:$0x1] %vm246_vm2, %v3243_v0  ;;  %281 = vst.msk [vmem:[#allocation2 + $0x191] sm:$0x1] %vm246_vm2, %v3243_v0  ;;  %v309_v52 = vld [vmem:[%s3348_s22 + $0xd0] sm:$0xff]  ;;  %v310_v53 = vld [vmem:[%s3348_s22 + $0xd8] sm:$0xff] }
  0x21   : > { %265 = vst.msk [vmem:[#allocation2 + $0x11] sm:$0x1] %vm246_vm2, %v3243_v0  ;;  %282 = vst.msk [vmem:[#allocation2 + $0x1a9] sm:$0x1] %vm246_vm2, %v3243_v0  ;;  %v311_v54 = vld [vmem:[%s3348_s22 + $0xe0] sm:$0xff]  ;;  %v312_v55 = vld [vmem:[%s3348_s22 + $0xe8] sm:$0xff] }
  0x22   : > { %247 = vst.msk [vmem:[#allocation2] sm:$0x1] %vm246_vm2, %v3243_v0  ;;  %264 = vst.msk [vmem:[#allocation2 + $0x198] sm:$0x1] %vm246_vm2, %v3243_v0  ;;  %s3250_s10 = smov 28   ;;  %s3251_s11 = smov 32  }
  0x23   : > { %318 = vst.msk [vmem:[#allocation2 + $0x31] sm:$0xff] %vm237_vm0, %v285_v1  ;;  %319 = vst.msk [vmem:[#allocation2 + $0x39] sm:$0xff] %vm237_vm0, %v286_v2  ;;  %vm1825_vm8 = vcmask 195584   ;;  %vm1858_vm9 = vcmask 228352   ;;  %vm1891_vm10 = vcmask 261120   ;;  %vm1960_vm11 = vcmask 293888  }
  0x24   : > { %316 = vst.msk [vmem:[#allocation2 + $0x19] sm:$0xff] %vm237_vm0, %v283_v3  ;;  %317 = vst.msk [vmem:[#allocation2 + $0x21] sm:$0xff] %vm237_vm0, %v284_v4  ;;  %s2475_s15 = sshll.u32 %s4465_s2, 1  ;;  %vm2344_vm12 = vcmask 1040384   ;;  %vm2346_vm13 = vcmask 58368  }
  0x25   : > { %320 = vst.msk [vmem:[#allocation2 + $0x49] sm:$0xff] %vm237_vm0, %v287_v5  ;;  %321 = vst.msk [vmem:[#allocation2 + $0x51] sm:$0xff] %vm237_vm0, %v288_v6  ;;  %s235_s3 = scalar_lea.vmem %s4406_s5, %s2475_s15 }
  0x26   : > { %322 = vst.msk [vmem:[#allocation2 + $0x61] sm:$0xff] %vm237_vm0, %v289_v9  ;;  %323 = vst.msk [vmem:[#allocation2 + $0x69] sm:$0xff] %vm237_vm0, %v290_v11 }
  0x27   : > { %324 = vst.msk [vmem:[#allocation2 + $0x79] sm:$0xff] %vm237_vm0, %v291_v12  ;;  %325 = vst.msk [vmem:[#allocation2 + $0x81] sm:$0xff] %vm237_vm0, %v292_v13 }
  0x28   : > { %326 = vst.msk [vmem:[#allocation2 + $0x91] sm:$0xff] %vm237_vm0, %v293_v14  ;;  %327 = vst.msk [vmem:[#allocation2 + $0x99] sm:$0xff] %vm237_vm0, %v294_v15  ;;  %v412_v14 = vld [vmem:[#allocation2 + $0x2] sm:$0xff]  ;;  %v413_v15 = vld [vmem:[#allocation2 + $0xa] sm:$0xff] }
  0x29   : > { %328 = vst.msk [vmem:[#allocation2 + $0xa9] sm:$0xff] %vm237_vm0, %v295_v16  ;;  %329 = vst.msk [vmem:[#allocation2 + $0xb1] sm:$0xff] %vm237_vm0, %v296_v17  ;;  %v2661_v17 = vpack.i.bf16 %v413_v15, %v412_v14 }
  0x2a   : > { %330 = vst.msk [vmem:[#allocation2 + $0xc1] sm:$0xff] %vm237_vm0, %v297_v18  ;;  %331 = vst.msk [vmem:[#allocation2 + $0xc9] sm:$0xff] %vm237_vm0, %v298_v19  ;;  %v384_v26 = vld [vmem:[#allocation2 + $0x31] sm:$0xff]  ;;  %v385_v27 = vld [vmem:[#allocation2 + $0x39] sm:$0xff] }
  0x2b   : > { %332 = vst.msk [vmem:[#allocation2 + $0xd9] sm:$0xff] %vm237_vm0, %v299_v20  ;;  %333 = vst.msk [vmem:[#allocation2 + $0xe1] sm:$0xff] %vm237_vm0, %v300_v21  ;;  %v382_v28 = vld [vmem:[#allocation2 + $0x19] sm:$0xff]  ;;  %v3395_v29 = vpack.i.bf16 %v385_v27, %v384_v26  ;;  %v383_v30 = vld [vmem:[#allocation2 + $0x21] sm:$0xff] }
  0x2c   : > { %334 = vst.msk [vmem:[#allocation2 + $0xf1] sm:$0xff] %vm237_vm0, %v301_v22  ;;  %335 = vst.msk [vmem:[#allocation2 + $0xf9] sm:$0xff] %vm237_vm0, %v302_v23  ;;  %v386_v31 = vld [vmem:[#allocation2 + $0x49] sm:$0xff]  ;;  %v387_v32 = vld [vmem:[#allocation2 + $0x51] sm:$0xff]  ;;  %v3397_v33 = vpack.i.bf16 %v383_v30, %v382_v28 }
  0x2d   : > { %336 = vst.msk [vmem:[#allocation2 + $0x109] sm:$0xff] %vm237_vm0, %v303_v24  ;;  %337 = vst.msk [vmem:[#allocation2 + $0x111] sm:$0xff] %vm237_vm0, %v304_v25  ;;  %v388_v34 = vld [vmem:[#allocation2 + $0x61] sm:$0xff]  ;;  %2592 = vrot.lane.b32.xlu1 %v3395_v29, %s3244_s23  ;;  %v3403_v37 = vpack.i.bf16 %v387_v32, %v386_v31  ;;  %v389_v38 = vld [vmem:[#allocation2 + $0x69] sm:$0xff] }
  0x2e   : > { %338 = vst.msk [vmem:[#allocation2 + $0x121] sm:$0xff] %vm237_vm0, %v305_v35  ;;  %339 = vst.msk [vmem:[#allocation2 + $0x129] sm:$0xff] %vm237_vm0, %v306_v36  ;;  %2587 = vrot.lane.b32.xlu0 %v3397_v33, %s3244_s23  ;;  %v3409_v39 = vpack.i.bf16 %v389_v38, %v388_v34  ;;  %v390_v40 = vld [vmem:[#allocation2 + $0x79] sm:$0xff]  ;;  %v391_v41 = vld [vmem:[#allocation2 + $0x81] sm:$0xff] }
  0x2f   : > { %v392_v42 = vld [vmem:[#allocation2 + $0x91] sm:$0xff]  ;;  %v393_v43 = vld [vmem:[#allocation2 + $0x99] sm:$0xff]  ;;  %v3413_v45 = vpack.i.bf16 %v391_v41, %v390_v40  ;;  %340 = vst.msk [vmem:[#allocation2 + $0x139] sm:$0xff] %vm237_vm0, %v307_v50  ;;  %341 = vst.msk [vmem:[#allocation2 + $0x141] sm:$0xff] %vm237_vm0, %v308_v51 }
  0x30   : > { %v394_v44 = vld [vmem:[#allocation2 + $0xa9] sm:$0xff]  ;;  %v395_v46 = vld [vmem:[#allocation2 + $0xb1] sm:$0xff]  ;;  %v3417_v49 = vpack.i.bf16 %v393_v43, %v392_v42  ;;  %342 = vst.msk [vmem:[#allocation2 + $0x151] sm:$0xff] %vm237_vm0, %v309_v52  ;;  %343 = vst.msk [vmem:[#allocation2 + $0x159] sm:$0xff] %vm237_vm0, %v310_v53 }
  0x31   : > { %2597 = vrot.lane.b32.xlu1 %v3403_v37, %s3244_s23  ;;  %v396_v47 = vld [vmem:[#allocation2 + $0xc1] sm:$0xff]  ;;  %v397_v48 = vld [vmem:[#allocation2 + $0xc9] sm:$0xff]  ;;  %344 = vst.msk [vmem:[#allocation2 + $0x169] sm:$0xff] %vm237_vm0, %v311_v54  ;;  %345 = vst.msk [vmem:[#allocation2 + $0x171] sm:$0xff] %vm237_vm0, %v312_v55  ;;  %v3433_v56 = vpack.i.bf16 %v395_v46, %v394_v44 }
  0x32   : > { %2602 = vrot.lane.b32.xlu0 %v3409_v39, %s3244_s23  ;;  %v3437_v57 = vpack.i.bf16 %v397_v48, %v396_v47  ;;  %v398_v58 = vld [vmem:[#allocation2 + $0xd9] sm:$0xff]  ;;  %v399_v59 = vld [vmem:[#allocation2 + $0xe1] sm:$0xff]  ;;  %v418_v24 = vld [vmem:[#allocation2 + $0x4a] sm:$0xff] }
  0x33   : > { %v400_v60 = vld [vmem:[#allocation2 + $0xf1] sm:$0xff]  ;;  %v401_v61 = vld [vmem:[#allocation2 + $0xf9] sm:$0xff]  ;;  %v3441_v62 = vpack.i.bf16 %v399_v59, %v398_v58  ;;  %v415_v19 = vld [vmem:[#allocation2 + $0x22] sm:$0xff] }
  0x34   : > { %v3445_v63 = vpack.i.bf16 %v401_v61, %v400_v60  ;;  %v402_v0 = vld [vmem:[#allocation2 + $0x109] sm:$0xff]  ;;  %v403_v1 = vld [vmem:[#allocation2 + $0x111] sm:$0xff]  ;;  %v414_v18 = vld [vmem:[#allocation2 + $0x1a] sm:$0xff] }
  0x35   : > { %2607 = vrot.lane.b32.xlu1 %v3413_v45, %s3244_s23  ;;  %v404_v2 = vld [vmem:[#allocation2 + $0x121] sm:$0xff]  ;;  %v405_v3 = vld [vmem:[#allocation2 + $0x129] sm:$0xff]  ;;  %v2636_v4 = vpack.i.bf16 %v403_v1, %v402_v0  ;;  %v416_v20 = vld [vmem:[#allocation2 + $0x32] sm:$0xff]  ;;  %v3456_v22 = vpack.i.bf16 %v415_v19, %v414_v18 }
  0x36   : > { %2612 = vrot.lane.b32.xlu0 %v3417_v49, %s3244_s23  ;;  %v2641_v5 = vpack.i.bf16 %v405_v3, %v404_v2  ;;  %v406_v6 = vld [vmem:[#allocation2 + $0x139] sm:$0xff]  ;;  %v407_v7 = vld [vmem:[#allocation2 + $0x141] sm:$0xff]  ;;  %v421_v27 = vld [vmem:[#allocation2 + $0x6a] sm:$0xff] }
  0x37   : > { %v408_v8 = vld [vmem:[#allocation2 + $0x151] sm:$0xff]  ;;  %v409_v9 = vld [vmem:[#allocation2 + $0x159] sm:$0xff]  ;;  %v2646_v10 = vpack.i.bf16 %v407_v7, %v406_v6  ;;  %v420_v26 = vld [vmem:[#allocation2 + $0x62] sm:$0xff] }
  0x38   : > { %v2651_v11 = vpack.i.bf16 %v409_v9, %v408_v8  ;;  %v410_v12 = vld [vmem:[#allocation2 + $0x169] sm:$0xff]  ;;  %v411_v13 = vld [vmem:[#allocation2 + $0x171] sm:$0xff]  ;;  %v417_v21 = vld [vmem:[#allocation2 + $0x3a] sm:$0xff]  ;;  %v3467_v30 = vpack.i.bf16 %v421_v27, %v420_v26 }
  0x39   : > { %2617 = vrot.lane.b32.xlu1 %v3433_v56, %s3244_s23  ;;  %v2656_v16 = vpack.i.bf16 %v411_v13, %v410_v12  ;;  %v3459_v23 = vpack.i.bf16 %v417_v21, %v416_v20  ;;  %v419_v25 = vld [vmem:[#allocation2 + $0x52] sm:$0xff]  ;;  %v422_v31 = vld [vmem:[#allocation2 + $0x7a] sm:$0xff]  ;;  %v423_v32 = vld [vmem:[#allocation2 + $0x82] sm:$0xff] }
  0x3a   : > { %2622 = vrot.lane.b32.xlu0 %v3437_v57, %s3244_s23  ;;  %v3463_v28 = vpack.i.bf16 %v419_v25, %v418_v24  ;;  %v424_v34 = vld [vmem:[#allocation2 + $0x92] sm:$0xff]  ;;  %v425_v35 = vld [vmem:[#allocation2 + $0x9a] sm:$0xff]  ;;  %v3471_v36 = vpack.i.bf16 %v423_v32, %v422_v31  ;;  %v426_v40 = vld [vmem:[#allocation2 + $0xaa] sm:$0xff] }
  0x3b   : > { %v3475_v38 = vpack.i.bf16 %v425_v35, %v424_v34  ;;  %v427_v41 = vld [vmem:[#allocation2 + $0xb2] sm:$0xff]  ;;  %v428_v42 = vld [vmem:[#allocation2 + $0xc2] sm:$0xff]  ;;  %v429_v43 = vld [vmem:[#allocation2 + $0xca] sm:$0xff] }
  0x3c   : > { %v3479_v44 = vpack.i.bf16 %v427_v41, %v426_v40  ;;  %v3483_v46 = vpack.i.bf16 %v429_v43, %v428_v42  ;;  %v430_v47 = vld [vmem:[#allocation2 + $0xda] sm:$0xff]  ;;  %v431_v48 = vld [vmem:[#allocation2 + $0xe2] sm:$0xff]  ;;  %v432_v50 = vld [vmem:[#allocation2 + $0xf2] sm:$0xff] }
  0x3d   : > { %2627 = vrot.lane.b32.xlu1 %v3441_v62, %s3244_s23  ;;  %v433_v51 = vld [vmem:[#allocation2 + $0xfa] sm:$0xff]  ;;  %v3487_v52 = vpack.i.bf16 %v431_v48, %v430_v47  ;;  %v434_v54 = vld [vmem:[#allocation2 + $0x10a] sm:$0xff]  ;;  %v435_v55 = vld [vmem:[#allocation2 + $0x112] sm:$0xff] }
  0x3e   : > { %2632 = vrot.lane.b32.xlu0 %v3445_v63, %s3244_s23  ;;  %v3491_v53 = vpack.i.bf16 %v433_v51, %v432_v50  ;;  %v436_v58 = vld [vmem:[#allocation2 + $0x122] sm:$0xff]  ;;  %v437_v59 = vld [vmem:[#allocation2 + $0x12a] sm:$0xff]  ;;  %v3495_v60 = vpack.i.bf16 %v435_v55, %v434_v54  ;;  %v438_v0 = vld [vmem:[#allocation2 + $0x13a] sm:$0xff] }
  0x3f   : > { %v2721_v61 = vpack.i.bf16 %v437_v59, %v436_v58  ;;  %v439_v1 = vld [vmem:[#allocation2 + $0x142] sm:$0xff]  ;;  %v440_v2 = vld [vmem:[#allocation2 + $0x152] sm:$0xff]  ;;  %v441_v3 = vld [vmem:[#allocation2 + $0x15a] sm:$0xff] }
  0x40   : > { %v442_v6 = vld [vmem:[#allocation2 + $0x16a] sm:$0xff]  ;;  %v443_v7 = vld [vmem:[#allocation2 + $0x172] sm:$0xff]  ;;  %v3504_v9 = vld [vmem:[#allocation2 + $0x20] sm:$0xff] }
  0x41   : > { %2637 = vrot.lane.b32.xlu1 %v2636_v4, %s3244_s23  ;;  %v2726_v4 = vpack.i.bf16 %v439_v1, %v438_v0  ;;  %v3502_v8 = vld [vmem:[#allocation2 + $0x18] sm:$0xff]  ;;  %v3510_v12 = vld [vmem:[#allocation2 + $0x30] sm:$0xff]  ;;  %v3514_v14 = vld [vmem:[#allocation2 + $0x48] sm:$0xff] }
  0x42   : > { %2642 = vrot.lane.b32.xlu0 %v2641_v5, %s3244_s23  ;;  %v2731_v5 = vpack.i.bf16 %v441_v3, %v440_v2  ;;  %v3512_v13 = vld [vmem:[#allocation2 + $0x38] sm:$0xff]  ;;  %v3516_v15 = vld [vmem:[#allocation2 + $0x50] sm:$0xff]  ;;  %v3524_v18 = vld [vmem:[#allocation2 + $0x60] sm:$0xff] }
  0x43   : > { %v3526_v19 = vld [vmem:[#allocation2 + $0x68] sm:$0xff]  ;;  %v3528_v20 = vld [vmem:[#allocation2 + $0x78] sm:$0xff]  ;;  %v3530_v21 = vld [vmem:[#allocation2 + $0x80] sm:$0xff] }
  0x44   : > { %v2756_v24 = vpack.i.bf16 %v3526_v19, %v3524_v18  ;;  %v2761_v25 = vpack.i.bf16 %v3530_v21, %v3528_v20  ;;  %v3538_v26 = vld [vmem:[#allocation2 + $0x90] sm:$0xff]  ;;  %v3540_v27 = vld [vmem:[#allocation2 + $0x98] sm:$0xff]  ;;  %v456_v31 = vld [vmem:[#allocation2 + $0xa8] sm:$0xff] }
  0x45   : > { %2647 = vrot.lane.b32.xlu1 %v2646_v10, %s3244_s23  ;;  %v2736_v10 = vpack.i.bf16 %v443_v7, %v442_v6  ;;  %4424 = vst [vmem:[#allocation3_spill] sm:$0xff] %v3538_v26  ;;  %v3542_v32 = vld [vmem:[#allocation2 + $0xb0] sm:$0xff]  ;;  %v2766_v34 = vpack.i.bf16 %v3540_v27, %v3538_v26  ;;  %v3221_v40 = vld [vmem:[%s4402_s1] sm:$0xff]   ;;  %v3222_v41 = vld [vmem:[%s4402_s1 + $0x8] sm:$0xff]  }
  0x46   : > { %2652 = vrot.lane.b32.xlu0 %v2651_v11, %s3244_s23  ;;  %v2741_v11 = vpack.i.bf16 %v3504_v9, %v3502_v8  ;;  %4425 = vst [vmem:[#allocation4_spill] sm:$0xff] %v3542_v32  ;;  %v2771_v35 = vpack.i.bf16 %v3542_v32, %v456_v31  ;;  %2518 = vmatprep.subr.bf16.mxu0 %v3221_v40  ;;  %v3223_v42 = vld [vmem:[%s4402_s1 + $0x10] ss:$0 sps:$4 sm:$0x33]   ;;  %v314_v43 = vld [vmem:[%s3348_s22 + $0xf8] sm:$0xff]  ;;  %v364_v50 = vld [vmem:[#allocation2 + $0xc0] sm:$0xff] }
  0x47   : > { %2556 = vmatprep.subr.bf16.mxu1 %v3221_v40  ;;  %2519 = vmatpush3.bf16.msra.mxu0 %v3221_v40  ;;  %347 = vst.msk [vmem:[#allocation2 + $0x189] sm:$0xff] %vm237_vm0, %v314_v43  ;;  %v365_v51 = vld [vmem:[#allocation2 + $0xc8] sm:$0xff]  ;;  %v3655_v0 = vld [vmem:[#allocation2 + $0xd8] sm:$0xff]  ;;  %v3657_v1 = vld [vmem:[#allocation2 + $0xe0] sm:$0xff] }
  0x48   : > { %2559 = vmatpush3.bf16.msra.mxu1 %v3221_v40  ;;  %2520 = vmatprep.subr.bf16.mxu0 %v3222_v41  ;;  %v2926_v55 = vpack.i.bf16 %v365_v51, %v364_v50  ;;  %4432 = vst [vmem:[#allocation11_spill] sm:$0xff] %v3655_v0  ;;  %4433 = vst [vmem:[#allocation12_spill] sm:$0xff] %v3657_v1  ;;  %v368_v7 = vld [vmem:[#allocation2 + $0xf0] sm:$0xff]  ;;  %v3712_v50 = vld [vmem:[#allocation2 + $0x158] sm:$0xff] }
  0x49   : > { %2657 = vrot.lane.b32.xlu1 %v2656_v16, %s3244_s23  ;;  %v2746_v16 = vpack.i.bf16 %v3512_v13, %v3510_v12  ;;  %2557 = vmatprep.subr.bf16.mxu1 %v3222_v41  ;;  %v589_v31 = vld [vmem:[#allocation2 + $0xf1] sm:$0xff] }
  0x4a   : > { %2662 = vrot.lane.b32.xlu0 %v2661_v17, %s3245_s24  ;;  %v2751_v17 = vpack.i.bf16 %v3516_v15, %v3514_v14  ;;  %v371_v40 = vld [vmem:[#allocation2 + $0x110] sm:$0xff] }
  0x4b   : > { %2521 = vmatpush3.bf16.msra.mxu0 %v3222_v41 }
  0x4c   : > { %2560 = vmatpush3.bf16.msra.mxu1 %v3222_v41  ;;  %2562 = vmatprep.subr.msk.bf16.mxu0 %vm2009_vm3, %v3223_v42 }
  0x4d   : > { %2667 = vrot.lane.b32.xlu1 %v3456_v22, %s3245_s24  ;;  %2563 = vmatprep.subr.msk.bf16.mxu1 %vm2009_vm3, %v3223_v42 }
  0x4e   : > { %2672 = vrot.lane.b32.xlu0 %v3459_v23, %s3245_s24 }
  0x51   : > { %2677 = vrot.lane.b32.xlu1 %v3463_v28, %s3245_s24 }
  0x52   : > { %2682 = vrot.lane.b32.xlu0 %v3467_v30, %s3245_s24 }
  0x55   : > { %2687 = vrot.lane.b32.xlu1 %v3471_v36, %s3245_s24 }
  0x56   : > { %2692 = vrot.lane.b32.xlu0 %v3475_v38, %s3245_s24 }
  0x59   : > { %2697 = vrot.lane.b32.xlu1 %v3479_v44, %s3245_s24 }
  0x5a   : > { %2702 = vrot.lane.b32.xlu0 %v3483_v46, %s3245_s24 }
  0x5d   : > { %2707 = vrot.lane.b32.xlu1 %v3487_v52, %s3245_s24 }
  0x5e   : > { %2712 = vrot.lane.b32.xlu0 %v3491_v53, %s3245_s24 }
  0x61   : > { %2717 = vrot.lane.b32.xlu1 %v3495_v60, %s3245_s24 }
  0x62   : > { %2722 = vrot.lane.b32.xlu0 %v2721_v61, %s3245_s24 }
  0x65   : > { %2727 = vrot.lane.b32.xlu1 %v2726_v4, %s3245_s24 }
  0x66   : > { %2732 = vrot.lane.b32.xlu0 %v2731_v5, %s3245_s24 }
  0x69   : > { %2737 = vrot.lane.b32.xlu1 %v2736_v10, %s3245_s24  ;;  %v369_v10 = vld [vmem:[#allocation2 + $0xf8] sm:$0xff] }
  0x6a   : > { %2742 = vrot.lane.b32.xlu0 %v2741_v11, %s3246_s25 }
  0x6d   : > { %2747 = vrot.lane.b32.xlu1 %v2746_v16, %s3246_s25 }
  0x6e   : > { %2752 = vrot.lane.b32.xlu0 %v2751_v17, %s3246_s25 }
  0x71   : > { %2757 = vrot.lane.b32.xlu1 %v2756_v24, %s3246_s25 }
  0x72   : > { %2762 = vrot.lane.b32.xlu0 %v2761_v25, %s3246_s25 }
  0x75   : > { %2767 = vrot.lane.b32.xlu1 %v2766_v34, %s3246_s25 }
  0x76   : > { %2772 = vrot.lane.b32.xlu0 %v2771_v35, %s3246_s25 }
  0x79   : > { %2777 = vrot.lane.b32.xlu1 %v3397_v33, %s3247_s28  ;;  %v2011_v33 = vsel %vm2009_vm3, %v3223_v42, 0  ;;  %v591_v42 = vld [vmem:[#allocation2 + $0x109] sm:$0xff] }
  0x7a   : > { %2782 = vrot.lane.b32.xlu0 %v3395_v29, %s3247_s28  ;;  %2523 = vmatpush3.bf16.msra.mxu0 %v2011_v33 }
  0x7b   : > { %2561 = vmatpush3.bf16.msra.mxu1 %v2011_v33  ;;  %v592_v33 = vld [vmem:[#allocation2 + $0x111] sm:$0xff] }
  0x7d   : > { %2787 = vrot.lane.b32.xlu1 %v3456_v22, %s3248_s6  ;;  %v313_v22 = vld [vmem:[%s3348_s22 + $0xf0] sm:$0xff] }
  0x7e   : > { %2792 = vrot.lane.b32.xlu0 %v3459_v23, %s3248_s6  ;;  %346 = vst.msk [vmem:[#allocation2 + $0x181] sm:$0xff] %vm237_vm0, %v313_v22 }
  0x81   : > { %2797 = vrot.lane.b32.xlu1 %v2746_v16, %s3249_s9 }
  0x82   : > { %2802 = vrot.lane.b32.xlu0 %v2751_v17, %s3249_s9 }
  0x85   : > { %2807 = vrot.lane.b32.xlu1 %v3395_v29, %s3250_s10 }
  0x86   : > { %2812 = vrot.lane.b32.xlu0 %v3403_v37, %s3250_s10 }
  0x89   : > { %2817 = vrot.lane.b32.xlu1 %v3459_v23, %s3251_s11 }
  0x8a   : > { %2822 = vrot.lane.b32.xlu0 %v3463_v28, %s3251_s11 }
  0x8b   : > { %v3596_v29 = vpop.permute.xlu0 %2582 }
  0x8d   : > { %2827 = vrot.lane.b32.xlu1 %v3403_v37, %s3247_s28 }
  0x8e   : > { %2832 = vrot.lane.b32.xlu0 %v3409_v39, %s3247_s28 }
  0x91   : > { %2837 = vrot.lane.b32.xlu1 %v3463_v28, %s3248_s6 }
  0x92   : > { %2842 = vrot.lane.b32.xlu0 %v3467_v30, %s3248_s6 }
  0x95   : > { %2847 = vrot.lane.b32.xlu1 %v2756_v24, %s3249_s9 }
  0x96   : > { %2852 = vrot.lane.b32.xlu0 %v2761_v25, %s3249_s9 }
  0x99   : > { %2857 = vrot.lane.b32.xlu1 %v3409_v39, %s3250_s10 }
  0x9a   : > { %2862 = vrot.lane.b32.xlu0 %v3413_v45, %s3250_s10 }
  0x9d   : > { %2867 = vrot.lane.b32.xlu1 %v3467_v30, %s3251_s11 }
  0x9e   : > { %2872 = vrot.lane.b32.xlu0 %v3471_v36, %s3251_s11 }
  0x9f   : > { %v3602_v37 = vpop.permute.xlu1 %2592 }
  0xa0   : > { %v3604_v23 = vpop.permute.xlu0 %2587 }
  0xa1   : > { %2877 = vrot.lane.b32.xlu1 %v3413_v45, %s3247_s28 }
  0xa2   : > { %2882 = vrot.lane.b32.xlu0 %v3417_v49, %s3247_s28 }
  0xa3   : > { %v3610_v39 = vpop.permute.xlu1 %2597 }
  0xa4   : > { %v3612_v28 = vpop.permute.xlu0 %2602 }
  0xa5   : > { %2887 = vrot.lane.b32.xlu1 %v3471_v36, %s3248_s6 }
  0xa6   : > { %2892 = vrot.lane.b32.xlu0 %v3475_v38, %s3248_s6 }
  0xa7   : > { %v3618_v30 = vpop.permute.xlu1 %2607 }
  0xa8   : > { %v3620_v47 = vpop.permute.xlu0 %2612 }
  0xa9   : > { %2897 = vrot.lane.b32.xlu1 %v2766_v34, %s3249_s9  ;;  %v590_v34 = vld [vmem:[#allocation2 + $0xf9] sm:$0xff] }
  0xaa   : > { %2902 = vrot.lane.b32.xlu0 %v2771_v35, %s3249_s9  ;;  %v370_v35 = vld [vmem:[#allocation2 + $0x108] sm:$0xff] }
  0xab   : > { %v3624_v45 = vpop.permute.xlu1 %2617 }
  0xac   : > { %v3626_v48 = vpop.permute.xlu0 %2622 }
  0xad   : > { %4426 = vst [vmem:[#allocation5_spill] sm:$0xff] %v3626_v48  ;;  %2907 = vrot.lane.b32.xlu1 %v3417_v49, %s3250_s10 }
  0xae   : > { %2912 = vrot.lane.b32.xlu0 %v3433_v56, %s3250_s10 }
  0xaf   : > { %v3632_v36 = vpop.permute.xlu1 %2627 }
  0xb0   : > { %4427 = vst [vmem:[#allocation6_spill] sm:$0xff] %v3632_v36  ;;  %v3634_v54 = vpop.permute.xlu0 %2632 }
  0xb1   : > { %4428 = vst [vmem:[#allocation7_spill] sm:$0xff] %v3634_v54  ;;  %2917 = vrot.lane.b32.xlu1 %v3475_v38, %s3251_s11  ;;  %v348_v54 = vld [vmem:[#allocation2] sm:$0xff] }
  0xb2   : > { %2922 = vrot.lane.b32.xlu0 %v3479_v44, %s3251_s11 }
  0xb3   : > { %v3640_v58 = vpop.permute.xlu1 %2637 }
  0xb4   : > { %4429 = vst [vmem:[#allocation8_spill] sm:$0xff] %v3640_v58  ;;  %v3642_v59 = vpop.permute.xlu0 %2642  ;;  %v349_v58 = vld [vmem:[#allocation2 + $0x8] sm:$0xff] }
  0xb5   : > { %4430 = vst [vmem:[#allocation9_spill] sm:$0xff] %v3642_v59  ;;  %2927 = vrot.lane.b32.xlu1 %v2926_v55, %s3246_s25  ;;  %v627_v59 = vld [vmem:[#allocation2 + $0x13a] sm:$0xff] }
  0xb6   : > { %2932 = vrot.lane.b32.xlu0 %v3433_v56, %s3247_s28  ;;  %v2956_v56 = vpack.i.bf16 %v3657_v1, %v3655_v0  ;;  %v2590_v0 = vunpack.i.h.bf16 %v3604_v23 }
  0xb7   : > { %v3647_v49 = vpop.permute.xlu1 %2647 }
  0xb8   : > { %4431 = vst [vmem:[#allocation10_spill] sm:$0xff] %v3647_v49  ;;  %v2653_v61 = vpop.permute.xlu0 %2652  ;;  %v596_v49 = vld [vmem:[#allocation2 + $0x141] sm:$0xff] }
  0xb9   : > { %2937 = vrot.lane.b32.xlu1 %v3437_v57, %s3247_s28  ;;  %v2655_v22 = vunpack.i.h.bf16 %v2653_v61  ;;  %v2654_v43 = vunpack.i.l.bf16 %v2653_v61 }
  0xba   : > { %2942 = vrot.lane.b32.xlu0 %v3479_v44, %s3248_s6 }
  0xbb   : > { %v3653_v38 = vpop.permute.xlu1 %2657  ;;  %v1690_v61 = vsel %vm237_vm0, %v3712_v50, %v2655_v22 }
  0xbc   : > { %v3659_v2 = vpop.permute.xlu0 %2662 }
  0xbd   : > { %2947 = vrot.lane.b32.xlu1 %v3483_v46, %s3248_s6  ;;  %v2664_v1 = vunpack.i.l.bf16 %v3659_v2 }
  0xbe   : > { %2952 = vrot.lane.b32.xlu0 %v2926_v55, %s3249_s9 }
  0xbf   : > { %v3666_v3 = vpop.permute.xlu1 %2667 }
  0xc0   : > { %v3668_v4 = vpop.permute.xlu0 %2672 }
  0xc1   : > { %2957 = vrot.lane.b32.xlu1 %v2956_v56, %s3249_s9 }
  0xc2   : > { %2962 = vrot.lane.b32.xlu0 %v3437_v57, %s3250_s10  ;;  %v2986_v57 = vpack.i.bf16 %v369_v10, %v368_v7  ;;  %v2660_v7 = vunpack.i.h.bf16 %v3653_v38  ;;  %v2659_v10 = vunpack.i.l.bf16 %v3653_v38 }
  0xc3   : > { %v3673_v44 = vpop.permute.xlu1 %2677 }
  0xc4   : > { %v3675_v5 = vpop.permute.xlu0 %2682 }
  0xc5   : > { %2967 = vrot.lane.b32.xlu1 %v3441_v62, %s3250_s10 }
  0xc6   : > { %2972 = vrot.lane.b32.xlu0 %v3483_v46, %s3251_s11 }
  0xc7   : > { %v3681_v6 = vpop.permute.xlu1 %2687 }
  0xc8   : > { %v3683_v11 = vpop.permute.xlu0 %2692 }
  0xc9   : > { %2977 = vrot.lane.b32.xlu1 %v3487_v52, %s3251_s11 }
  0xca   : > { %2982 = vrot.lane.b32.xlu0 %v2956_v56, %s3246_s25  ;;  %v3026_v56 = vpack.i.bf16 %v592_v33, %v591_v42 }
  0xcb   : > { %v3688_v16 = vpop.permute.xlu1 %2697 }
  0xcc   : > { %v3690_v17 = vpop.permute.xlu0 %2702 }
  0xcd   : > { %4434 = vst [vmem:[#allocation13_spill] sm:$0xff] %v3690_v17  ;;  %2987 = vrot.lane.b32.xlu1 %v2986_v57, %s3246_s25  ;;  %v2669_v17 = vunpack.i.l.bf16 %v3666_v3 }
  0xce   : > { %2992 = vrot.lane.b32.xlu0 %v3441_v62, %s3247_s28  ;;  %v3016_v62 = vpack.i.bf16 %v371_v40, %v370_v35 }
  0xcf   : > { %v3695_v46 = vpop.permute.xlu1 %2707 }
  0xd0   : > { %4435 = vst [vmem:[#allocation14_spill] sm:$0xff] %v3695_v46  ;;  %v3697_v24 = vpop.permute.xlu0 %2712 }
  0xd1   : > { %4436 = vst [vmem:[#allocation15_spill] sm:$0xff] %v3697_v24  ;;  %2997 = vrot.lane.b32.xlu1 %v3445_v63, %s3247_s28  ;;  %v3021_v63 = vpack.i.bf16 %v590_v34, %v589_v31  ;;  %v3723_v31 = vld [vmem:[#allocation2 + $0x168] sm:$0xff]  ;;  %v3725_v34 = vld [vmem:[#allocation2 + $0x170] sm:$0xff]  ;;  %v503_v24 = vld [vmem:[#allocation2 + $0x159] sm:$0xff] }
  0xd2   : > { %3002 = vrot.lane.b32.xlu0 %v3487_v52, %s3248_s6  ;;  %v3710_v52 = vld [vmem:[#allocation2 + $0x150] sm:$0xff] }
  0xd3   : > { %v3703_v25 = vpop.permute.xlu1 %2717 }
  0xd4   : > { %4437 = vst [vmem:[#allocation16_spill] sm:$0xff] %v3703_v25  ;;  %v3705_v41 = vpop.permute.xlu0 %2722  ;;  %v628_v25 = vld [vmem:[#allocation2 + $0x142] sm:$0xff] }
  0xd5   : > { %4438 = vst [vmem:[#allocation17_spill] sm:$0xff] %v3705_v41  ;;  %3007 = vrot.lane.b32.xlu1 %v3491_v53, %s3248_s6  ;;  %v1691_v41 = vsel %vm237_vm0, %v3723_v31, %v2659_v10  ;;  %v498_v10 = vld [vmem:[#allocation2 + $0x121] sm:$0xff]  ;;  %v3790_v48 = vpack.i.bf16 %v628_v25, %v627_v59 }
  0xd6   : > { %3012 = vrot.lane.b32.xlu0 %v2986_v57, %s3249_s9  ;;  %v1689_v57 = vsel %vm237_vm0, %v3710_v52, %v2654_v43  ;;  %v1692_v43 = vsel %vm237_vm0, %v3725_v34, %v2660_v7 }
  0xd7   : > { %v3714_v51 = vpop.permute.xlu1 %2727 }
  0xd8   : > { %4439 = vst [vmem:[#allocation18_spill] sm:$0xff] %v3714_v51  ;;  %v2733_v55 = vpop.permute.xlu0 %2732 }
  0xd9   : > { %v2735_v35 = vunpack.i.h.bf16 %v2733_v55  ;;  %v2734_v40 = vunpack.i.l.bf16 %v2733_v55  ;;  %3017 = vrot.lane.b32.xlu1 %v3016_v62, %s3249_s9 }
  0xda   : > { %3022 = vrot.lane.b32.xlu0 %v3021_v63, %s3250_s10 }
  0xdb   : > { %v3729_v42 = vsel %vm1693_vm4, %v1689_v57, %v2734_v40  ;;  %v3732_v38 = vsel %vm1693_vm4, %v1690_v61, %v2735_v35  ;;  %v2738_v33 = vpop.permute.xlu1 %2737  ;;  %v372_v61 = vld [vmem:[#allocation2 + $0x120] sm:$0xff]  ;;  %v373_v57 = vld [vmem:[#allocation2 + $0x128] sm:$0xff] }
  0xdc   : > { %4440 = vst [vmem:[#allocation19_spill] sm:$0xff] %v3729_v42  ;;  %4441 = vst [vmem:[#allocation20_spill] sm:$0xff] %v3732_v38  ;;  %v2740_v55 = vunpack.i.h.bf16 %v2738_v33  ;;  %v2739_v51 = vunpack.i.l.bf16 %v2738_v33  ;;  %v3734_v22 = vpop.permute.xlu0 %2742  ;;  %v3046_v7 = vpack.i.bf16 %v373_v57, %v372_v61  ;;  %v374_v57 = vld [vmem:[#allocation2 + $0x138] sm:$0xff]  ;;  %v375_v42 = vld [vmem:[#allocation2 + $0x140] sm:$0xff] }
  0xdd   : > { %3027 = vrot.lane.b32.xlu1 %v3026_v56, %s3250_s10  ;;  %v2745_v32 = vunpack.i.h.bf16 %v3734_v22 }
  0xde   : > { %v3742_v63 = vsel %vm1693_vm4, %v1692_v43, %v2740_v55  ;;  %v3745_v40 = vsel %vm1693_vm4, %v1691_v41, %v2739_v51  ;;  %3032 = vrot.lane.b32.xlu0 %v3491_v53, %s3251_s11  ;;  %v499_v55 = vld [vmem:[#allocation2 + $0x129] sm:$0xff] }
  0xdf   : > { %4442 = vst [vmem:[#allocation21_spill] sm:$0xff] %v3742_v63  ;;  %4443 = vst [vmem:[#allocation22_spill] sm:$0xff] %v3745_v40  ;;  %v3749_v35 = vpop.permute.xlu1 %2747  ;;  %v3056_v53 = vpack.i.bf16 %v499_v55, %v498_v10  ;;  %v530_v51 = vld [vmem:[#allocation2 + $0x122] sm:$0xff]  ;;  %v531_v63 = vld [vmem:[#allocation2 + $0x12a] sm:$0xff]  ;;  %v3777_v55 = vpack.i.bf16 %v375_v42, %v374_v57  ;;  %v2589_v42 = vunpack.i.l.bf16 %v3604_v23  ;;  %v2665_v57 = vunpack.i.h.bf16 %v3659_v2 }
  0xe0   : > { %v3751_v33 = vpop.permute.xlu0 %2752  ;;  %v2744_v23 = vunpack.i.l.bf16 %v3734_v22  ;;  %v3798_v2 = vpack.i.bf16 %v3712_v50, %v3710_v52  ;;  %v2750_v59 = vunpack.i.h.bf16 %v3749_v35  ;;  %v2749_v25 = vunpack.i.l.bf16 %v3749_v35 }
  0xe1   : > { %3037 = vrot.lane.b32.xlu1 %v3495_v60, %s3251_s11  ;;  %v1663_v22 = vsel %vm237_vm0, %v3502_v8, %v2589_v42  ;;  %v1664_v52 = vsel %vm237_vm0, %v3504_v9, %v2590_v0 }
  0xe2   : > { %3042 = vrot.lane.b32.xlu0 %v3016_v62, %s3246_s25  ;;  %v3767_v62 = vpack.i.bf16 %v531_v63, %v530_v51  ;;  %v2585_v63 = vunpack.i.h.bf16 %v3596_v29  ;;  %v2584_v51 = vunpack.i.l.bf16 %v3596_v29  ;;  %v2670_v29 = vunpack.i.h.bf16 %v3666_v3 }
  0xe3   : > { %v3756_v43 = vpop.permute.xlu1 %2757 }
  0xe4   : > { %v3758_v41 = vpop.permute.xlu0 %2762  ;;  %v1662_v3 = vsel %vm237_vm0, %v349_v58, %v2585_v63 }
  0xe5   : > { %3047 = vrot.lane.b32.xlu1 %v3046_v7, %s3246_s25 }
  0xe6   : > { %3052 = vrot.lane.b32.xlu0 %v3026_v56, %s3247_s28  ;;  %v595_v56 = vld [vmem:[#allocation2 + $0x139] sm:$0xff] }
  0xe7   : > { %v3762_v40 = vpop.permute.xlu1 %2767 }
  0xe8   : > { %v3764_v38 = vpop.permute.xlu0 %2772 }
  0xe9   : > { %3057 = vrot.lane.b32.xlu1 %v3056_v53, %s3247_s28 }
  0xea   : > { %3062 = vrot.lane.b32.xlu0 %v3495_v60, %s3248_s6  ;;  %v502_v60 = vld [vmem:[#allocation2 + $0x151] sm:$0xff] }
  0xeb   : > { %v3771_v61 = vpop.permute.xlu1 %2777  ;;  %v3800_v26 = vpack.i.bf16 %v503_v24, %v502_v60  ;;  %v1695_v24 = vsel %vm1693_vm4, %v1662_v3, %v2665_v57 }
  0xec   : > { %v3773_v10 = vpop.permute.xlu0 %2782  ;;  %v2780_v35 = vunpack.i.h.bf16 %v3771_v61 }
  0xed   : > { %3067 = vrot.lane.b32.xlu1 %v3767_v62, %s3248_s6  ;;  %v2785_v9 = vunpack.i.h.bf16 %v3773_v10  ;;  %v2784_v0 = vunpack.i.l.bf16 %v3773_v10 }
  0xee   : > { %3072 = vrot.lane.b32.xlu0 %v3046_v7, %s3249_s9  ;;  %v3788_v7 = vpack.i.bf16 %v596_v49, %v595_v56  ;;  %v1661_v49 = vsel %vm237_vm0, %v348_v54, %v2584_v51  ;;  %v1696_v54 = vsel %vm1693_vm4, %v1663_v22, %v2669_v17  ;;  %v1697_v56 = vsel %vm1693_vm4, %v1664_v52, %v2670_v29 }
  0xef   : > { %v2788_v46 = vpop.permute.xlu1 %2787  ;;  %v1694_v50 = vsel %vm1693_vm4, %v1661_v49, %v2664_v1  ;;  %v1728_v51 = vsel %vm1726_vm5, %v1695_v24, %v2745_v32  ;;  %v1729_v1 = vsel %vm1726_vm5, %v1696_v54, %v2749_v25  ;;  %v1730_v17 = vsel %vm1726_vm5, %v1697_v56, %v2750_v59 }
  0xf0   : > { %v2793_v36 = vpop.permute.xlu0 %2792  ;;  %v1727_v8 = vsel %vm1726_vm5, %v1694_v50, %v2744_v23  ;;  %v2790_v60 = vunpack.i.h.bf16 %v2788_v46  ;;  %v2789_v42 = vunpack.i.l.bf16 %v2788_v46  ;;  %v1761_v3 = vsel %vm1759_vm6, %v1728_v51, %v2780_v35 }
  0xf1   : > { %3077 = vrot.lane.b32.xlu1 %v3777_v55, %s3249_s9  ;;  %v2794_v57 = vunpack.i.l.bf16 %v2793_v36  ;;  %v1762_v59 = vsel %vm1759_vm6, %v1729_v1, %v2784_v0  ;;  %v1763_v46 = vsel %vm1759_vm6, %v1730_v17, %v2785_v9 }
  0xf2   : > { %3082 = vrot.lane.b32.xlu0 %v3056_v53, %s3250_s10  ;;  %v2779_v53 = vunpack.i.l.bf16 %v3771_v61  ;;  %v2795_v61 = vunpack.i.h.bf16 %v2793_v36 }
  0xf3   : > { %v2798_v58 = vpop.permute.xlu1 %2797  ;;  %v1795_v54 = vsel %vm1792_vm7, %v1762_v59, %v2794_v57 }
  0xf4   : > { %v2803_v63 = vpop.permute.xlu0 %2802  ;;  %v2800_v32 = vunpack.i.h.bf16 %v2798_v58  ;;  %v2799_v29 = vunpack.i.l.bf16 %v2798_v58  ;;  %v1760_v10 = vsel %vm1759_vm6, %v1727_v8, %v2779_v53  ;;  %v1796_v56 = vsel %vm1792_vm7, %v1763_v46, %v2795_v61 }
  0xf5   : > { %3087 = vrot.lane.b32.xlu1 %v3788_v7, %s3250_s10  ;;  %v2805_v49 = vunpack.i.h.bf16 %v2803_v63  ;;  %v2804_v22 = vunpack.i.l.bf16 %v2803_v63  ;;  %v1793_v36 = vsel %vm1792_vm7, %v1760_v10, %v2789_v42  ;;  %v535_v10 = vld [vmem:[#allocation2 + $0x15a] sm:$0xff] }
  0xf6   : > { %3092 = vrot.lane.b32.xlu0 %v3767_v62, %s3251_s11  ;;  %v1794_v62 = vsel %vm1792_vm7, %v1761_v3, %v2790_v60  ;;  %v1826_v35 = vsel %vm1825_vm8, %v1793_v36, %v2799_v29  ;;  %v631_v36 = vld [vmem:[#allocation2 + $0x16a] sm:$0xff] }
  0xf7   : > { %v2808_v23 = vpop.permute.xlu1 %2807  ;;  %v1827_v53 = vsel %vm1825_vm8, %v1794_v62, %v2800_v32  ;;  %v1828_v8 = vsel %vm1825_vm8, %v1795_v54, %v2804_v22  ;;  %v1829_v51 = vsel %vm1825_vm8, %v1796_v56, %v2805_v49  ;;  %v2595_v62 = vunpack.i.h.bf16 %v3602_v37  ;;  %v474_v54 = vld [vmem:[#allocation2 + $0x180] sm:$0xff]  ;;  %v475_v56 = vld [vmem:[#allocation2 + $0x188] sm:$0xff] }
  0xf8   : > { %v2813_v25 = vpop.permute.xlu0 %2812  ;;  %v2810_v52 = vunpack.i.h.bf16 %v2808_v23  ;;  %v2809_v24 = vunpack.i.l.bf16 %v2808_v23  ;;  %v534_v23 = vld [vmem:[#allocation2 + $0x152] sm:$0xff] }
  0xf9   : > { %3097 = vrot.lane.b32.xlu1 %v3790_v48, %s3251_s11  ;;  %v2815_v50 = vunpack.i.h.bf16 %v2813_v25  ;;  %v2814_v58 = vunpack.i.l.bf16 %v2813_v25 }
  0xfa   : > { %3102 = vrot.lane.b32.xlu0 %v3777_v55, %s3246_s25  ;;  %v1859_v55 = vsel %vm1858_vm9, %v1826_v35, %v2809_v24  ;;  %v1860_v42 = vsel %vm1858_vm9, %v1827_v53, %v2810_v52  ;;  %v599_v52 = vld [vmem:[#allocation2 + $0x169] sm:$0xff]  ;;  %v600_v24 = vld [vmem:[#allocation2 + $0x171] sm:$0xff]  ;;  %v2600_v35 = vunpack.i.h.bf16 %v3610_v39  ;;  %v2599_v53 = vunpack.i.l.bf16 %v3610_v39 }
  0xfb   : > { %v2818_v63 = vpop.permute.xlu1 %2817  ;;  %v1861_v61 = vsel %vm1858_vm9, %v1828_v8, %v2814_v58  ;;  %v1862_v57 = vsel %vm1858_vm9, %v1829_v51, %v2815_v50  ;;  %v2594_v50 = vunpack.i.l.bf16 %v3602_v37  ;;  %v632_v58 = vld [vmem:[#allocation2 + $0x172] sm:$0xff]  ;;  %v2674_v8 = vunpack.i.l.bf16 %v3668_v4 }
  0xfc   : > { %v2820_v9 = vunpack.i.h.bf16 %v2818_v63  ;;  %v2819_v0 = vunpack.i.l.bf16 %v2818_v63  ;;  %v2823_v1 = vpop.permute.xlu0 %2822  ;;  %v2675_v63 = vunpack.i.h.bf16 %v3668_v4  ;;  %v2679_v37 = vunpack.i.l.bf16 %v3673_v44 }
  0xfd   : > { %v2825_v17 = vunpack.i.h.bf16 %v2823_v1  ;;  %v2824_v60 = vunpack.i.l.bf16 %v2823_v1  ;;  %3107 = vrot.lane.b32.xlu1 %v3798_v2, %s3246_s25  ;;  %v3879_v1 = vpack.i.bf16 %v600_v24, %v599_v52  ;;  %v2754_v39 = vunpack.i.l.bf16 %v3751_v33 }
  0xfe   : > { %3112 = vrot.lane.b32.xlu0 %v3788_v7, %s3247_s28  ;;  %v1892_v32 = vsel %vm1891_vm10, %v1859_v55, %v2819_v0  ;;  %v1893_v29 = vsel %vm1891_vm10, %v1860_v42, %v2820_v9  ;;  %v3862_v7 = vpack.i.bf16 %v535_v10, %v534_v23  ;;  %v2680_v9 = vunpack.i.h.bf16 %v3673_v44 }
  0xff   : > { %v1894_v3 = vsel %vm1891_vm10, %v1861_v61, %v2824_v60  ;;  %v1895_v49 = vsel %vm1891_vm10, %v1862_v57, %v2825_v17  ;;  %v3855_v22 = vpop.permute.xlu1 %2827  ;;  %v1924_v25 = vpack.c.bf16 %v1893_v29, %v1892_v32  ;;  %v2755_v17 = vunpack.i.h.bf16 %v3751_v33 }
 0x100   : > { %v1925_v59 = vpack.c.bf16 %v1895_v49, %v1894_v3  ;;  %v3857_v46 = vpop.permute.xlu0 %2832  ;;  %v3885_v4 = vpack.i.bf16 %v632_v58, %v631_v36  ;;  %v3887_v60 = vpack.i.bf16 %v475_v56, %v474_v54  ;;  %v1665_v44 = vsel %vm237_vm0, %v3510_v12, %v2594_v50 }
 0x101   : > { %3117 = vrot.lane.b32.xlu1 %v3800_v26, %s3247_s28  ;;  %2524 = vmatprep.mubr.msk.bf16.mxu0 %vm1960_vm11, %v1924_v25  ;;  %v2759_v55 = vunpack.i.l.bf16 %v3756_v43  ;;  %v1668_v33 = vsel %vm237_vm0, %v3516_v15, %v2600_v35  ;;  %v1667_v42 = vsel %vm237_vm0, %v3514_v14, %v2599_v53  ;;  %v1698_v12 = vsel %vm1693_vm4, %v1665_v44, %v2674_v8 }
 0x102   : > { %3122 = vrot.lane.b32.xlu0 %v3790_v48, %s3248_s6  ;;  %2525 = vmatmul.mubr.msk.bf16.vlgmr.msra.gmra.mrb[0].mxu0 %vm1960_vm11, %v1925_v59  ;;  %v3877_v48 = vpack.i.bf16 %v3725_v34, %v3723_v31  ;;  %v1666_v31 = vsel %vm237_vm0, %v3512_v13, %v2595_v62  ;;  %v2760_v34 = vunpack.i.h.bf16 %v3756_v43  ;;  %v1701_v13 = vsel %vm1693_vm4, %v1668_v33, %v2680_v9 }
 0x103   : > { %v2838_v51 = vpop.permute.xlu1 %2837  ;;  %v1699_v61 = vsel %vm1693_vm4, %v1666_v31, %v2675_v63  ;;  %v1700_v32 = vsel %vm1693_vm4, %v1667_v42, %v2679_v37  ;;  %v2830_v43 = vunpack.i.h.bf16 %v3855_v22  ;;  %v2829_v29 = vunpack.i.l.bf16 %v3855_v22 }
 0x104   : > { %v2843_v0 = vpop.permute.xlu0 %2842  ;;  %v1731_v23 = vsel %vm1726_vm5, %v1698_v12, %v2754_v39  ;;  %v1732_v15 = vsel %vm1726_vm5, %v1699_v61, %v2755_v17  ;;  %v2835_v14 = vunpack.i.h.bf16 %v3857_v46  ;;  %v2834_v10 = vunpack.i.l.bf16 %v3857_v46 }
 0x105   : > { %3127 = vrot.lane.b32.xlu1 %v3862_v7, %s3248_s6  ;;  %v1733_v3 = vsel %vm1726_vm5, %v1700_v32, %v2759_v55  ;;  %v1734_v49 = vsel %vm1726_vm5, %v1701_v13, %v2760_v34  ;;  %v2840_v25 = vunpack.i.h.bf16 %v2838_v51  ;;  %v2839_v59 = vunpack.i.l.bf16 %v2838_v51 }
 0x106   : > { %3132 = vrot.lane.b32.xlu0 %v3798_v2, %s3249_s9  ;;  %v2845_v22 = vunpack.i.h.bf16 %v2843_v0  ;;  %v2844_v52 = vunpack.i.l.bf16 %v2843_v0  ;;  %v1764_v50 = vsel %vm1759_vm6, %v1731_v23, %v2829_v29  ;;  %v1765_v46 = vsel %vm1759_vm6, %v1732_v15, %v2830_v43  ;;  %v506_v23 = vld [vmem:[#allocation2 + $0x181] sm:$0xff]  ;;  %v507_v15 = vld [vmem:[#allocation2 + $0x189] sm:$0xff] }
 0x107   : > { %v2848_v57 = vpop.permute.xlu1 %2847  ;;  %v1767_v35 = vsel %vm1759_vm6, %v1734_v49, %v2835_v14  ;;  %v1766_v53 = vsel %vm1759_vm6, %v1733_v3, %v2834_v10  ;;  %v1798_v51 = vsel %vm1792_vm7, %v1765_v46, %v2840_v25  ;;  %v3961_v46 = vld [vmem:[#allocation2 + $0x199] sm:$0xff] }
 0x108   : > { %v2853_v2 = vpop.permute.xlu0 %2852  ;;  %v2850_v24 = vunpack.i.h.bf16 %v2848_v57  ;;  %v2849_v36 = vunpack.i.l.bf16 %v2848_v57  ;;  %v1799_v0 = vsel %vm1792_vm7, %v1766_v53, %v2844_v52  ;;  %v1800_v17 = vsel %vm1792_vm7, %v1767_v35, %v2845_v22  ;;  %v538_v22 = vld [vmem:[#allocation2 + $0x182] sm:$0xff] }
 0x109   : > { %3137 = vrot.lane.b32.xlu1 %v3877_v48, %s3249_s9  ;;  %v2855_v58 = vunpack.i.h.bf16 %v2853_v2  ;;  %v2854_v54 = vunpack.i.l.bf16 %v2853_v2  ;;  %v2605_v52 = vunpack.i.h.bf16 %v3612_v28  ;;  %v2685_v35 = vunpack.i.h.bf16 %v3675_v5 }
 0x10a   : > { %3142 = vrot.lane.b32.xlu0 %v3800_v26, %s3250_s10  ;;  %v1797_v26 = vsel %vm1792_vm7, %v1764_v50, %v2839_v59  ;;  %v1831_v44 = vsel %vm1825_vm8, %v1798_v51, %v2850_v24  ;;  %v539_v24 = vld [vmem:[#allocation2 + $0x18a] sm:$0xff]  ;;  %v2604_v50 = vunpack.i.l.bf16 %v3612_v28  ;;  %v2684_v53 = vunpack.i.l.bf16 %v3675_v5  ;;  %v3971_v28 = vld [vmem:[#allocation2 + $0x1a2] sm:$0xff] }
 0x10b   : > { %v2858_v62 = vpop.permute.xlu1 %2857  ;;  %v1830_v39 = vsel %vm1825_vm8, %v1797_v26, %v2849_v36  ;;  %v1832_v34 = vsel %vm1825_vm8, %v1799_v0, %v2854_v54  ;;  %v1833_v55 = vsel %vm1825_vm8, %v1800_v17, %v2855_v58  ;;  %v3955_v36 = vld [vmem:[#allocation2 + $0x198] sm:$0xff]  ;;  %v3963_v58 = vld [vmem:[#allocation2 + $0x1a1] sm:$0xff]  ;;  %v2610_v54 = vunpack.i.h.bf16 %v3618_v30 }
 0x10c   : > { %v2863_v56 = vpop.permute.xlu0 %2862  ;;  %v2860_v63 = vunpack.i.h.bf16 %v2858_v62  ;;  %v2859_v8 = vunpack.i.l.bf16 %v2858_v62  ;;  %v572_v62 = vld [vmem:[#allocation2 + $0x1a0] sm:$0xff]  ;;  %v2689_v26 = vunpack.i.l.bf16 %v3681_v6  ;;  %v2765_v0 = vunpack.i.h.bf16 %v3758_v41 }
 0x10d   : > { %3147 = vrot.lane.b32.xlu1 %v3879_v1, %s3250_s10  ;;  %v2865_v9 = vunpack.i.h.bf16 %v2863_v56  ;;  %v2864_v37 = vunpack.i.l.bf16 %v2863_v56  ;;  %v2609_v56 = vunpack.i.l.bf16 %v3618_v30  ;;  %v1670_v30 = vsel %vm237_vm0, %v3526_v19, %v2605_v52 }
 0x10e   : > { %3152 = vrot.lane.b32.xlu0 %v3862_v7, %s3251_s11  ;;  %v1863_v12 = vsel %vm1858_vm9, %v1830_v39, %v2859_v8  ;;  %v1864_v7 = vsel %vm1858_vm9, %v1831_v44, %v2860_v63  ;;  %v3969_v8 = vld [vmem:[#allocation2 + $0x19a] sm:$0xff]  ;;  %v2764_v5 = vunpack.i.l.bf16 %v3758_v41  ;;  %v3206_v17 = vpack.i.bf16 %v3963_v58, %v3961_v46 }
 0x10f   : > { %v2868_v31 = vpop.permute.xlu1 %2867  ;;  %v1865_v32 = vsel %vm1858_vm9, %v1832_v34, %v2864_v37  ;;  %v1866_v43 = vsel %vm1858_vm9, %v1833_v55, %v2865_v9  ;;  %v3975_v9 = vpack.i.bf16 %v539_v24, %v538_v22  ;;  %v3196_v37 = vpack.i.bf16 %v572_v62, %v3955_v36 }
 0x110   : > { %v2870_v33 = vunpack.i.h.bf16 %v2868_v31  ;;  %v2869_v42 = vunpack.i.l.bf16 %v2868_v31  ;;  %v2873_v61 = vpop.permute.xlu0 %2872  ;;  %v2770_v39 = vunpack.i.h.bf16 %v3762_v40  ;;  %v2769_v44 = vunpack.i.l.bf16 %v3762_v40 }
 0x111   : > { %v2875_v57 = vunpack.i.h.bf16 %v2873_v61  ;;  %v2874_v13 = vunpack.i.l.bf16 %v2873_v61  ;;  %3157 = vrot.lane.b32.xlu1 %v3885_v4, %s3251_s11  ;;  %v3216_v19 = vpack.i.bf16 %v3971_v28, %v3969_v8  ;;  %v1672_v41 = vsel %vm237_vm0, %v3530_v21, %v2610_v54 }
 0x112   : > { %v1896_v29 = vsel %vm1891_vm10, %v1863_v12, %v2869_v42  ;;  %v1897_v2 = vsel %vm1891_vm10, %v1864_v7, %v2870_v33  ;;  %3162 = vrot.lane.b32.xlu0 %v3877_v48, %s3246_s25  ;;  %v3953_v48 = vpack.i.bf16 %v507_v15, %v506_v23  ;;  %v1671_v31 = vsel %vm237_vm0, %v3528_v20, %v2609_v56 }
 0x113   : > { %v1926_v14 = vpack.c.bf16 %v1897_v2, %v1896_v29  ;;  %v1898_v10 = vsel %vm1891_vm10, %v1865_v32, %v2874_v13  ;;  %v1899_v3 = vsel %vm1891_vm10, %v1866_v43, %v2875_v57  ;;  %v3945_v49 = vpop.permute.xlu1 %2877  ;;  %v1704_v40 = vsel %vm1693_vm4, %v1671_v31, %v2689_v26 }
 0x114   : > { %v1927_v25 = vpack.c.bf16 %v1899_v3, %v1898_v10  ;;  %v3947_v59 = vpop.permute.xlu0 %2882  ;;  %v2879_v42 = vunpack.i.l.bf16 %v3945_v49  ;;  %v1737_v57 = vsel %vm1726_vm5, %v1704_v40, %v2769_v44  ;;  %v2700_v8 = vunpack.i.h.bf16 %v3688_v16 }
 0x115   : > { %3167 = vrot.lane.b32.xlu1 %v3887_v60, %s3246_s25  ;;  %2528 = vmatprep.mubr.msk.bf16.mxu0 %vm1960_vm11, %v1926_v14  ;;  %v2885_v20 = vunpack.i.h.bf16 %v3947_v59  ;;  %v2884_v7 = vunpack.i.l.bf16 %v3947_v59  ;;  %v2699_v28 = vunpack.i.l.bf16 %v3688_v16  ;;  %v3224_v16 = vld [vmem:[#allocation2 + $0xa8] sm:$0xff] }
 0x116   : > { %3172 = vrot.lane.b32.xlu0 %v3879_v1, %s3247_s28  ;;  %2529 = vmatmul.mubr.msk.bf16.gmra.mrb[4].mxu0 %vm1960_vm11, %v1927_v25  ;;  %v2690_v1 = vunpack.i.h.bf16 %v3681_v6  ;;  %v1669_v6 = vsel %vm237_vm0, %v3524_v18, %v2604_v50  ;;  %v1703_v18 = vsel %vm1693_vm4, %v1670_v30, %v2685_v35 }
 0x117   : > { %v2888_v63 = vpop.permute.xlu1 %2887  ;;  %v1702_v34 = vsel %vm1693_vm4, %v1669_v6, %v2684_v53  ;;  %v1736_v21 = vsel %vm1726_vm5, %v1703_v18, %v2765_v0  ;;  %v1770_v52 = vsel %vm1759_vm6, %v1737_v57, %v2884_v7 }
 0x118   : > { %v2893_v51 = vpop.permute.xlu0 %2892  ;;  %v1705_v33 = vsel %vm1693_vm4, %v1672_v41, %v2690_v1  ;;  %v1735_v12 = vsel %vm1726_vm5, %v1702_v34, %v2764_v5  ;;  %v2890_v32 = vunpack.i.h.bf16 %v2888_v63  ;;  %v2889_v43 = vunpack.i.l.bf16 %v2888_v63 }
 0x119   : > { %3177 = vrot.lane.b32.xlu1 %v3953_v48, %s3247_s28  ;;  %v1738_v13 = vsel %vm1726_vm5, %v1705_v33, %v2770_v39  ;;  %v2895_v29 = vunpack.i.h.bf16 %v2893_v51  ;;  %v2894_v2 = vunpack.i.l.bf16 %v2893_v51  ;;  %v1768_v10 = vsel %vm1759_vm6, %v1735_v12, %v2879_v42 }
 0x11a   : > { %3182 = vrot.lane.b32.xlu0 %v3885_v4, %s3248_s6  ;;  %v2880_v4 = vunpack.i.h.bf16 %v3945_v49  ;;  %v1771_v22 = vsel %vm1759_vm6, %v1738_v13, %v2885_v20  ;;  %v2620_v42 = vunpack.i.h.bf16 %v3624_v45  ;;  %v2619_v12 = vunpack.i.l.bf16 %v3624_v45 }
 0x11b   : > { %v2898_v55 = vpop.permute.xlu1 %2897  ;;  %v1803_v58 = vsel %vm1792_vm7, %v1770_v52, %v2894_v2  ;;  %v1804_v54 = vsel %vm1792_vm7, %v1771_v22, %v2895_v29  ;;  %v2694_v20 = vunpack.i.l.bf16 %v3683_v11 }
 0x11c   : > { %v2903_v61 = vpop.permute.xlu0 %2902  ;;  %v2900_v23 = vunpack.i.h.bf16 %v2898_v55  ;;  %v2899_v15 = vunpack.i.l.bf16 %v2898_v55  ;;  %v1769_v3 = vsel %vm1759_vm6, %v1736_v21, %v2880_v4  ;;  %v2614_v4 = vunpack.i.l.bf16 %v3620_v47 }
 0x11d   : > { %3187 = vrot.lane.b32.xlu1 %v3975_v9, %s3248_s6  ;;  %v2905_v49 = vunpack.i.h.bf16 %v2903_v61  ;;  %v2904_v25 = vunpack.i.l.bf16 %v2903_v61  ;;  %v1802_v62 = vsel %vm1792_vm7, %v1769_v3, %v2890_v32  ;;  %v2695_v21 = vunpack.i.h.bf16 %v3683_v11  ;;  %v4445_v32 = vld [vmem:[#allocation4_spill] sm:$0xff] }
 0x11e   : > { %3192 = vrot.lane.b32.xlu0 %v3887_v60, %s3249_s9  ;;  %v1801_v60 = vsel %vm1792_vm7, %v1768_v10, %v2889_v43  ;;  %v1835_v35 = vsel %vm1825_vm8, %v1802_v62, %v2900_v23  ;;  %v1676_v45 = vsel %vm237_vm0, %v4445_v32, %v2620_v42  ;;  %v2775_v43 = vunpack.i.h.bf16 %v3764_v38 }
 0x11f   : > { %v2908_v14 = vpop.permute.xlu1 %2907  ;;  %v1834_v56 = vsel %vm1825_vm8, %v1801_v60, %v2899_v15  ;;  %v1836_v63 = vsel %vm1825_vm8, %v1803_v58, %v2904_v25  ;;  %v1837_v1 = vsel %vm1825_vm8, %v1804_v54, %v2905_v49  ;;  %v1709_v3 = vsel %vm1693_vm4, %v1676_v45, %v2700_v8 }
 0x120   : > { %v2913_v59 = vpop.permute.xlu0 %2912  ;;  %v2910_v24 = vunpack.i.h.bf16 %v2908_v14  ;;  %v2909_v36 = vunpack.i.l.bf16 %v2908_v14  ;;  %v1675_v14 = vsel %vm237_vm0, %v3224_v16, %v2619_v12 }
 0x121   : > { %3197 = vrot.lane.b32.xlu1 %v3196_v37, %s3249_s9  ;;  %v2915_v50 = vunpack.i.h.bf16 %v2913_v59  ;;  %v2914_v46 = vunpack.i.l.bf16 %v2913_v59  ;;  %v1708_v49 = vsel %vm1693_vm4, %v1675_v14, %v2699_v28 }
 0x122   : > { %3202 = vrot.lane.b32.xlu0 %v3953_v48, %s3250_s10  ;;  %v1867_v30 = vsel %vm1858_vm9, %v1834_v56, %v2909_v36  ;;  %v1868_v48 = vsel %vm1858_vm9, %v1835_v35, %v2910_v24 }
 0x123   : > { %v2918_v53 = vpop.permute.xlu1 %2917  ;;  %v1869_v6 = vsel %vm1858_vm9, %v1836_v63, %v2914_v46  ;;  %v1870_v39 = vsel %vm1858_vm9, %v1837_v1, %v2915_v50 }
 0x124   : > { %v2920_v26 = vunpack.i.h.bf16 %v2918_v53  ;;  %v2919_v51 = vunpack.i.l.bf16 %v2918_v53  ;;  %v2923_v37 = vpop.permute.xlu0 %2922 }
 0x125   : > { %v2925_v0 = vunpack.i.h.bf16 %v2923_v37  ;;  %v2924_v5 = vunpack.i.l.bf16 %v2923_v37  ;;  %3207 = vrot.lane.b32.xlu1 %v3206_v17, %s3250_s10 }
 0x126   : > { %v1900_v44 = vsel %vm1891_vm10, %v1867_v30, %v2919_v51  ;;  %v1901_v41 = vsel %vm1891_vm10, %v1868_v48, %v2920_v26  ;;  %3212 = vrot.lane.b32.xlu0 %v3975_v9, %s3251_s11  ;;  %v2615_v9 = vunpack.i.h.bf16 %v3620_v47  ;;  %v4444_v47 = vld [vmem:[#allocation3_spill] sm:$0xff] }
 0x127   : > { %v1928_v31 = vpack.c.bf16 %v1901_v41, %v1900_v44  ;;  %v1902_v34 = vsel %vm1891_vm10, %v1869_v6, %v2924_v5  ;;  %v1903_v18 = vsel %vm1891_vm10, %v1870_v39, %v2925_v0  ;;  %v2928_v55 = vpop.permute.xlu1 %2927  ;;  %v1673_v13 = vsel %vm237_vm0, %v4444_v47, %v2614_v4 }
 0x128   : > { %v1929_v33 = vpack.c.bf16 %v1903_v18, %v1902_v34  ;;  %v2933_v40 = vpop.permute.xlu0 %2932  ;;  %v1674_v57 = vsel %vm237_vm0, %v3540_v27, %v2615_v9  ;;  %v2930_v11 = vunpack.i.h.bf16 %v2928_v55  ;;  %v2929_v2 = vunpack.i.l.bf16 %v2928_v55 }
 0x129   : > { %3217 = vrot.lane.b32.xlu1 %v3216_v19, %s3251_s11  ;;  %2532 = vmatprep.mubr.msk.bf16.mxu0 %vm1960_vm11, %v1928_v31  ;;  %v2774_v19 = vunpack.i.l.bf16 %v3764_v38  ;;  %v2935_v23 = vunpack.i.h.bf16 %v2933_v40  ;;  %v2934_v15 = vunpack.i.l.bf16 %v2933_v40  ;;  %v1706_v10 = vsel %vm1693_vm4, %v1673_v13, %v2694_v20 }
 0x12a   : > { %2533 = vmatmul.mubr.msk.bf16.gmra.mrb[8].mxu0 %vm1960_vm11, %v1929_v33  ;;  %v1707_v27 = vsel %vm1693_vm4, %v1674_v57, %v2695_v21  ;;  %v1741_v50 = vsel %vm1726_vm5, %v1708_v49, %v2929_v2  ;;  %v1742_v46 = vsel %vm1726_vm5, %v1709_v3, %v2930_v11  ;;  %v4449_v49 = vld [vmem:[#allocation14_spill] sm:$0xff] }
 0x12b   : > { %v2938_v17 = vpop.permute.xlu1 %2937  ;;  %v1739_v25 = vsel %vm1726_vm5, %v1706_v10, %v2774_v19  ;;  %v1740_v52 = vsel %vm1726_vm5, %v1707_v27, %v2775_v43  ;;  %v4448_v10 = vld [vmem:[#allocation13_spill] sm:$0xff] }
 0x12c   : > { %v2943_v61 = vpop.permute.xlu0 %2942  ;;  %v2939_v24 = vunpack.i.l.bf16 %v2938_v17  ;;  %v1772_v58 = vsel %vm1759_vm6, %v1739_v25, %v2934_v15  ;;  %v1773_v54 = vsel %vm1759_vm6, %v1740_v52, %v2935_v23  ;;  %v2940_v56 = vunpack.i.h.bf16 %v2938_v17  ;;  %v4447_v23 = vld [vmem:[#allocation6_spill] sm:$0xff] }
 0x12d   : > { %v2945_v59 = vunpack.i.h.bf16 %v2943_v61  ;;  %v2944_v38 = vunpack.i.l.bf16 %v2943_v61  ;;  %v2630_v15 = vunpack.i.h.bf16 %v4447_v23  ;;  %v2629_v14 = vunpack.i.l.bf16 %v4447_v23  ;;  %v3225_v52 = vld [vmem:[#allocation2 + $0xc8] sm:$0xff] }
 0x12e   : > { %v1774_v48 = vsel %vm1759_vm6, %v1741_v50, %v2939_v24  ;;  %v1775_v18 = vsel %vm1759_vm6, %v1742_v46, %v2940_v56  ;;  %v2705_v27 = vunpack.i.h.bf16 %v4448_v10  ;;  %v2704_v3 = vunpack.i.l.bf16 %v4448_v10 }
 0x12f   : > { %v2948_v7 = vpop.permute.xlu1 %2947  ;;  %v1805_v1 = vsel %vm1792_vm7, %v1772_v58, %v2944_v38  ;;  %v1806_v26 = vsel %vm1792_vm7, %v1773_v54, %v2945_v59  ;;  %v2710_v25 = vunpack.i.h.bf16 %v4449_v49  ;;  %v2709_v59 = vunpack.i.l.bf16 %v4449_v49 }
 0x130   : > { %v2953_v29 = vpop.permute.xlu0 %2952  ;;  %v2949_v35 = vunpack.i.l.bf16 %v2948_v7  ;;  %v2950_v51 = vunpack.i.h.bf16 %v2948_v7 }
 0x131   : > { %v2955_v36 = vunpack.i.h.bf16 %v2953_v29  ;;  %v2954_v60 = vunpack.i.l.bf16 %v2953_v29  ;;  %v4446_v29 = vld [vmem:[#allocation5_spill] sm:$0xff] }
 0x132   : > { %v1807_v55 = vsel %vm1792_vm7, %v1774_v48, %v2949_v35  ;;  %v1808_v17 = vsel %vm1792_vm7, %v1775_v18, %v2950_v51  ;;  %v2625_v11 = vunpack.i.h.bf16 %v4446_v29  ;;  %v2624_v2 = vunpack.i.l.bf16 %v4446_v29 }
 0x133   : > { %v2958_v22 = vpop.permute.xlu1 %2957  ;;  %v1838_v0 = vsel %vm1825_vm8, %v1805_v1, %v2954_v60  ;;  %v1839_v5 = vsel %vm1825_vm8, %v1806_v26, %v2955_v36  ;;  %v3226_v36 = vld [vmem:[#allocation2 + $0xc0] sm:$0xff] }
 0x134   : > { %v2963_v62 = vpop.permute.xlu0 %2962  ;;  %v2959_v37 = vunpack.i.l.bf16 %v2958_v22  ;;  %v2960_v6 = vunpack.i.h.bf16 %v2958_v22  ;;  %v1678_v24 = vsel %vm237_vm0, %v3225_v52, %v2625_v11  ;;  %v1677_v60 = vsel %vm237_vm0, %v3226_v36, %v2624_v2 }
 0x135   : > { %v2965_v53 = vunpack.i.h.bf16 %v2963_v62  ;;  %v2964_v63 = vunpack.i.l.bf16 %v2963_v62  ;;  %v4450_v62 = vld [vmem:[#allocation12_spill] sm:$0xff]  ;;  %v1710_v26 = vsel %vm1693_vm4, %v1677_v60, %v2704_v3  ;;  %v1711_v51 = vsel %vm1693_vm4, %v1678_v24, %v2705_v27 }
 0x136   : > { %v1840_v9 = vsel %vm1825_vm8, %v1807_v55, %v2959_v37  ;;  %v1841_v12 = vsel %vm1825_vm8, %v1808_v17, %v2960_v6  ;;  %v1680_v50 = vsel %vm237_vm0, %v4450_v62, %v2630_v15 }
 0x137   : > { %v2968_v30 = vpop.permute.xlu1 %2967  ;;  %v1871_v33 = vsel %vm1858_vm9, %v1838_v0, %v2964_v63  ;;  %v1872_v40 = vsel %vm1858_vm9, %v1839_v5, %v2965_v53  ;;  %v4451_v63 = vld [vmem:[#allocation11_spill] sm:$0xff]  ;;  %v1713_v37 = vsel %vm1693_vm4, %v1680_v50, %v2710_v25 }
 0x138   : > { %v2973_v39 = vpop.permute.xlu0 %2972  ;;  %v2970_v44 = vunpack.i.h.bf16 %v2968_v30  ;;  %v2969_v41 = vunpack.i.l.bf16 %v2968_v30  ;;  %v1679_v1 = vsel %vm237_vm0, %v4451_v63, %v2629_v14 }
 0x139   : > { %v2975_v31 = vunpack.i.h.bf16 %v2973_v39  ;;  %v2974_v34 = vunpack.i.l.bf16 %v2973_v39  ;;  %v1712_v30 = vsel %vm1693_vm4, %v1679_v1, %v2709_v59 }
 0x13a   : > { %v1873_v19 = vsel %vm1858_vm9, %v1840_v9, %v2969_v41  ;;  %v1874_v7 = vsel %vm1858_vm9, %v1841_v12, %v2970_v44 }
 0x13b   : > { %v1904_v4 = vsel %vm1891_vm10, %v1871_v33, %v2974_v34  ;;  %v1905_v42 = vsel %vm1891_vm10, %v1872_v40, %v2975_v31  ;;  %v2978_v61 = vpop.permute.xlu1 %2977 }
 0x13c   : > { %v1930_v21 = vpack.c.bf16 %v1905_v42, %v1904_v4  ;;  %v2980_v20 = vunpack.i.h.bf16 %v2978_v61  ;;  %v2979_v8 = vunpack.i.l.bf16 %v2978_v61  ;;  %v2983_v28 = vpop.permute.xlu0 %2982 }
 0x13d   : > { %v2984_v38 = vunpack.i.l.bf16 %v2983_v28  ;;  %v2985_v46 = vunpack.i.h.bf16 %v2983_v28 }
 0x13e   : > { %v1906_v57 = vsel %vm1891_vm10, %v1873_v19, %v2979_v8  ;;  %v1907_v47 = vsel %vm1891_vm10, %v1874_v7, %v2980_v20  ;;  %2536 = vmatprep.mubr.msk.bf16.mxu0 %vm1960_vm11, %v1930_v21 }
 0x13f   : > { %v1931_v13 = vpack.c.bf16 %v1907_v47, %v1906_v57  ;;  %v2988_v32 = vpop.permute.xlu1 %2987  ;;  %v1743_v48 = vsel %vm1726_vm5, %v1710_v26, %v2984_v38  ;;  %v1744_v39 = vsel %vm1726_vm5, %v1711_v51, %v2985_v46  ;;  %v4454_v26 = vld [vmem:[#allocation15_spill] sm:$0xff] }
 0x140   : > { %v2993_v45 = vpop.permute.xlu0 %2992  ;;  %v2990_v54 = vunpack.i.h.bf16 %v2988_v32  ;;  %v2989_v56 = vunpack.i.l.bf16 %v2988_v32  ;;  %v2715_v51 = vunpack.i.h.bf16 %v4454_v26 }
 0x141   : > { %2537 = vmatmul.mubr.msk.bf16.gmra.mrb[12].mxu0 %vm1960_vm11, %v1931_v13  ;;  %v2995_v35 = vunpack.i.h.bf16 %v2993_v45  ;;  %v2994_v53 = vunpack.i.l.bf16 %v2993_v45 }
 0x142   : > { %v1745_v18 = vsel %vm1726_vm5, %v1712_v30, %v2989_v56  ;;  %v1746_v55 = vsel %vm1726_vm5, %v1713_v37, %v2990_v54  ;;  %v2714_v37 = vunpack.i.l.bf16 %v4454_v26  ;;  %v4455_v30 = vld [vmem:[#allocation16_spill] sm:$0xff] }
 0x143   : > { %v2998_v43 = vpop.permute.xlu1 %2997  ;;  %v1776_v33 = vsel %vm1759_vm6, %v1743_v48, %v2994_v53  ;;  %v1777_v40 = vsel %vm1759_vm6, %v1744_v39, %v2995_v35  ;;  %v4453_v35 = vld [vmem:[#allocation8_spill] sm:$0xff]  ;;  %v2720_v48 = vunpack.i.h.bf16 %v4455_v30 }
 0x144   : > { %v3003_v16 = vpop.permute.xlu0 %3002  ;;  %v2999_v44 = vunpack.i.l.bf16 %v2998_v43  ;;  %v3000_v17 = vunpack.i.h.bf16 %v2998_v43  ;;  %v2640_v53 = vunpack.i.h.bf16 %v4453_v35  ;;  %v2639_v1 = vunpack.i.l.bf16 %v4453_v35  ;;  %v3227_v39 = vld [vmem:[#allocation2 + $0xf8] sm:$0xff] }
 0x145   : > { %v3005_v0 = vunpack.i.h.bf16 %v3003_v16  ;;  %v3004_v5 = vunpack.i.l.bf16 %v3003_v16 }
 0x146   : > { %v1778_v28 = vsel %vm1759_vm6, %v1745_v18, %v2999_v44  ;;  %v1779_v29 = vsel %vm1759_vm6, %v1746_v55, %v3000_v17 }
 0x147   : > { %v3008_v22 = vpop.permute.xlu1 %3007  ;;  %v1809_v61 = vsel %vm1792_vm7, %v1776_v33, %v3004_v5  ;;  %v1810_v12 = vsel %vm1792_vm7, %v1777_v40, %v3005_v0  ;;  %v2719_v0 = vunpack.i.l.bf16 %v4455_v30 }
 0x148   : > { %v3013_v58 = vpop.permute.xlu0 %3012  ;;  %v3009_v9 = vunpack.i.l.bf16 %v3008_v22  ;;  %v3010_v21 = vunpack.i.h.bf16 %v3008_v22 }
 0x149   : > { %v3015_v41 = vunpack.i.h.bf16 %v3013_v58  ;;  %v3014_v31 = vunpack.i.l.bf16 %v3013_v58  ;;  %v4452_v58 = vld [vmem:[#allocation7_spill] sm:$0xff] }
 0x14a   : > { %v1811_v11 = vsel %vm1792_vm7, %v1778_v28, %v3009_v9  ;;  %v1812_v15 = vsel %vm1792_vm7, %v1779_v29, %v3010_v21  ;;  %v2635_v54 = vunpack.i.h.bf16 %v4452_v58  ;;  %v2634_v56 = vunpack.i.l.bf16 %v4452_v58 }
 0x14b   : > { %v3018_v6 = vpop.permute.xlu1 %3017  ;;  %v1842_v19 = vsel %vm1825_vm8, %v1809_v61, %v3014_v31  ;;  %v1843_v7 = vsel %vm1825_vm8, %v1810_v12, %v3015_v41  ;;  %v3228_v41 = vld [vmem:[#allocation2 + $0xf0] sm:$0xff] }
 0x14c   : > { %v3023_v34 = vpop.permute.xlu0 %3022  ;;  %v3019_v20 = vunpack.i.l.bf16 %v3018_v6  ;;  %v3020_v57 = vunpack.i.h.bf16 %v3018_v6  ;;  %v1682_v44 = vsel %vm237_vm0, %v3227_v39, %v2635_v54  ;;  %v1681_v31 = vsel %vm237_vm0, %v3228_v41, %v2634_v56 }
 0x14d   : > { %v3025_v4 = vunpack.i.h.bf16 %v3023_v34  ;;  %v3024_v42 = vunpack.i.l.bf16 %v3023_v34  ;;  %v3229_v34 = vld [vmem:[#allocation2 + $0x110] sm:$0xff]  ;;  %v1714_v12 = vsel %vm1693_vm4, %v1681_v31, %v2714_v37  ;;  %v1715_v21 = vsel %vm1693_vm4, %v1682_v44, %v2715_v51 }
 0x14e   : > { %v1844_v16 = vsel %vm1825_vm8, %v1811_v11, %v3019_v20  ;;  %v1845_v3 = vsel %vm1825_vm8, %v1812_v15, %v3020_v57  ;;  %v1684_v18 = vsel %vm237_vm0, %v3229_v34, %v2640_v53 }
 0x14f   : > { %v3028_v8 = vpop.permute.xlu1 %3027  ;;  %v1875_v2 = vsel %vm1858_vm9, %v1842_v19, %v3024_v42  ;;  %v1876_v23 = vsel %vm1858_vm9, %v1843_v7, %v3025_v4  ;;  %v3230_v42 = vld [vmem:[#allocation2 + $0x108] sm:$0xff]  ;;  %v1717_v20 = vsel %vm1693_vm4, %v1684_v18, %v2720_v48 }
 0x150   : > { %v3033_v47 = vpop.permute.xlu0 %3032  ;;  %v3030_v13 = vunpack.i.h.bf16 %v3028_v8  ;;  %v3029_v32 = vunpack.i.l.bf16 %v3028_v8  ;;  %v1683_v61 = vsel %vm237_vm0, %v3230_v42, %v2639_v1 }
 0x151   : > { %v3035_v45 = vunpack.i.h.bf16 %v3033_v47  ;;  %v3034_v43 = vunpack.i.l.bf16 %v3033_v47  ;;  %v1716_v8 = vsel %vm1693_vm4, %v1683_v61, %v2719_v0 }
 0x152   : > { %v1877_v22 = vsel %vm1858_vm9, %v1844_v16, %v3029_v32  ;;  %v1878_v52 = vsel %vm1858_vm9, %v1845_v3, %v3030_v13 }
 0x153   : > { %v3038_v14 = vpop.permute.xlu1 %3037  ;;  %v1908_v10 = vsel %vm1891_vm10, %v1875_v2, %v3034_v43  ;;  %v1909_v27 = vsel %vm1891_vm10, %v1876_v23, %v3035_v45 }
 0x154   : > { %v3040_v49 = vunpack.i.h.bf16 %v3038_v14  ;;  %v3039_v25 = vunpack.i.l.bf16 %v3038_v14  ;;  %v3043_v59 = vpop.permute.xlu0 %3042  ;;  %v1932_v38 = vpack.c.bf16 %v1909_v27, %v1908_v10 }
 0x155   : > { %v3044_v5 = vunpack.i.l.bf16 %v3043_v59  ;;  %v3045_v55 = vunpack.i.h.bf16 %v3043_v59 }
 0x156   : > { %v1910_v24 = vsel %vm1891_vm10, %v1877_v22, %v3039_v25  ;;  %v1911_v36 = vsel %vm1891_vm10, %v1878_v52, %v3040_v49  ;;  %2540 = vmatprep.mubr.msk.bf16.mxu1 %vm1960_vm11, %v1932_v38 }
 0x157   : > { %v1933_v60 = vpack.c.bf16 %v1911_v36, %v1910_v24  ;;  %v3048_v62 = vpop.permute.xlu1 %3047  ;;  %v1747_v28 = vsel %vm1726_vm5, %v1714_v12, %v3044_v5  ;;  %v1748_v47 = vsel %vm1726_vm5, %v1715_v21, %v3045_v55  ;;  %v4458_v12 = vld [vmem:[#allocation17_spill] sm:$0xff] }
 0x158   : > { %v3053_v50 = vpop.permute.xlu0 %3052  ;;  %v3050_v40 = vunpack.i.h.bf16 %v3048_v62  ;;  %v3049_v17 = vunpack.i.l.bf16 %v3048_v62  ;;  %v2725_v21 = vunpack.i.h.bf16 %v4458_v12 }
 0x159   : > { %2541 = vmatmul.mubr.msk.bf16.vlgmr.msra.gmra.mrb[0].mxu1 %vm1960_vm11, %v1933_v60  ;;  %v3055_v9 = vunpack.i.h.bf16 %v3053_v50  ;;  %v3054_v4 = vunpack.i.l.bf16 %v3053_v50 }
 0x15a   : > { %v1749_v29 = vsel %vm1726_vm5, %v1716_v8, %v3049_v17  ;;  %v1750_v11 = vsel %vm1726_vm5, %v1717_v20, %v3050_v40  ;;  %v2724_v20 = vunpack.i.l.bf16 %v4458_v12  ;;  %v4459_v8 = vld [vmem:[#allocation18_spill] sm:$0xff] }
 0x15b   : > { %v4137_v46 = vpop.permute.xlu1 %3057  ;;  %v1780_v2 = vsel %vm1759_vm6, %v1747_v28, %v3054_v4  ;;  %v1781_v23 = vsel %vm1759_vm6, %v1748_v47, %v3055_v9  ;;  %v4457_v9 = vld [vmem:[#allocation10_spill] sm:$0xff]  ;;  %v2730_v28 = vunpack.i.h.bf16 %v4459_v8 }
 0x15c   : > { %v3063_v63 = vpop.permute.xlu0 %3062  ;;  %v3059_v13 = vunpack.i.l.bf16 %v4137_v46  ;;  %v3060_v15 = vunpack.i.h.bf16 %v4137_v46  ;;  %v2650_v4 = vunpack.i.h.bf16 %v4457_v9  ;;  %v2649_v61 = vunpack.i.l.bf16 %v4457_v9  ;;  %v3231_v47 = vld [vmem:[#allocation2 + $0x128] sm:$0xff] }
 0x15d   : > { %v3065_v19 = vunpack.i.h.bf16 %v3063_v63  ;;  %v3064_v7 = vunpack.i.l.bf16 %v3063_v63 }
 0x15e   : > { %v1782_v38 = vsel %vm1759_vm6, %v1749_v29, %v3059_v13  ;;  %v1783_v58 = vsel %vm1759_vm6, %v1750_v11, %v3060_v15 }
 0x15f   : > { %v3068_v6 = vpop.permute.xlu1 %3067  ;;  %v1813_v27 = vsel %vm1792_vm7, %v1780_v2, %v3064_v7  ;;  %v1814_v3 = vsel %vm1792_vm7, %v1781_v23, %v3065_v19  ;;  %v2729_v19 = vunpack.i.l.bf16 %v4459_v8 }
 0x160   : > { %v3073_v33 = vpop.permute.xlu0 %3072  ;;  %v3069_v16 = vunpack.i.l.bf16 %v3068_v6  ;;  %v3070_v49 = vunpack.i.h.bf16 %v3068_v6 }
 0x161   : > { %v3075_v32 = vunpack.i.h.bf16 %v3073_v33  ;;  %v3074_v45 = vunpack.i.l.bf16 %v3073_v33  ;;  %v4456_v33 = vld [vmem:[#allocation9_spill] sm:$0xff] }
 0x162   : > { %v1815_v54 = vsel %vm1792_vm7, %v1782_v38, %v3069_v16  ;;  %v1816_v53 = vsel %vm1792_vm7, %v1783_v58, %v3070_v49  ;;  %v2645_v40 = vunpack.i.h.bf16 %v4456_v33  ;;  %v2644_v17 = vunpack.i.l.bf16 %v4456_v33 }
 0x163   : > { %v3078_v57 = vpop.permute.xlu1 %3077  ;;  %v1846_v22 = vsel %vm1825_vm8, %v1813_v27, %v3074_v45  ;;  %v1847_v52 = vsel %vm1825_vm8, %v1814_v3, %v3075_v32  ;;  %v3232_v32 = vld [vmem:[#allocation2 + $0x120] sm:$0xff] }
 0x164   : > { %v3083_v43 = vpop.permute.xlu0 %3082  ;;  %v3079_v25 = vunpack.i.l.bf16 %v3078_v57  ;;  %v3080_v24 = vunpack.i.h.bf16 %v3078_v57  ;;  %v1686_v13 = vsel %vm237_vm0, %v3231_v47, %v2645_v40  ;;  %v1685_v45 = vsel %vm237_vm0, %v3232_v32, %v2644_v17 }
 0x165   : > { %v3085_v14 = vunpack.i.h.bf16 %v3083_v43  ;;  %v3084_v10 = vunpack.i.l.bf16 %v3083_v43  ;;  %v3233_v43 = vld [vmem:[#allocation2 + $0x140] sm:$0xff]  ;;  %v1718_v3 = vsel %vm1693_vm4, %v1685_v45, %v2724_v20  ;;  %v1719_v49 = vsel %vm1693_vm4, %v1686_v13, %v2725_v21 }
 0x166   : > { %v1848_v63 = vsel %vm1825_vm8, %v1815_v54, %v3079_v25  ;;  %v1849_v37 = vsel %vm1825_vm8, %v1816_v53, %v3080_v24  ;;  %v1688_v29 = vsel %vm237_vm0, %v3233_v43, %v2650_v4 }
 0x167   : > { %v3088_v59 = vpop.permute.xlu1 %3087  ;;  %v1879_v56 = vsel %vm1858_vm9, %v1846_v22, %v3084_v10  ;;  %v1880_v35 = vsel %vm1858_vm9, %v1847_v52, %v3085_v14  ;;  %v3234_v10 = vld [vmem:[#allocation2 + $0x138] sm:$0xff]  ;;  %v1721_v25 = vsel %vm1693_vm4, %v1688_v29, %v2730_v28 }
 0x168   : > { %v3093_v36 = vpop.permute.xlu0 %3092  ;;  %v3090_v60 = vunpack.i.h.bf16 %v3088_v59  ;;  %v3089_v62 = vunpack.i.l.bf16 %v3088_v59  ;;  %v1687_v27 = vsel %vm237_vm0, %v3234_v10, %v2649_v61 }
 0x169   : > { %v3095_v50 = vunpack.i.h.bf16 %v3093_v36  ;;  %v3094_v46 = vunpack.i.l.bf16 %v3093_v36  ;;  %v1720_v59 = vsel %vm1693_vm4, %v1687_v27, %v2729_v19 }
 0x16a   : > { %v1881_v6 = vsel %vm1858_vm9, %v1848_v63, %v3089_v62  ;;  %v1882_v39 = vsel %vm1858_vm9, %v1849_v37, %v3090_v60 }
 0x16b   : > { %v1912_v1 = vsel %vm1891_vm10, %v1879_v56, %v3094_v46  ;;  %v1913_v26 = vsel %vm1891_vm10, %v1880_v35, %v3095_v50  ;;  %v3098_v51 = vpop.permute.xlu1 %3097 }
 0x16c   : > { %v1934_v30 = vpack.c.bf16 %v1913_v26, %v1912_v1  ;;  %v3100_v48 = vunpack.i.h.bf16 %v3098_v51  ;;  %v3099_v0 = vunpack.i.l.bf16 %v3098_v51  ;;  %v3103_v5 = vpop.permute.xlu0 %3102 }
 0x16d   : > { %v3104_v7 = vunpack.i.l.bf16 %v3103_v5  ;;  %v3105_v11 = vunpack.i.h.bf16 %v3103_v5 }
 0x16e   : > { %v1914_v44 = vsel %vm1891_vm10, %v1881_v6, %v3099_v0  ;;  %v1915_v41 = vsel %vm1891_vm10, %v1882_v39, %v3100_v48  ;;  %2544 = vmatprep.mubr.msk.bf16.mxu1 %vm1960_vm11, %v1934_v30 }
 0x16f   : > { %v1935_v31 = vpack.c.bf16 %v1915_v41, %v1914_v44  ;;  %v3108_v34 = vpop.permute.xlu1 %3107  ;;  %v1751_v38 = vsel %vm1726_vm5, %v1718_v3, %v3104_v7  ;;  %v1752_v36 = vsel %vm1726_vm5, %v1719_v49, %v3105_v11 }
 0x170   : > { %v3113_v18 = vpop.permute.xlu0 %3112  ;;  %v3110_v23 = vunpack.i.h.bf16 %v3108_v34  ;;  %v3109_v15 = vunpack.i.l.bf16 %v3108_v34 }
 0x171   : > { %2545 = vmatmul.mubr.msk.bf16.gmra.mrb[4].mxu1 %vm1960_vm11, %v1935_v31  ;;  %v3115_v16 = vunpack.i.h.bf16 %v3113_v18  ;;  %v3114_v14 = vunpack.i.l.bf16 %v3113_v18 }
 0x172   : > { %v1753_v58 = vsel %vm1726_vm5, %v1720_v59, %v3109_v15  ;;  %v1754_v54 = vsel %vm1726_vm5, %v1721_v25, %v3110_v23  ;;  %v4460_v25 = vld [vmem:[#allocation19_spill] sm:$0xff] }
 0x173   : > { %v4183_v55 = vpop.permute.xlu1 %3117  ;;  %v1784_v56 = vsel %vm1759_vm6, %v1751_v38, %v3114_v14  ;;  %v1785_v35 = vsel %vm1759_vm6, %v1752_v36, %v3115_v16 }
 0x174   : > { %v3123_v42 = vpop.permute.xlu0 %3122  ;;  %v3119_v60 = vunpack.i.l.bf16 %v4183_v55  ;;  %v3120_v53 = vunpack.i.h.bf16 %v4183_v55 }
 0x175   : > { %v3125_v22 = vunpack.i.h.bf16 %v3123_v42  ;;  %v3124_v52 = vunpack.i.l.bf16 %v3123_v42 }
 0x176   : > { %v1786_v5 = vsel %vm1759_vm6, %v1753_v58, %v3119_v60  ;;  %v1787_v33 = vsel %vm1759_vm6, %v1754_v54, %v3120_v53  ;;  %v4462_v58 = vld [vmem:[#allocation22_spill] sm:$0xff] }
 0x177   : > { %v3128_v57 = vpop.permute.xlu1 %3127  ;;  %v1817_v51 = vsel %vm1792_vm7, %v1784_v56, %v3124_v52  ;;  %v1818_v37 = vsel %vm1792_vm7, %v1785_v35, %v3125_v22  ;;  %v4463_v56 = vld [vmem:[#allocation21_spill] sm:$0xff] }
 0x178   : > { %v3133_v2 = vpop.permute.xlu0 %3132  ;;  %v3129_v63 = vunpack.i.l.bf16 %v3128_v57  ;;  %v3130_v30 = vunpack.i.h.bf16 %v3128_v57 }
 0x179   : > { %v3135_v62 = vunpack.i.h.bf16 %v3133_v2  ;;  %v3134_v50 = vunpack.i.l.bf16 %v3133_v2 }
 0x17a   : > { %v1819_v40 = vsel %vm1792_vm7, %v1786_v5, %v3129_v63  ;;  %v1820_v4 = vsel %vm1792_vm7, %v1787_v33, %v3130_v30 }
 0x17b   : > { %v3138_v24 = vpop.permute.xlu1 %3137  ;;  %v1850_v6 = vsel %vm1825_vm8, %v1817_v51, %v3134_v50  ;;  %v1851_v39 = vsel %vm1825_vm8, %v1818_v37, %v3135_v62 }
 0x17c   : > { %v3143_v46 = vpop.permute.xlu0 %3142  ;;  %v3139_v48 = vunpack.i.l.bf16 %v3138_v24  ;;  %v3140_v44 = vunpack.i.h.bf16 %v3138_v24  ;;  %v4461_v24 = vld [vmem:[#allocation20_spill] sm:$0xff] }
 0x17d   : > { %v3145_v1 = vunpack.i.h.bf16 %v3143_v46  ;;  %v3144_v26 = vunpack.i.l.bf16 %v3143_v46 }
 0x17e   : > { %v1852_v42 = vsel %vm1825_vm8, %v1819_v40, %v3139_v48  ;;  %v1853_v20 = vsel %vm1825_vm8, %v1820_v4, %v3140_v44 }
 0x17f   : > { %v3148_v0 = vpop.permute.xlu1 %3147  ;;  %v1883_v17 = vsel %vm1858_vm9, %v1850_v6, %v3144_v26  ;;  %v1884_v9 = vsel %vm1858_vm9, %v1851_v39, %v3145_v1 }
 0x180   : > { %v3153_v41 = vpop.permute.xlu0 %3152  ;;  %v3150_v31 = vunpack.i.h.bf16 %v3148_v0  ;;  %v3149_v34 = vunpack.i.l.bf16 %v3148_v0 }
 0x181   : > { %v3155_v18 = vunpack.i.h.bf16 %v3153_v41  ;;  %v3154_v55 = vunpack.i.l.bf16 %v3153_v41 }
 0x182   : > { %v1885_v57 = vsel %vm1858_vm9, %v1852_v42, %v3149_v34  ;;  %v1886_v47 = vsel %vm1858_vm9, %v1853_v20, %v3150_v31 }
 0x183   : > { %v1916_v61 = vsel %vm1891_vm10, %v1883_v17, %v3154_v55  ;;  %v1917_v12 = vsel %vm1891_vm10, %v1884_v9, %v3155_v18  ;;  %v3158_v21 = vpop.permute.xlu1 %3157 }
 0x184   : > { %v1936_v8 = vpack.c.bf16 %v1917_v12, %v1916_v61  ;;  %v3160_v28 = vunpack.i.h.bf16 %v3158_v21  ;;  %v3159_v19 = vunpack.i.l.bf16 %v3158_v21  ;;  %v3163_v7 = vpop.permute.xlu0 %3162 }
 0x185   : > { %v3164_v23 = vunpack.i.l.bf16 %v3163_v7  ;;  %v3165_v16 = vunpack.i.h.bf16 %v3163_v7 }
 0x186   : > { %v1918_v13 = vsel %vm1891_vm10, %v1885_v57, %v3159_v19  ;;  %v1919_v32 = vsel %vm1891_vm10, %v1886_v47, %v3160_v28  ;;  %2548 = vmatprep.mubr.msk.bf16.mxu1 %vm1960_vm11, %v1936_v8 }
 0x187   : > { %v1937_v45 = vpack.c.bf16 %v1919_v32, %v1918_v13  ;;  %v3168_v43 = vpop.permute.xlu1 %3167  ;;  %v1755_v59 = vsel %vm1726_vm5, %v4460_v25, %v3164_v23  ;;  %v1756_v36 = vsel %vm1726_vm5, %v4461_v24, %v3165_v16 }
 0x188   : > { %v3173_v29 = vpop.permute.xlu0 %3172  ;;  %v3170_v10 = vunpack.i.h.bf16 %v3168_v43  ;;  %v3169_v27 = vunpack.i.l.bf16 %v3168_v43 }
 0x189   : > { %2549 = vmatmul.mubr.msk.bf16.gmra.mrb[8].mxu1 %vm1960_vm11, %v1937_v45  ;;  %v3175_v3 = vunpack.i.h.bf16 %v3173_v29  ;;  %v3174_v49 = vunpack.i.l.bf16 %v3173_v29 }
 0x18a   : > { %v1757_v54 = vsel %vm1726_vm5, %v4462_v58, %v3169_v27  ;;  %v1758_v35 = vsel %vm1726_vm5, %v4463_v56, %v3170_v10 }
 0x18b   : > { %v3178_v11 = vpop.permute.xlu1 %3177  ;;  %v1788_v53 = vsel %vm1759_vm6, %v1755_v59, %v3174_v49  ;;  %v1789_v63 = vsel %vm1759_vm6, %v1756_v36, %v3175_v3 }
 0x18c   : > { %v3183_v2 = vpop.permute.xlu0 %3182  ;;  %v3179_v60 = vunpack.i.l.bf16 %v3178_v11  ;;  %v3180_v1 = vunpack.i.h.bf16 %v3178_v11 }
 0x18d   : > { %v3185_v38 = vunpack.i.h.bf16 %v3183_v2  ;;  %v3184_v22 = vunpack.i.l.bf16 %v3183_v2 }
 0x18e   : > { %v1790_v39 = vsel %vm1759_vm6, %v1757_v54, %v3179_v60  ;;  %v1791_v17 = vsel %vm1759_vm6, %v1758_v35, %v3180_v1 }
 0x18f   : > { %v3188_v15 = vpop.permute.xlu1 %3187  ;;  %v1821_v30 = vsel %vm1792_vm7, %v1788_v53, %v3184_v22  ;;  %v1822_v48 = vsel %vm1792_vm7, %v1789_v63, %v3185_v38 }
 0x190   : > { %v3193_v14 = vpop.permute.xlu0 %3192  ;;  %v3189_v26 = vunpack.i.l.bf16 %v3188_v15  ;;  %v3190_v0 = vunpack.i.h.bf16 %v3188_v15 }
 0x191   : > { %v3195_v62 = vunpack.i.h.bf16 %v3193_v14  ;;  %v3194_v50 = vunpack.i.l.bf16 %v3193_v14 }
 0x192   : > { %v1823_v9 = vsel %vm1792_vm7, %v1790_v39, %v3189_v26  ;;  %v1824_v61 = vsel %vm1792_vm7, %v1791_v17, %v3190_v0 }
 0x193   : > { %v3198_v52 = vpop.permute.xlu1 %3197  ;;  %v1854_v44 = vsel %vm1825_vm8, %v1821_v30, %v3194_v50  ;;  %v1855_v41 = vsel %vm1825_vm8, %v1822_v48, %v3195_v62 }
 0x194   : > { %v3203_v46 = vpop.permute.xlu0 %3202  ;;  %v3199_v5 = vunpack.i.l.bf16 %v3198_v52  ;;  %v3200_v31 = vunpack.i.h.bf16 %v3198_v52 }
 0x195   : > { %v3205_v51 = vunpack.i.h.bf16 %v3203_v46  ;;  %v3204_v37 = vunpack.i.l.bf16 %v3203_v46 }
 0x196   : > { %v1856_v12 = vsel %vm1825_vm8, %v1823_v9, %v3199_v5  ;;  %v1857_v28 = vsel %vm1825_vm8, %v1824_v61, %v3200_v31 }
 0x197   : > { %v3208_v6 = vpop.permute.xlu1 %3207  ;;  %v1887_v4 = vsel %vm1858_vm9, %v1854_v44, %v3204_v37  ;;  %v1888_v42 = vsel %vm1858_vm9, %v1855_v41, %v3205_v51 }
 0x198   : > { %v3213_v34 = vpop.permute.xlu0 %3212  ;;  %v3210_v18 = vunpack.i.h.bf16 %v3208_v6  ;;  %v3209_v55 = vunpack.i.l.bf16 %v3208_v6 }
 0x199   : > { %v3215_v33 = vunpack.i.h.bf16 %v3213_v34  ;;  %v3214_v40 = vunpack.i.l.bf16 %v3213_v34 }
 0x19a   : > { %v1889_v47 = vsel %vm1858_vm9, %v1856_v12, %v3209_v55  ;;  %v1890_v13 = vsel %vm1858_vm9, %v1857_v28, %v3210_v18 }
 0x19b   : > { %v1920_v21 = vsel %vm1891_vm10, %v1887_v4, %v3214_v40  ;;  %v1921_v20 = vsel %vm1891_vm10, %v1888_v42, %v3215_v33  ;;  %v3218_v8 = vpop.permute.xlu1 %3217 }
 0x19c   : > { %v1938_v19 = vpack.c.bf16 %v1921_v20, %v1920_v21  ;;  %v3220_v7 = vunpack.i.h.bf16 %v3218_v8  ;;  %v3219_v57 = vunpack.i.l.bf16 %v3218_v8 }
 0x19e   : > { %v1922_v32 = vsel %vm1891_vm10, %v1889_v47, %v3219_v57  ;;  %v1923_v45 = vsel %vm1891_vm10, %v1890_v13, %v3220_v7  ;;  %2552 = vmatprep.mubr.msk.bf16.mxu1 %vm1960_vm11, %v1938_v19 }
 0x19f   : > { %v1939_v43 = vpack.c.bf16 %v1923_v45, %v1922_v32 }
 0x1a1   : > { %2553 = vmatmul.mubr.msk.bf16.gmra.mrb[12].mxu1 %vm1960_vm11, %v1939_v43 }
 0x1d5   : > { %v2526_v29 = vpop.f32.mrb[0].mxu0 }
 0x1d6   : > { %2350 = vst.msk [vmem:[%s4264_s14 + $0x10] sm:$0xff] %vm1693_vm4, %v2526_v29  ;;  %v2047_v11 = vpop.f32.mrb[1].mxu0  ;;  %v2245_v16 = vmul.f32 %v2526_v29, %v2526_v29  ;;  %v2177_v49 = vsel %vm1693_vm4, %v2526_v29, 0.0 }
 0x1d7   : > { %v2243_v2 = vmul.f32 %v2047_v11, %v2047_v11  ;;  %2348 = vst.msk [vmem:[%s4264_s14] sm:$0xff] %vm1693_vm4, %v2047_v11  ;;  %v2527_v23 = vpop.f32.mrb[2].mxu0  ;;  %v2174_v14 = vsel %vm1693_vm4, %v2047_v11, 0.0 }
 0x1d8   : > { %2351 = vst.msk [vmem:[%s4264_s14 + $0x18] sm:$0xff] %vm1693_vm4, %v2527_v23  ;;  %v2050_v15 = vpop.f32.mrb[3].mxu0  ;;  %v2246_v59 = vmul.f32 %v2527_v23, %v2527_v23  ;;  %v2278_v24 = vsel %vm1693_vm4, %v2245_v16, 0.0  ;;  %v2179_v36 = vsel %vm1693_vm4, %v2527_v23, 0.0 }
 0x1d9   : > { %v2175_v10 = vsel %vm1693_vm4, %v2050_v15, 0.0  ;;  %v2244_v27 = vmul.f32 %v2050_v15, %v2050_v15  ;;  %2349 = vst.msk [vmem:[%s4264_s14 + $0x8] sm:$0xff] %vm1693_vm4, %v2050_v15  ;;  %v2275_v25 = vsel %vm1693_vm4, %v2243_v2, 0.0 }
 0x1da   : > { %v2176_v3 = vadd.f32 %v2175_v10, %v2174_v14  ;;  %v2280_v50 = vsel %vm1693_vm4, %v2246_v59, 0.0 }
 0x1db   : > { %v2276_v38 = vsel %vm1693_vm4, %v2244_v27, 0.0 }
 0x1dc   : > { %v2178_v22 = vadd.f32 %v2177_v49, %v2176_v3  ;;  %v2277_v52 = vadd.f32 %v2276_v38, %v2275_v25 }
 0x1de   : > { %v2279_v60 = vadd.f32 %v2278_v24, %v2277_v52  ;;  %v2180_v62 = vadd.f32 %v2179_v36, %v2178_v22 }
 0x1e0   : > { %v2281_v46 = vadd.f32 %v2280_v50, %v2279_v60 }
 0x1e9   : > { %v2530_v58 = vpop.f32.mrb[4].mxu0 }
 0x1ea   : > { %2354 = vst.msk [vmem:[%s4264_s14 + $0x30] sm:$0xff] %vm1693_vm4, %v2530_v58  ;;  %v2063_v54 = vpop.f32.mrb[5].mxu0  ;;  %v2249_v26 = vmul.f32 %v2530_v58, %v2530_v58  ;;  %v2185_v5 = vsel %vm1693_vm4, %v2530_v58, 0.0 }
 0x1eb   : > { %v2181_v56 = vsel %vm1693_vm4, %v2063_v54, 0.0  ;;  %v2247_v35 = vmul.f32 %v2063_v54, %v2063_v54  ;;  %2352 = vst.msk [vmem:[%s4264_s14 + $0x20] sm:$0xff] %vm1693_vm4, %v2063_v54  ;;  %v2531_v53 = vpop.f32.mrb[6].mxu0 }
 0x1ec   : > { %v2182_v63 = vadd.f32 %v2181_v56, %v2180_v62  ;;  %2355 = vst.msk [vmem:[%s4264_s14 + $0x38] sm:$0xff] %vm1693_vm4, %v2531_v53  ;;  %v2066_v1 = vpop.f32.mrb[7].mxu0  ;;  %v2250_v6 = vmul.f32 %v2531_v53, %v2531_v53  ;;  %v2286_v31 = vsel %vm1693_vm4, %v2249_v26, 0.0  ;;  %v2187_v34 = vsel %vm1693_vm4, %v2531_v53, 0.0 }
 0x1ed   : > { %v2282_v51 = vsel %vm1693_vm4, %v2247_v35, 0.0  ;;  %v2183_v37 = vsel %vm1693_vm4, %v2066_v1, 0.0  ;;  %v2248_v30 = vmul.f32 %v2066_v1, %v2066_v1  ;;  %2353 = vst.msk [vmem:[%s4264_s14 + $0x28] sm:$0xff] %vm1693_vm4, %v2066_v1 }
 0x1ee   : > { %v2283_v48 = vadd.f32 %v2282_v51, %v2281_v46  ;;  %v2184_v0 = vadd.f32 %v2183_v37, %v2182_v63  ;;  %v2288_v33 = vsel %vm1693_vm4, %v2250_v6, 0.0 }
 0x1ef   : > { %v2284_v39 = vsel %vm1693_vm4, %v2248_v30, 0.0 }
 0x1f0   : > { %v2186_v44 = vadd.f32 %v2185_v5, %v2184_v0  ;;  %v2285_v41 = vadd.f32 %v2284_v39, %v2283_v48 }
 0x1f2   : > { %v2287_v18 = vadd.f32 %v2286_v31, %v2285_v41  ;;  %v2188_v55 = vadd.f32 %v2187_v34, %v2186_v44 }
 0x1f4   : > { %v2289_v40 = vadd.f32 %v2288_v33, %v2287_v18 }
 0x1fd   : > { %v2534_v17 = vpop.f32.mrb[8].mxu0 }
 0x1fe   : > { %2358 = vst.msk [vmem:[%s4264_s14 + $0x50] sm:$0xff] %vm1693_vm4, %v2534_v17  ;;  %v2079_v9 = vpop.f32.mrb[9].mxu0  ;;  %v2253_v20 = vmul.f32 %v2534_v17, %v2534_v17  ;;  %v2193_v47 = vsel %vm1693_vm4, %v2534_v17, 0.0 }
 0x1ff   : > { %v2189_v4 = vsel %vm1693_vm4, %v2079_v9, 0.0  ;;  %v2251_v42 = vmul.f32 %v2079_v9, %v2079_v9  ;;  %2356 = vst.msk [vmem:[%s4264_s14 + $0x40] sm:$0xff] %vm1693_vm4, %v2079_v9  ;;  %v2535_v61 = vpop.f32.mrb[10].mxu0 }
 0x200   : > { %v2190_v12 = vadd.f32 %v2189_v4, %v2188_v55  ;;  %2359 = vst.msk [vmem:[%s4264_s14 + $0x58] sm:$0xff] %vm1693_vm4, %v2535_v61  ;;  %v2082_v21 = vpop.f32.mrb[11].mxu0  ;;  %v2254_v13 = vmul.f32 %v2535_v61, %v2535_v61  ;;  %v2294_v29 = vsel %vm1693_vm4, %v2253_v20, 0.0  ;;  %v2195_v11 = vsel %vm1693_vm4, %v2535_v61, 0.0 }
 0x201   : > { %v2290_v8 = vsel %vm1693_vm4, %v2251_v42, 0.0  ;;  %v2191_v28 = vsel %vm1693_vm4, %v2082_v21, 0.0  ;;  %v2252_v19 = vmul.f32 %v2082_v21, %v2082_v21  ;;  %2357 = vst.msk [vmem:[%s4264_s14 + $0x48] sm:$0xff] %vm1693_vm4, %v2082_v21 }
 0x202   : > { %v2291_v7 = vadd.f32 %v2290_v8, %v2289_v40  ;;  %v2192_v57 = vadd.f32 %v2191_v28, %v2190_v12  ;;  %v2296_v15 = vsel %vm1693_vm4, %v2254_v13, 0.0 }
 0x203   : > { %v2292_v32 = vsel %vm1693_vm4, %v2252_v19, 0.0 }
 0x204   : > { %v2194_v45 = vadd.f32 %v2193_v47, %v2192_v57  ;;  %v2293_v43 = vadd.f32 %v2292_v32, %v2291_v7 }
 0x206   : > { %v2295_v2 = vadd.f32 %v2294_v29, %v2293_v43  ;;  %v2196_v23 = vadd.f32 %v2195_v11, %v2194_v45 }
 0x208   : > { %v2297_v16 = vadd.f32 %v2296_v15, %v2295_v2 }
 0x214   : > { %v2538_v14 = vpop.f32.mrb[12].mxu0 }
 0x215   : > { %2362 = vst.msk [vmem:[%s4264_s14 + $0x70] sm:$0xff] %vm1693_vm4, %v2538_v14  ;;  %v2095_v10 = vpop.f32.mrb[13].mxu0  ;;  %v2257_v38 = vmul.f32 %v2538_v14, %v2538_v14  ;;  %v2201_v62 = vsel %vm1693_vm4, %v2538_v14, 0.0 }
 0x216   : > { %v2197_v27 = vsel %vm1693_vm4, %v2095_v10, 0.0  ;;  %v2255_v3 = vmul.f32 %v2095_v10, %v2095_v10  ;;  %2360 = vst.msk [vmem:[%s4264_s14 + $0x60] sm:$0xff] %vm1693_vm4, %v2095_v10  ;;  %v2539_v49 = vpop.f32.mrb[14].mxu0 }
 0x217   : > { %v2198_v25 = vadd.f32 %v2197_v27, %v2196_v23  ;;  %2363 = vst.msk [vmem:[%s4264_s14 + $0x78] sm:$0xff] %vm1693_vm4, %v2539_v49  ;;  %v2098_v59 = vpop.f32.mrb[15].mxu0  ;;  %v2258_v50 = vmul.f32 %v2539_v49, %v2539_v49  ;;  %v2302_v56 = vsel %vm1693_vm4, %v2257_v38, 0.0  ;;  %v2203_v35 = vsel %vm1693_vm4, %v2539_v49, 0.0 }
 0x218   : > { %v2298_v22 = vsel %vm1693_vm4, %v2255_v3, 0.0  ;;  %v2199_v52 = vsel %vm1693_vm4, %v2098_v59, 0.0  ;;  %v2256_v24 = vmul.f32 %v2098_v59, %v2098_v59  ;;  %2361 = vst.msk [vmem:[%s4264_s14 + $0x68] sm:$0xff] %vm1693_vm4, %v2098_v59 }
 0x219   : > { %v2299_v36 = vadd.f32 %v2298_v22, %v2297_v16  ;;  %v2200_v60 = vadd.f32 %v2199_v52, %v2198_v25  ;;  %v2304_v1 = vsel %vm1693_vm4, %v2258_v50, 0.0 }
 0x21a   : > { %v2300_v46 = vsel %vm1693_vm4, %v2256_v24, 0.0 }
 0x21b   : > { %v2202_v58 = vadd.f32 %v2201_v62, %v2200_v60  ;;  %v2301_v54 = vadd.f32 %v2300_v46, %v2299_v36 }
 0x21d   : > { %v2303_v53 = vadd.f32 %v2302_v56, %v2301_v54  ;;  %v2204_v63 = vadd.f32 %v2203_v35, %v2202_v58 }
 0x21f   : > { %v2305_v26 = vadd.f32 %v2304_v1, %v2303_v53 }
 0x22c   : > { %v2542_v51 = vpop.f32.mrb[0].mxu1 }
 0x22d   : > { %2366 = vst.msk [vmem:[%s4264_s14 + $0x90] sm:$0xff] %vm1693_vm4, %v2542_v51  ;;  %v2111_v37 = vpop.f32.mrb[1].mxu1  ;;  %v2261_v39 = vmul.f32 %v2542_v51, %v2542_v51  ;;  %v2209_v55 = vsel %vm1693_vm4, %v2542_v51, 0.0 }
 0x22e   : > { %v2205_v30 = vsel %vm1693_vm4, %v2111_v37, 0.0  ;;  %v2259_v48 = vmul.f32 %v2111_v37, %v2111_v37  ;;  %2364 = vst.msk [vmem:[%s4264_s14 + $0x80] sm:$0xff] %vm1693_vm4, %v2111_v37  ;;  %v2543_v0 = vpop.f32.mrb[2].mxu1 }
 0x22f   : > { %v2206_v5 = vadd.f32 %v2205_v30, %v2204_v63  ;;  %2367 = vst.msk [vmem:[%s4264_s14 + $0x98] sm:$0xff] %vm1693_vm4, %v2543_v0  ;;  %v2114_v6 = vpop.f32.mrb[3].mxu1  ;;  %v2262_v33 = vmul.f32 %v2543_v0, %v2543_v0  ;;  %v2310_v4 = vsel %vm1693_vm4, %v2261_v39, 0.0  ;;  %v2211_v42 = vsel %vm1693_vm4, %v2543_v0, 0.0 }
 0x230   : > { %v2306_v44 = vsel %vm1693_vm4, %v2259_v48, 0.0  ;;  %v2207_v41 = vsel %vm1693_vm4, %v2114_v6, 0.0  ;;  %v2260_v31 = vmul.f32 %v2114_v6, %v2114_v6  ;;  %2365 = vst.msk [vmem:[%s4264_s14 + $0x88] sm:$0xff] %vm1693_vm4, %v2114_v6 }
 0x231   : > { %v2307_v34 = vadd.f32 %v2306_v44, %v2305_v26  ;;  %v2208_v18 = vadd.f32 %v2207_v41, %v2206_v5  ;;  %v2312_v21 = vsel %vm1693_vm4, %v2262_v33, 0.0 }
 0x232   : > { %v2308_v40 = vsel %vm1693_vm4, %v2260_v31, 0.0 }
 0x233   : > { %v2210_v17 = vadd.f32 %v2209_v55, %v2208_v18  ;;  %v2309_v9 = vadd.f32 %v2308_v40, %v2307_v34 }
 0x235   : > { %v2311_v61 = vadd.f32 %v2310_v4, %v2309_v9  ;;  %v2212_v12 = vadd.f32 %v2211_v42, %v2210_v17 }
 0x237   : > { %v2313_v20 = vadd.f32 %v2312_v21, %v2311_v61 }
 0x244   : > { %v2546_v8 = vpop.f32.mrb[4].mxu1 }
 0x245   : > { %2370 = vst.msk [vmem:[%s4264_s14 + $0xb0] sm:$0xff] %vm1693_vm4, %v2546_v8  ;;  %v2127_v28 = vpop.f32.mrb[5].mxu1  ;;  %v2265_v32 = vmul.f32 %v2546_v8, %v2546_v8  ;;  %v2217_v23 = vsel %vm1693_vm4, %v2546_v8, 0.0 }
 0x246   : > { %v2213_v19 = vsel %vm1693_vm4, %v2127_v28, 0.0  ;;  %v2263_v7 = vmul.f32 %v2127_v28, %v2127_v28  ;;  %2368 = vst.msk [vmem:[%s4264_s14 + $0xa0] sm:$0xff] %vm1693_vm4, %v2127_v28  ;;  %v2547_v57 = vpop.f32.mrb[6].mxu1 }
 0x247   : > { %v2214_v47 = vadd.f32 %v2213_v19, %v2212_v12  ;;  %2371 = vst.msk [vmem:[%s4264_s14 + $0xb8] sm:$0xff] %vm1693_vm4, %v2547_v57  ;;  %v2130_v13 = vpop.f32.mrb[7].mxu1  ;;  %v2266_v15 = vmul.f32 %v2547_v57, %v2547_v57  ;;  %v2318_v27 = vsel %vm1693_vm4, %v2265_v32, 0.0  ;;  %v2219_v3 = vsel %vm1693_vm4, %v2547_v57, 0.0 }
 0x248   : > { %v2314_v45 = vsel %vm1693_vm4, %v2263_v7, 0.0  ;;  %v2215_v43 = vsel %vm1693_vm4, %v2130_v13, 0.0  ;;  %v2264_v29 = vmul.f32 %v2130_v13, %v2130_v13  ;;  %2369 = vst.msk [vmem:[%s4264_s14 + $0xa8] sm:$0xff] %vm1693_vm4, %v2130_v13 }
 0x249   : > { %v2315_v11 = vadd.f32 %v2314_v45, %v2313_v20  ;;  %v2216_v2 = vadd.f32 %v2215_v43, %v2214_v47  ;;  %v2320_v59 = vsel %vm1693_vm4, %v2266_v15, 0.0 }
 0x24a   : > { %v2316_v16 = vsel %vm1693_vm4, %v2264_v29, 0.0 }
 0x24b   : > { %v2218_v14 = vadd.f32 %v2217_v23, %v2216_v2  ;;  %v2317_v10 = vadd.f32 %v2316_v16, %v2315_v11 }
 0x24d   : > { %v2319_v49 = vadd.f32 %v2318_v27, %v2317_v10  ;;  %v2220_v25 = vadd.f32 %v2219_v3, %v2218_v14 }
 0x24f   : > { %v2321_v38 = vadd.f32 %v2320_v59, %v2319_v49 }
 0x25c   : > { %v2550_v22 = vpop.f32.mrb[8].mxu1 }
 0x25d   : > { %2374 = vst.msk [vmem:[%s4264_s14 + $0xd0] sm:$0xff] %vm1693_vm4, %v2550_v22  ;;  %v2143_v52 = vpop.f32.mrb[9].mxu1  ;;  %v2269_v46 = vmul.f32 %v2550_v22, %v2550_v22  ;;  %v2225_v63 = vsel %vm1693_vm4, %v2550_v22, 0.0 }
 0x25e   : > { %v2221_v24 = vsel %vm1693_vm4, %v2143_v52, 0.0  ;;  %v2267_v36 = vmul.f32 %v2143_v52, %v2143_v52  ;;  %2372 = vst.msk [vmem:[%s4264_s14 + $0xc0] sm:$0xff] %vm1693_vm4, %v2143_v52  ;;  %v2551_v60 = vpop.f32.mrb[10].mxu1 }
 0x25f   : > { %v2222_v62 = vadd.f32 %v2221_v24, %v2220_v25  ;;  %2375 = vst.msk [vmem:[%s4264_s14 + $0xd8] sm:$0xff] %vm1693_vm4, %v2551_v60  ;;  %v2146_v50 = vpop.f32.mrb[11].mxu1  ;;  %v2270_v1 = vmul.f32 %v2551_v60, %v2551_v60  ;;  %v2326_v30 = vsel %vm1693_vm4, %v2269_v46, 0.0  ;;  %v2227_v48 = vsel %vm1693_vm4, %v2551_v60, 0.0 }
 0x260   : > { %v2322_v58 = vsel %vm1693_vm4, %v2267_v36, 0.0  ;;  %v2223_v54 = vsel %vm1693_vm4, %v2146_v50, 0.0  ;;  %v2268_v56 = vmul.f32 %v2146_v50, %v2146_v50  ;;  %2373 = vst.msk [vmem:[%s4264_s14 + $0xc8] sm:$0xff] %vm1693_vm4, %v2146_v50 }
 0x261   : > { %v2323_v35 = vadd.f32 %v2322_v58, %v2321_v38  ;;  %v2224_v53 = vadd.f32 %v2223_v54, %v2222_v62  ;;  %v2328_v6 = vsel %vm1693_vm4, %v2270_v1, 0.0 }
 0x262   : > { %v2324_v26 = vsel %vm1693_vm4, %v2268_v56, 0.0 }
 0x263   : > { %v2226_v51 = vadd.f32 %v2225_v63, %v2224_v53  ;;  %v2325_v37 = vadd.f32 %v2324_v26, %v2323_v35 }
 0x265   : > { %v2327_v0 = vadd.f32 %v2326_v30, %v2325_v37  ;;  %v2228_v5 = vadd.f32 %v2227_v48, %v2226_v51 }
 0x267   : > { %v2329_v39 = vadd.f32 %v2328_v6, %v2327_v0 }
 0x274   : > { %v2554_v44 = vpop.f32.mrb[12].mxu1 }
 0x275   : > { %2378 = vst.msk [vmem:[%s4264_s14 + $0xf0] sm:$0xff] %vm1693_vm4, %v2554_v44  ;;  %v2159_v41 = vpop.f32.mrb[13].mxu1  ;;  %v2273_v40 = vmul.f32 %v2554_v44, %v2554_v44  ;;  %v2233_v12 = vsel %vm1693_vm4, %v2554_v44, 0.0 }
 0x276   : > { %v2229_v31 = vsel %vm1693_vm4, %v2159_v41, 0.0  ;;  %v2271_v34 = vmul.f32 %v2159_v41, %v2159_v41  ;;  %2376 = vst.msk [vmem:[%s4264_s14 + $0xe0] sm:$0xff] %vm1693_vm4, %v2159_v41  ;;  %v2555_v18 = vpop.f32.mrb[14].mxu1 }
 0x277   : > { %v2230_v55 = vadd.f32 %v2229_v31, %v2228_v5  ;;  %2379 = vst.msk [vmem:[%s4264_s14 + $0xf8] sm:$0xff] %vm1693_vm4, %v2555_v18  ;;  %v2162_v33 = vpop.f32.mrb[15].mxu1  ;;  %v2274_v21 = vmul.f32 %v2555_v18, %v2555_v18  ;;  %v2334_v19 = vsel %vm1693_vm4, %v2273_v40, 0.0  ;;  %v2235_v7 = vsel %vm1693_vm4, %v2555_v18, 0.0 }
 0x278   : > { %v2330_v17 = vsel %vm1693_vm4, %v2271_v34, 0.0  ;;  %v2231_v9 = vsel %vm1693_vm4, %v2162_v33, 0.0  ;;  %v2272_v4 = vmul.f32 %v2162_v33, %v2162_v33  ;;  %2377 = vst.msk [vmem:[%s4264_s14 + $0xe8] sm:$0xff] %vm1693_vm4, %v2162_v33 }
 0x279   : > { %v2331_v42 = vadd.f32 %v2330_v17, %v2329_v39  ;;  %v2232_v61 = vadd.f32 %v2231_v9, %v2230_v55  ;;  %v2336_v13 = vsel %vm1693_vm4, %v2274_v21, 0.0 }
 0x27a   : > { %v2332_v20 = vsel %vm1693_vm4, %v2272_v4, 0.0 }
 0x27b   : > { %v2234_v8 = vadd.f32 %v2233_v12, %v2232_v61  ;;  %v2333_v28 = vadd.f32 %v2332_v20, %v2331_v42 }
 0x27d   : > { %v2236_v57 = vadd.f32 %v2235_v7, %v2234_v8  ;;  %v2335_v47 = vadd.f32 %v2334_v19, %v2333_v28 }
 0x27f   : > { %v2237_v32 = vrot.slane %v2236_v57, 4  ;;  %v2337_v45 = vadd.f32 %v2336_v13, %v2335_v47 }
 0x281   : > { %v2238_v43 = vadd.f32 %v2237_v32, %v2236_v57  ;;  %v2338_v29 = vrot.slane %v2337_v45, 4 }
 0x283   : > { %v2239_v11 = vrot.slane %v2238_v43, 2  ;;  %v2339_v2 = vadd.f32 %v2338_v29, %v2337_v45 }
 0x285   : > { %v2240_v23 = vadd.f32 %v2239_v11, %v2238_v43  ;;  %v2340_v15 = vrot.slane %v2339_v2, 2 }
 0x287   : > { %v2241_v16 = vrot.slane %v2240_v23, 1  ;;  %v2341_v14 = vadd.f32 %v2340_v15, %v2339_v2 }
 0x289   : > { %v2342_v10 = vrot.slane %v2341_v14, 1  ;;  %v2242_v27 = vadd.f32 %v2241_v16, %v2240_v23 }
 0x28b   : > { %v2343_v3 = vadd.f32 %v2342_v10, %v2341_v14 }
 0x28d   : > { %v2345_v49 = vsel %vm2344_vm12, %v2242_v27, %v2343_v3 }
 0x28e   : > { %2347 = vst.msk [vmem:[%s235_s3] sm:$0x3] %vm2346_vm13, %v2345_v49 }
 0x28f PF: > { %s16_s18 = sadd.s32 1, %s3241_s18  }
 0x290   : > { %p13_p4 = scmp.ge.s32.totalorder %s16_s18, 4  }
 0x292   :  { %15 = sbr.rel (!%p13_p4) target bundleno = 1 (0x1), region = 81 }

// kernel: unet_res_conv_block.5
= control target key start
LH: loop header
LB: loop body
LE: loop exit
PB: predicated region body
PF: predicated region fallthrough
CT: control target
= control target key end

     0   :  { %s3427_s18 = smov 0   ;;  %s4632_s0 = inlined_call_operand.vmem [shape: f32[2,16,16,8], index: 0, kind: input, shape index: {}]   ;;  %s4633_s1 = inlined_call_operand.vmem [shape: bf16[72,8], index: 1, kind: input, shape index: {}]   ;;  %s4634_s2 = inlined_call_operand.vmem [shape: f32[1,8], index: 2, kind: input, shape index: {}]   ;;  %s4635_s3 = inlined_call_operand.vmem [shape: f32[1,8], index: 3, kind: input, shape index: {}]   ;;  %s4636_s4 = inlined_call_operand.vmem [shape: f32[2,16,16,8], index: 4, kind: output, shape index: {0}]   ;;  %s4637_s5 = inlined_call_operand.vmem [shape: f32[2,2,8], index: 5, kind: output, shape index: {1}]  }
   0x1 LB: > { %s2591_s19 = sadd.s32 4294967295, %s3386_s18   ;;  %p2595_p0 = scmp.ge.s32.totalorder %s3386_s18, 1  ;;  %s3386_s18 = sphi %s3427_s18, %s16_s18  }
   0x2   : > { %p190_p1 = scmp.lt.s32.totalorder %s3386_s18, 3 }
   0x4   : > { %p191_p2 = pnand %p2595_p0, %p190_p1 }
   0x6   : > { %194 = sbr.rel (%p191_p2) target bundleno = 655 (0x28f), region = 36 }
   0xd   : > { %vm237_vm0 = vcmask 64512   ;;  %vm240_vm1 = vcmask 58368   ;;  %vm246_vm2 = vcmask 57344   ;;  %p3437_p3 = scmp.lt.s32.totalorder %s2591_s19, 1  ;;  %v3388_v0 = vmov 0.0   ;;  %s3389_s29 = smov 8  }
   0xe   : > { %238 = vst.msk [vmem:[#allocation2] sm:$0xff] %vm237_vm0, %v3388_v0  ;;  %239 = vst.msk [vmem:[#allocation2 + $0x8] sm:$0xff] %vm237_vm0, %v3388_v0  ;;  %v3492_v1 = vld [vmem:[%s4634_s2] ss:$0 sm:$0xff]  ;;  %s3390_s30 = smov 16   ;;  %s3391_s6 = smov 24  }
   0xf   : > { %241 = vst.msk [vmem:[#allocation2 + $0x10] sm:$0x3] %vm240_vm1, %v3388_v0  ;;  %245 = vst.msk [vmem:[#allocation2 + $0x1a8] sm:$0x3] %vm240_vm1, %v3388_v0  ;;  %s4684_s19 = smov (!%p3437_p3, %s2591_s19), 1  ;;  %s3392_s13 = smov 32  }
  0x10   : > { %243 = vst.msk [vmem:[#allocation2 + $0x198] sm:$0xff] %vm237_vm0, %v3388_v0  ;;  %244 = vst.msk [vmem:[#allocation2 + $0x1a0] sm:$0xff] %vm237_vm0, %v3388_v0  ;;  %s2626_s23 = sshll.u32 %s4684_s19, 8  ;;  %v3505_v2 = vld [vmem:[%s4635_s3] ss:$0 sm:$0xff]  ;;  %s3393_s16 = smov 40  }
  0x11   : > { %248 = vst.msk [vmem:[#allocation2 + $0x18] sm:$0x1] %vm246_vm2, %v3388_v0  ;;  %249 = vst.msk [vmem:[#allocation2 + $0x30] sm:$0x1] %vm246_vm2, %v3388_v0  ;;  %s3500_s26 = scalar_lea.vmem %s4632_s0, %s2626_s23  ;;  %vm2135_vm3 = vcmask 1043456   ;;  %s3394_s21 = smov 48  }
  0x12   : > { %250 = vst.msk [vmem:[#allocation2 + $0x48] sm:$0x1] %vm246_vm2, %v3388_v0  ;;  %251 = vst.msk [vmem:[#allocation2 + $0x60] sm:$0x1] %vm246_vm2, %v3388_v0  ;;  %v285_v3 = vld [vmem:[%s3500_s26 + $0x10] sm:$0xff]  ;;  %v286_v4 = vld [vmem:[%s3500_s26 + $0x18] sm:$0xff]  ;;  %s4494_s27 = scalar_lea.vmem %s4636_s4, %s2626_s23 }
  0x13   : > { %252 = vst.msk [vmem:[#allocation2 + $0x78] sm:$0x1] %vm246_vm2, %v3388_v0  ;;  %253 = vst.msk [vmem:[#allocation2 + $0x90] sm:$0x1] %vm246_vm2, %v3388_v0  ;;  %v283_v5 = vld [vmem:[%s3500_s26] sm:$0xff]  ;;  %v324_v6 = vmul.f32 %v3492_v1, %v285_v3  ;;  %v325_v7 = vmul.f32 %v3492_v1, %v286_v4  ;;  %v284_v8 = vld [vmem:[%s3500_s26 + $0x8] sm:$0xff] }
  0x14   : > { %254 = vst.msk [vmem:[#allocation2 + $0xa8] sm:$0x1] %vm246_vm2, %v3388_v0  ;;  %255 = vst.msk [vmem:[#allocation2 + $0xc0] sm:$0x1] %vm246_vm2, %v3388_v0  ;;  %v322_v9 = vmul.f32 %v3492_v1, %v283_v5  ;;  %v287_v10 = vld [vmem:[%s3500_s26 + $0x20] sm:$0xff]  ;;  %v288_v11 = vld [vmem:[%s3500_s26 + $0x28] sm:$0xff]  ;;  %v323_v14 = vmul.f32 %v3492_v1, %v284_v8 }
  0x15   : > { %256 = vst.msk [vmem:[#allocation2 + $0xd8] sm:$0x1] %vm246_vm2, %v3388_v0  ;;  %257 = vst.msk [vmem:[#allocation2 + $0xf0] sm:$0x1] %vm246_vm2, %v3388_v0  ;;  %v490_v12 = vld [vmem:[#allocation2 + $0x1] sm:$0xff]  ;;  %v326_v15 = vmul.f32 %v3492_v1, %v287_v10  ;;  %v327_v16 = vmul.f32 %v3492_v1, %v288_v11  ;;  %v289_v17 = vld [vmem:[%s3500_s26 + $0x30] sm:$0xff]  ;;  %v363_v19 = vadd.f32 %v3505_v2, %v324_v6 }
  0x16   : > { %258 = vst.msk [vmem:[#allocation2 + $0x108] sm:$0x1] %vm246_vm2, %v3388_v0  ;;  %259 = vst.msk [vmem:[#allocation2 + $0x120] sm:$0x1] %vm246_vm2, %v3388_v0  ;;  %v491_v13 = vld [vmem:[#allocation2 + $0x9] sm:$0xff]  ;;  %v364_v20 = vadd.f32 %v3505_v2, %v325_v7  ;;  %v361_v21 = vadd.f32 %v3505_v2, %v322_v9  ;;  %v290_v22 = vld [vmem:[%s3500_s26 + $0x38] sm:$0xff]  ;;  %v362_v23 = vadd.f32 %v3505_v2, %v323_v14 }
  0x17   : > { %260 = vst.msk [vmem:[#allocation2 + $0x138] sm:$0x1] %vm246_vm2, %v3388_v0  ;;  %261 = vst.msk [vmem:[#allocation2 + $0x150] sm:$0x1] %vm246_vm2, %v3388_v0  ;;  %v2720_v18 = vpack.i.bf16 %v491_v13, %v490_v12  ;;  %v365_v24 = vadd.f32 %v3505_v2, %v326_v15  ;;  %v366_v25 = vadd.f32 %v3505_v2, %v327_v16  ;;  %v291_v27 = vld [vmem:[%s3500_s26 + $0x40] sm:$0xff]  ;;  %v292_v28 = vld [vmem:[%s3500_s26 + $0x48] sm:$0xff] }
  0x18   : > { %262 = vst.msk [vmem:[#allocation2 + $0x168] sm:$0x1] %vm246_vm2, %v3388_v0  ;;  %263 = vst.msk [vmem:[#allocation2 + $0x180] sm:$0x1] %vm246_vm2, %v3388_v0  ;;  %v328_v26 = vmul.f32 %v3492_v1, %v289_v17  ;;  %v293_v29 = vld [vmem:[%s3500_s26 + $0x50] sm:$0xff]  ;;  %v395_v30 = vmax.f32 %v363_v19, 0.0  ;;  %v329_v33 = vmul.f32 %v3492_v1, %v290_v22  ;;  %v330_v42 = vmul.f32 %v3492_v1, %v291_v27 }
  0x19   : > { %266 = vst.msk [vmem:[#allocation2 + $0x29] sm:$0x1] %vm246_vm2, %v3388_v0  ;;  %267 = vst.msk [vmem:[#allocation2 + $0x41] sm:$0x1] %vm246_vm2, %v3388_v0  ;;  %2721 = vrot.lane.b32.xlu0 %v2720_v18, %s3389_s29  ;;  %v396_v31 = vmax.f32 %v364_v20, 0.0  ;;  %v393_v32 = vmax.f32 %v361_v21, 0.0  ;;  %v331_v43 = vmul.f32 %v3492_v1, %v292_v28  ;;  %v332_v44 = vmul.f32 %v3492_v1, %v293_v29 }
  0x1a   : > { %268 = vst.msk [vmem:[#allocation2 + $0x59] sm:$0x1] %vm246_vm2, %v3388_v0  ;;  %269 = vst.msk [vmem:[#allocation2 + $0x71] sm:$0x1] %vm246_vm2, %v3388_v0  ;;  %v294_v34 = vld [vmem:[%s3500_s26 + $0x58] sm:$0xff]  ;;  %v295_v35 = vld [vmem:[%s3500_s26 + $0x60] sm:$0xff]  ;;  %v367_v40 = vadd.f32 %v3505_v2, %v328_v26  ;;  %v368_v41 = vadd.f32 %v3505_v2, %v329_v33  ;;  %v369_v52 = vadd.f32 %v3505_v2, %v330_v42 }
  0x1b   : > { %270 = vst.msk [vmem:[#allocation2 + $0x89] sm:$0x1] %vm246_vm2, %v3388_v0  ;;  %271 = vst.msk [vmem:[#allocation2 + $0xa1] sm:$0x1] %vm246_vm2, %v3388_v0  ;;  %v296_v36 = vld [vmem:[%s3500_s26 + $0x68] sm:$0xff]  ;;  %v394_v37 = vmax.f32 %v362_v23, 0.0  ;;  %v333_v47 = vmul.f32 %v3492_v1, %v294_v34  ;;  %v334_v48 = vmul.f32 %v3492_v1, %v295_v35  ;;  %v370_v53 = vadd.f32 %v3505_v2, %v331_v43 }
  0x1c   : > { %272 = vst.msk [vmem:[#allocation2 + $0xb9] sm:$0x1] %vm246_vm2, %v3388_v0  ;;  %273 = vst.msk [vmem:[#allocation2 + $0xd1] sm:$0x1] %vm246_vm2, %v3388_v0  ;;  %v397_v38 = vmax.f32 %v365_v24, 0.0  ;;  %v398_v39 = vmax.f32 %v366_v25, 0.0  ;;  %v335_v49 = vmul.f32 %v3492_v1, %v296_v36  ;;  %v371_v54 = vadd.f32 %v3505_v2, %v332_v44 }
  0x1d   : > { %274 = vst.msk [vmem:[#allocation2 + $0xe9] sm:$0x1] %vm246_vm2, %v3388_v0  ;;  %275 = vst.msk [vmem:[#allocation2 + $0x101] sm:$0x1] %vm246_vm2, %v3388_v0  ;;  %v297_v45 = vld [vmem:[%s3500_s26 + $0x70] sm:$0xff]  ;;  %v399_v46 = vmax.f32 %v367_v40, 0.0  ;;  %v372_v55 = vadd.f32 %v3505_v2, %v333_v47  ;;  %v373_v56 = vadd.f32 %v3505_v2, %v334_v48 }
  0x1e   : > { %276 = vst.msk [vmem:[#allocation2 + $0x119] sm:$0x1] %vm246_vm2, %v3388_v0  ;;  %277 = vst.msk [vmem:[#allocation2 + $0x131] sm:$0x1] %vm246_vm2, %v3388_v0  ;;  %v298_v50 = vld [vmem:[%s3500_s26 + $0x78] sm:$0xff]  ;;  %v400_v51 = vmax.f32 %v368_v41, 0.0  ;;  %v374_v57 = vadd.f32 %v3505_v2, %v335_v49  ;;  %v336_v58 = vmul.f32 %v3492_v1, %v297_v45 }
  0x1f   : > { %278 = vst.msk [vmem:[#allocation2 + $0x149] sm:$0x1] %vm246_vm2, %v3388_v0  ;;  %279 = vst.msk [vmem:[#allocation2 + $0x161] sm:$0x1] %vm246_vm2, %v3388_v0  ;;  %v299_v59 = vld [vmem:[%s3500_s26 + $0x80] sm:$0xff]  ;;  %v300_v60 = vld [vmem:[%s3500_s26 + $0x88] sm:$0xff]  ;;  %v337_v3 = vmul.f32 %v3492_v1, %v298_v50 }
  0x20   : > { %280 = vst.msk [vmem:[#allocation2 + $0x179] sm:$0x1] %vm246_vm2, %v3388_v0  ;;  %281 = vst.msk [vmem:[#allocation2 + $0x191] sm:$0x1] %vm246_vm2, %v3388_v0  ;;  %v301_v61 = vld [vmem:[%s3500_s26 + $0x90] sm:$0xff]  ;;  %v401_v62 = vmax.f32 %v369_v52, 0.0  ;;  %v375_v10 = vadd.f32 %v3505_v2, %v336_v58  ;;  %v338_v12 = vmul.f32 %v3492_v1, %v299_v59  ;;  %v339_v13 = vmul.f32 %v3492_v1, %v300_v60 }
  0x21   : > { %265 = vst.msk [vmem:[#allocation2 + $0x11] sm:$0x1] %vm246_vm2, %v3388_v0  ;;  %247 = vst.msk [vmem:[#allocation2] sm:$0x1] %vm246_vm2, %v3388_v0  ;;  %v402_v63 = vmax.f32 %v370_v53, 0.0  ;;  %v302_v4 = vld [vmem:[%s3500_s26 + $0x98] sm:$0xff]  ;;  %v376_v11 = vadd.f32 %v3505_v2, %v337_v3  ;;  %v340_v14 = vmul.f32 %v3492_v1, %v301_v61 }
  0x22   : > { %282 = vst.msk [vmem:[#allocation2 + $0x1a9] sm:$0x1] %vm246_vm2, %v3388_v0  ;;  %264 = vst.msk [vmem:[#allocation2 + $0x198] sm:$0x1] %vm246_vm2, %v3388_v0  ;;  %v403_v0 = vmax.f32 %v371_v54, 0.0  ;;  %v303_v5 = vld [vmem:[%s3500_s26 + $0xa0] sm:$0xff]  ;;  %v341_v21 = vmul.f32 %v3492_v1, %v302_v4  ;;  %v377_v29 = vadd.f32 %v3505_v2, %v338_v12 }
  0x23   : > { %428 = vst.msk [vmem:[#allocation2 + $0x31] sm:$0xff] %vm237_vm0, %v395_v30  ;;  %429 = vst.msk [vmem:[#allocation2 + $0x39] sm:$0xff] %vm237_vm0, %v396_v31  ;;  %v304_v6 = vld [vmem:[%s3500_s26 + $0xa8] sm:$0xff]  ;;  %v404_v7 = vmax.f32 %v372_v55, 0.0  ;;  %v405_v8 = vmax.f32 %v373_v56, 0.0  ;;  %v406_v9 = vmax.f32 %v374_v57, 0.0  ;;  %v342_v22 = vmul.f32 %v3492_v1, %v303_v5 }
  0x24   : > { %426 = vst.msk [vmem:[#allocation2 + $0x19] sm:$0xff] %vm237_vm0, %v393_v32  ;;  %427 = vst.msk [vmem:[#allocation2 + $0x21] sm:$0xff] %vm237_vm0, %v394_v37  ;;  %v305_v15 = vld [vmem:[%s3500_s26 + $0xb0] sm:$0xff]  ;;  %v306_v16 = vld [vmem:[%s3500_s26 + $0xb8] sm:$0xff]  ;;  %v407_v20 = vmax.f32 %v375_v10, 0.0  ;;  %v343_v23 = vmul.f32 %v3492_v1, %v304_v6  ;;  %v408_v28 = vmax.f32 %v376_v11, 0.0  ;;  %v378_v30 = vadd.f32 %v3505_v2, %v339_v13 }
  0x25   : > { %430 = vst.msk [vmem:[#allocation2 + $0x49] sm:$0xff] %vm237_vm0, %v397_v38  ;;  %431 = vst.msk [vmem:[#allocation2 + $0x51] sm:$0xff] %vm237_vm0, %v398_v39  ;;  %v379_v33 = vadd.f32 %v3505_v2, %v340_v14  ;;  %v380_v34 = vadd.f32 %v3505_v2, %v341_v21  ;;  %v307_v35 = vld [vmem:[%s3500_s26 + $0xc0] sm:$0xff]  ;;  %v409_v37 = vmax.f32 %v377_v29, 0.0  ;;  %v381_v39 = vadd.f32 %v3505_v2, %v342_v22  ;;  %v308_v41 = vld [vmem:[%s3500_s26 + $0xc8] sm:$0xff]  ;;  %s3395_s22 = smov 56  }
  0x26   : > { %432 = vst.msk [vmem:[#allocation2 + $0x61] sm:$0xff] %vm237_vm0, %v399_v46  ;;  %433 = vst.msk [vmem:[#allocation2 + $0x69] sm:$0xff] %vm237_vm0, %v400_v51  ;;  %v410_v38 = vmax.f32 %v378_v30, 0.0  ;;  %v382_v40 = vadd.f32 %v3505_v2, %v343_v23  ;;  %v309_v42 = vld [vmem:[%s3500_s26 + $0xd0] sm:$0xff]  ;;  %v344_v46 = vmul.f32 %v3492_v1, %v305_v15  ;;  %v345_v47 = vmul.f32 %v3492_v1, %v306_v16  ;;  %v310_v48 = vld [vmem:[%s3500_s26 + $0xd8] sm:$0xff]  ;;  %s3396_s24 = smov 64  }
  0x27   : > { %434 = vst.msk [vmem:[#allocation2 + $0x79] sm:$0xff] %vm237_vm0, %v401_v62  ;;  %435 = vst.msk [vmem:[#allocation2 + $0x81] sm:$0xff] %vm237_vm0, %v402_v63  ;;  %v411_v44 = vmax.f32 %v379_v33, 0.0  ;;  %v412_v45 = vmax.f32 %v380_v34, 0.0  ;;  %v311_v49 = vld [vmem:[%s3500_s26 + $0xe0] sm:$0xff]  ;;  %v413_v51 = vmax.f32 %v381_v39, 0.0  ;;  %v346_v53 = vmul.f32 %v3492_v1, %v307_v35 }
  0x28   : > { %436 = vst.msk [vmem:[#allocation2 + $0x91] sm:$0xff] %vm237_vm0, %v403_v0  ;;  %437 = vst.msk [vmem:[#allocation2 + $0x99] sm:$0xff] %vm237_vm0, %v404_v7  ;;  %v414_v52 = vmax.f32 %v382_v40, 0.0  ;;  %v383_v57 = vadd.f32 %v3505_v2, %v344_v46  ;;  %v384_v58 = vadd.f32 %v3505_v2, %v345_v47  ;;  %v347_v59 = vmul.f32 %v3492_v1, %v308_v41  ;;  %v312_v3 = vld [vmem:[%s3500_s26 + $0xe8] sm:$0xff]  ;;  %s2600_s23 = sshll.u32 %s4684_s19, 1 }
  0x29   : > { %438 = vst.msk [vmem:[#allocation2 + $0xa9] sm:$0xff] %vm237_vm0, %v405_v8  ;;  %439 = vst.msk [vmem:[#allocation2 + $0xb1] sm:$0xff] %vm237_vm0, %v406_v9  ;;  %v348_v60 = vmul.f32 %v3492_v1, %v309_v42  ;;  %v385_v63 = vadd.f32 %v3505_v2, %v346_v53  ;;  %v349_v0 = vmul.f32 %v3492_v1, %v310_v48  ;;  %vm1803_vm4 = vcmask 130048  }
  0x2a   : > { %v494_v17 = vld [vmem:[#allocation2 + $0x31] sm:$0xff]  ;;  %v495_v18 = vld [vmem:[#allocation2 + $0x39] sm:$0xff]  ;;  %440 = vst.msk [vmem:[#allocation2 + $0xc1] sm:$0xff] %vm237_vm0, %v407_v20  ;;  %441 = vst.msk [vmem:[#allocation2 + $0xc9] sm:$0xff] %vm237_vm0, %v408_v28  ;;  %v350_v4 = vmul.f32 %v3492_v1, %v311_v49  ;;  %v415_v8 = vmax.f32 %v383_v57, 0.0  ;;  %v416_v9 = vmax.f32 %v384_v58, 0.0  ;;  %v386_v11 = vadd.f32 %v3505_v2, %v347_v59 }
  0x2b   : > { %v492_v19 = vld [vmem:[#allocation2 + $0x19] sm:$0xff]  ;;  %v3584_v24 = vpack.i.bf16 %v495_v18, %v494_v17  ;;  %v493_v25 = vld [vmem:[#allocation2 + $0x21] sm:$0xff]  ;;  %442 = vst.msk [vmem:[#allocation2 + $0xd9] sm:$0xff] %vm237_vm0, %v409_v37  ;;  %443 = vst.msk [vmem:[#allocation2 + $0xe1] sm:$0xff] %vm237_vm0, %v410_v38  ;;  %v417_v12 = vmax.f32 %v385_v63, 0.0  ;;  %v387_v13 = vadd.f32 %v3505_v2, %v348_v60  ;;  %v388_v14 = vadd.f32 %v3505_v2, %v349_v0 }
  0x2c   : > { %v496_v26 = vld [vmem:[#allocation2 + $0x49] sm:$0xff]  ;;  %v497_v27 = vld [vmem:[#allocation2 + $0x51] sm:$0xff]  ;;  %v3588_v31 = vpack.i.bf16 %v493_v25, %v492_v19  ;;  %444 = vst.msk [vmem:[#allocation2 + $0xf1] sm:$0xff] %vm237_vm0, %v411_v44  ;;  %445 = vst.msk [vmem:[#allocation2 + $0xf9] sm:$0xff] %vm237_vm0, %v412_v45  ;;  %v351_v16 = vmul.f32 %v3492_v1, %v312_v3  ;;  %v389_v17 = vadd.f32 %v3505_v2, %v350_v4  ;;  %v418_v19 = vmax.f32 %v386_v11, 0.0 }
  0x2d   : > { %v3590_v32 = vpack.i.bf16 %v497_v27, %v496_v26  ;;  %2731 = vrot.lane.b32.xlu1 %v3584_v24, %s3389_s29  ;;  %v498_v36 = vld [vmem:[#allocation2 + $0x61] sm:$0xff]  ;;  %v499_v43 = vld [vmem:[#allocation2 + $0x69] sm:$0xff]  ;;  %446 = vst.msk [vmem:[#allocation2 + $0x109] sm:$0xff] %vm237_vm0, %v413_v51  ;;  %447 = vst.msk [vmem:[#allocation2 + $0x111] sm:$0xff] %vm237_vm0, %v414_v52  ;;  %v419_v20 = vmax.f32 %v387_v13, 0.0  ;;  %v420_v21 = vmax.f32 %v388_v14, 0.0 }
  0x2e   : > { %2726 = vrot.lane.b32.xlu0 %v3588_v31, %s3389_s29  ;;  %v3609_v50 = vpack.i.bf16 %v499_v43, %v498_v36  ;;  %v500_v54 = vld [vmem:[#allocation2 + $0x79] sm:$0xff]  ;;  %v501_v55 = vld [vmem:[#allocation2 + $0x81] sm:$0xff]  ;;  %448 = vst.msk [vmem:[#allocation2 + $0x121] sm:$0xff] %vm237_vm0, %v415_v8  ;;  %449 = vst.msk [vmem:[#allocation2 + $0x129] sm:$0xff] %vm237_vm0, %v416_v9  ;;  %v390_v26 = vadd.f32 %v3505_v2, %v351_v16  ;;  %v421_v27 = vmax.f32 %v389_v17, 0.0  ;;  %vm1836_vm5 = vcmask 195584  }
  0x2f   : > { %v502_v56 = vld [vmem:[#allocation2 + $0x91] sm:$0xff]  ;;  %v3622_v61 = vpack.i.bf16 %v501_v55, %v500_v54  ;;  %v503_v62 = vld [vmem:[#allocation2 + $0x99] sm:$0xff]  ;;  %450 = vst.msk [vmem:[#allocation2 + $0x139] sm:$0xff] %vm237_vm0, %v417_v12  ;;  %451 = vst.msk [vmem:[#allocation2 + $0x141] sm:$0xff] %vm237_vm0, %v418_v19  ;;  %vm1869_vm6 = vcmask 261120   ;;  %vm1902_vm7 = vcmask 326656  }
  0x30   : > { %v3632_v5 = vpack.i.bf16 %v503_v62, %v502_v56  ;;  %v504_v6 = vld [vmem:[#allocation2 + $0xa9] sm:$0xff]  ;;  %v505_v7 = vld [vmem:[#allocation2 + $0xb1] sm:$0xff]  ;;  %452 = vst.msk [vmem:[#allocation2 + $0x151] sm:$0xff] %vm237_vm0, %v419_v20  ;;  %453 = vst.msk [vmem:[#allocation2 + $0x159] sm:$0xff] %vm237_vm0, %v420_v21  ;;  %v422_v30 = vmax.f32 %v390_v26, 0.0  ;;  %vm1935_vm8 = vcmask 392192  }
  0x31   : > { %2736 = vrot.lane.b32.xlu1 %v3590_v32, %s3389_s29  ;;  %v506_v10 = vld [vmem:[#allocation2 + $0xc1] sm:$0xff]  ;;  %v507_v15 = vld [vmem:[#allocation2 + $0xc9] sm:$0xff]  ;;  %v3643_v18 = vpack.i.bf16 %v505_v7, %v504_v6  ;;  %454 = vst.msk [vmem:[#allocation2 + $0x169] sm:$0xff] %vm237_vm0, %v421_v27  ;;  %v526_v56 = vld [vmem:[#allocation2 + $0x32] sm:$0xff]  ;;  %vm1968_vm9 = vcmask 457728   ;;  %vm2001_vm10 = vcmask 523264  }
  0x32   : > { %2741 = vrot.lane.b32.xlu0 %v3609_v50, %s3389_s29  ;;  %v3648_v22 = vpack.i.bf16 %v507_v15, %v506_v10  ;;  %v508_v23 = vld [vmem:[#allocation2 + $0xd9] sm:$0xff]  ;;  %v509_v25 = vld [vmem:[#allocation2 + $0xe1] sm:$0xff]  ;;  %455 = vst.msk [vmem:[#allocation2 + $0x171] sm:$0xff] %vm237_vm0, %v422_v30  ;;  %v523_v51 = vld [vmem:[#allocation2 + $0xa] sm:$0xff]  ;;  %vm2086_vm11 = vcmask 588800   ;;  %vm2470_vm12 = vcmask 1040384  }
  0x33   : > { %v510_v28 = vld [vmem:[#allocation2 + $0xf1] sm:$0xff]  ;;  %v511_v29 = vld [vmem:[#allocation2 + $0xf9] sm:$0xff]  ;;  %v3657_v33 = vpack.i.bf16 %v509_v25, %v508_v23  ;;  %v522_v49 = vld [vmem:[#allocation2 + $0x2] sm:$0xff] }
  0x34   : > { %v2770_v34 = vpack.i.bf16 %v511_v29, %v510_v28  ;;  %v512_v35 = vld [vmem:[#allocation2 + $0x109] sm:$0xff]  ;;  %v513_v36 = vld [vmem:[#allocation2 + $0x111] sm:$0xff]  ;;  %v2800_v53 = vpack.i.bf16 %v523_v51, %v522_v49  ;;  %v524_v54 = vld [vmem:[#allocation2 + $0x1a] sm:$0xff] }
  0x35   : > { %2746 = vrot.lane.b32.xlu1 %v3622_v61, %s3389_s29  ;;  %v514_v37 = vld [vmem:[#allocation2 + $0x121] sm:$0xff]  ;;  %v515_v38 = vld [vmem:[#allocation2 + $0x129] sm:$0xff]  ;;  %v2775_v39 = vpack.i.bf16 %v513_v36, %v512_v35  ;;  %v529_v62 = vld [vmem:[#allocation2 + $0x52] sm:$0xff] }
  0x36   : > { %2751 = vrot.lane.b32.xlu0 %v3632_v5, %s3389_s29  ;;  %v2780_v40 = vpack.i.bf16 %v515_v38, %v514_v37  ;;  %v516_v41 = vld [vmem:[#allocation2 + $0x139] sm:$0xff]  ;;  %v517_v42 = vld [vmem:[#allocation2 + $0x141] sm:$0xff]  ;;  %v528_v60 = vld [vmem:[#allocation2 + $0x4a] sm:$0xff] }
  0x37   : > { %v518_v43 = vld [vmem:[#allocation2 + $0x151] sm:$0xff]  ;;  %v519_v44 = vld [vmem:[#allocation2 + $0x159] sm:$0xff]  ;;  %v2785_v45 = vpack.i.bf16 %v517_v42, %v516_v41  ;;  %v525_v55 = vld [vmem:[#allocation2 + $0x22] sm:$0xff]  ;;  %v3677_v3 = vpack.i.bf16 %v529_v62, %v528_v60 }
  0x38   : > { %v2790_v46 = vpack.i.bf16 %v519_v44, %v518_v43  ;;  %v520_v47 = vld [vmem:[#allocation2 + $0x169] sm:$0xff]  ;;  %v527_v57 = vld [vmem:[#allocation2 + $0x3a] sm:$0xff]  ;;  %v3670_v58 = vpack.i.bf16 %v525_v55, %v524_v54  ;;  %v534_v8 = vld [vmem:[#allocation2 + $0x92] sm:$0xff] }
  0x39   : > { %2756 = vrot.lane.b32.xlu1 %v3643_v18, %s3389_s29  ;;  %v521_v48 = vld [vmem:[#allocation2 + $0x171] sm:$0xff]  ;;  %v3673_v59 = vpack.i.bf16 %v527_v57, %v526_v56  ;;  %v530_v63 = vld [vmem:[#allocation2 + $0x62] sm:$0xff]  ;;  %v532_v6 = vld [vmem:[#allocation2 + $0x7a] sm:$0xff] }
  0x3a   : > { %2761 = vrot.lane.b32.xlu0 %v3648_v22, %s3389_s29  ;;  %v2795_v52 = vpack.i.bf16 %v521_v48, %v520_v47  ;;  %v531_v0 = vld [vmem:[#allocation2 + $0x6a] sm:$0xff]  ;;  %v533_v7 = vld [vmem:[#allocation2 + $0x82] sm:$0xff]  ;;  %v535_v9 = vld [vmem:[#allocation2 + $0x9a] sm:$0xff] }
  0x3b   : > { %v3681_v4 = vpack.i.bf16 %v531_v0, %v530_v63  ;;  %v3685_v10 = vpack.i.bf16 %v533_v7, %v532_v6  ;;  %v3689_v11 = vpack.i.bf16 %v535_v9, %v534_v8  ;;  %v536_v12 = vld [vmem:[#allocation2 + $0xaa] sm:$0xff]  ;;  %v537_v13 = vld [vmem:[#allocation2 + $0xb2] sm:$0xff]  ;;  %v538_v14 = vld [vmem:[#allocation2 + $0xc2] sm:$0xff] }
  0x3c   : > { %v539_v15 = vld [vmem:[#allocation2 + $0xca] sm:$0xff]  ;;  %v3693_v16 = vpack.i.bf16 %v537_v13, %v536_v12  ;;  %v540_v19 = vld [vmem:[#allocation2 + $0xda] sm:$0xff]  ;;  %v541_v20 = vld [vmem:[#allocation2 + $0xe2] sm:$0xff] }
  0x3d   : > { %2766 = vrot.lane.b32.xlu1 %v3657_v33, %s3389_s29  ;;  %v3697_v17 = vpack.i.bf16 %v539_v15, %v538_v14  ;;  %v542_v21 = vld [vmem:[#allocation2 + $0xf2] sm:$0xff]  ;;  %v543_v23 = vld [vmem:[#allocation2 + $0xfa] sm:$0xff]  ;;  %v3701_v25 = vpack.i.bf16 %v541_v20, %v540_v19  ;;  %v544_v27 = vld [vmem:[#allocation2 + $0x10a] sm:$0xff] }
  0x3e   : > { %2771 = vrot.lane.b32.xlu0 %v2770_v34, %s3389_s29  ;;  %v3705_v26 = vpack.i.bf16 %v543_v23, %v542_v21  ;;  %v545_v28 = vld [vmem:[#allocation2 + $0x112] sm:$0xff]  ;;  %v546_v29 = vld [vmem:[#allocation2 + $0x122] sm:$0xff]  ;;  %v547_v30 = vld [vmem:[#allocation2 + $0x12a] sm:$0xff] }
  0x3f   : > { %v3709_v34 = vpack.i.bf16 %v545_v28, %v544_v27  ;;  %v2860_v35 = vpack.i.bf16 %v547_v30, %v546_v29  ;;  %v548_v36 = vld [vmem:[#allocation2 + $0x13a] sm:$0xff]  ;;  %v549_v37 = vld [vmem:[#allocation2 + $0x142] sm:$0xff]  ;;  %v550_v38 = vld [vmem:[#allocation2 + $0x152] sm:$0xff] }
  0x40   : > { %v552_v42 = vld [vmem:[#allocation2 + $0x16a] sm:$0xff]  ;;  %v553_v43 = vld [vmem:[#allocation2 + $0x172] sm:$0xff]  ;;  %v3738_v55 = vld [vmem:[#allocation2 + $0x60] sm:$0xff] }
  0x41   : > { %2776 = vrot.lane.b32.xlu1 %v2775_v39, %s3389_s29  ;;  %v551_v39 = vld [vmem:[#allocation2 + $0x15a] sm:$0xff]  ;;  %v3724_v48 = vld [vmem:[#allocation2 + $0x30] sm:$0xff]  ;;  %v3728_v51 = vld [vmem:[#allocation2 + $0x48] sm:$0xff] }
  0x42   : > { %2781 = vrot.lane.b32.xlu0 %v2780_v40, %s3389_s29  ;;  %v2865_v40 = vpack.i.bf16 %v549_v37, %v548_v36  ;;  %v2870_v41 = vpack.i.bf16 %v551_v39, %v550_v38  ;;  %v3716_v44 = vld [vmem:[#allocation2 + $0x18] sm:$0xff]  ;;  %v3740_v56 = vld [vmem:[#allocation2 + $0x68] sm:$0xff]  ;;  %v3744_v60 = vld [vmem:[#allocation2 + $0x80] sm:$0xff] }
  0x43   : > { %v3726_v49 = vld [vmem:[#allocation2 + $0x38] sm:$0xff]  ;;  %v3749_v62 = vpack.i.bf16 %v3740_v56, %v3738_v55  ;;  %v3360_v63 = vld [vmem:[%s4633_s1] sm:$0xff]   ;;  %v564_v6 = vld [vmem:[#allocation2 + $0x90] sm:$0xff] }
  0x44   : > { %v3742_v57 = vld [vmem:[#allocation2 + $0x78] sm:$0xff]  ;;  %v566_v8 = vld [vmem:[#allocation2 + $0xa8] sm:$0xff]  ;;  %v567_v9 = vld [vmem:[#allocation2 + $0xb0] sm:$0xff]  ;;  %2649 = vmatprep.subr.bf16.mxu0 %v3360_v63  ;;  %2691 = vmatprep.subr.bf16.mxu1 %v3360_v63 }
  0x45   : > { %2786 = vrot.lane.b32.xlu1 %v2785_v45, %s3389_s29  ;;  %v3718_v45 = vld [vmem:[#allocation2 + $0x20] sm:$0xff]  ;;  %v3757_v0 = vpack.i.bf16 %v3744_v60, %v3742_v57  ;;  %v565_v7 = vld [vmem:[#allocation2 + $0x98] sm:$0xff]  ;;  %2650 = vmatpush3.bf16.msra.mxu0 %v3360_v63  ;;  %v3361_v13 = vld [vmem:[%s4633_s1 + $0x8] sm:$0xff]   ;;  %v3768_v14 = vpack.i.bf16 %v567_v9, %v566_v8 }
  0x46   : > { %2791 = vrot.lane.b32.xlu0 %v2790_v46, %s3389_s29  ;;  %v2875_v46 = vpack.i.bf16 %v553_v43, %v552_v42  ;;  %v2880_v47 = vpack.i.bf16 %v3718_v45, %v3716_v44  ;;  %2696 = vmatpush3.bf16.msra.mxu1 %v3360_v63  ;;  %v3761_v12 = vpack.i.bf16 %v565_v7, %v564_v6  ;;  %v3362_v15 = vld [vmem:[%s4633_s1 + $0x10] sm:$0xff]   ;;  %v3363_v19 = vld [vmem:[%s4633_s1 + $0x18] sm:$0xff]   ;;  %v474_v36 = vld [vmem:[#allocation2 + $0xc0] sm:$0xff] }
  0x47   : > { %2651 = vmatprep.subr.bf16.mxu0 %v3361_v13  ;;  %2692 = vmatprep.subr.bf16.mxu1 %v3361_v13  ;;  %v314_v21 = vld [vmem:[%s3500_s26 + $0xf8] sm:$0xff]  ;;  %v475_v37 = vld [vmem:[#allocation2 + $0xc8] sm:$0xff]  ;;  %v478_v7 = vld [vmem:[#allocation2 + $0xf0] sm:$0xff] }
  0x48   : > { %v353_v27 = vmul.f32 %v3492_v1, %v314_v21  ;;  %v3065_v39 = vpack.i.bf16 %v475_v37, %v474_v36  ;;  %v476_v43 = vld [vmem:[#allocation2 + $0xd8] sm:$0xff]  ;;  %v603_v6 = vld [vmem:[#allocation2 + $0xe1] sm:$0xff]  ;;  %v481_v21 = vld [vmem:[#allocation2 + $0x110] sm:$0xff] }
  0x49   : > { %2796 = vrot.lane.b32.xlu1 %v2795_v52, %s3389_s29  ;;  %v3730_v52 = vld [vmem:[#allocation2 + $0x50] sm:$0xff]  ;;  %2652 = vmatpush3.bf16.msra.mxu0 %v3361_v13  ;;  %v479_v8 = vld [vmem:[#allocation2 + $0xf8] sm:$0xff] }
  0x4a   : > { %2801 = vrot.lane.b32.xlu0 %v2800_v53, %s3390_s30  ;;  %v2885_v53 = vpack.i.bf16 %v3726_v49, %v3724_v48  ;;  %v2890_v54 = vpack.i.bf16 %v3730_v52, %v3728_v51  ;;  %2697 = vmatpush3.bf16.msra.mxu1 %v3361_v13  ;;  %v392_v29 = vadd.f32 %v3505_v2, %v353_v27  ;;  %v604_v13 = vld [vmem:[#allocation2 + $0xf1] sm:$0xff] }
  0x4b   : > { %2653 = vmatprep.subr.bf16.mxu0 %v3362_v15  ;;  %2693 = vmatprep.subr.bf16.mxu1 %v3362_v15  ;;  %v3940_v36 = vld [vmem:[#allocation2 + $0x150] sm:$0xff] }
  0x4c   : > { %v424_v30 = vmax.f32 %v392_v29, 0.0  ;;  %v702_v29 = vld [vmem:[#allocation2 + $0x111] sm:$0xff] }
  0x4d   : > { %2806 = vrot.lane.b32.xlu1 %v3670_v58, %s3390_s30  ;;  %2654 = vmatpush3.bf16.msra.mxu0 %v3362_v15 }
  0x4e   : > { %2811 = vrot.lane.b32.xlu0 %v3673_v59, %s3390_s30  ;;  %2698 = vmatpush3.bf16.msra.mxu1 %v3362_v15  ;;  %457 = vst.msk [vmem:[#allocation2 + $0x189] sm:$0xff] %vm237_vm0, %v424_v30 }
  0x4f   : > { %2655 = vmatprep.subr.bf16.mxu0 %v3363_v19  ;;  %2694 = vmatprep.subr.bf16.mxu1 %v3363_v19 }
  0x51   : > { %2816 = vrot.lane.b32.xlu1 %v3677_v3, %s3390_s30  ;;  %2656 = vmatpush3.bf16.msra.mxu0 %v3363_v19 }
  0x52   : > { %2821 = vrot.lane.b32.xlu0 %v3681_v4, %s3390_s30  ;;  %2699 = vmatpush3.bf16.msra.mxu1 %v3363_v19 }
  0x55   : > { %2826 = vrot.lane.b32.xlu1 %v3685_v10, %s3390_s30 }
  0x56   : > { %2831 = vrot.lane.b32.xlu0 %v3689_v11, %s3390_s30 }
  0x59   : > { %2836 = vrot.lane.b32.xlu1 %v3693_v16, %s3390_s30 }
  0x5a   : > { %2841 = vrot.lane.b32.xlu0 %v3697_v17, %s3390_s30 }
  0x5d   : > { %2846 = vrot.lane.b32.xlu1 %v3701_v25, %s3390_s30 }
  0x5e   : > { %2851 = vrot.lane.b32.xlu0 %v3705_v26, %s3390_s30 }
  0x61   : > { %2856 = vrot.lane.b32.xlu1 %v3709_v34, %s3390_s30 }
  0x62   : > { %2861 = vrot.lane.b32.xlu0 %v2860_v35, %s3390_s30 }
  0x65   : > { %2866 = vrot.lane.b32.xlu1 %v2865_v40, %s3390_s30 }
  0x66   : > { %2871 = vrot.lane.b32.xlu0 %v2870_v41, %s3390_s30 }
  0x69   : > { %2876 = vrot.lane.b32.xlu1 %v2875_v46, %s3390_s30  ;;  %v3888_v46 = vld [vmem:[#allocation2 + $0xe0] sm:$0xff]  ;;  %s235_s30 = scalar_lea.vmem %s4637_s5, %s2600_s23 }
  0x6a   : > { %2881 = vrot.lane.b32.xlu0 %v2880_v47, %s3391_s6  ;;  %4656 = vst [vmem:[#allocation8_spill] sm:$0xff] %v3888_v46 }
  0x6d   : > { %2886 = vrot.lane.b32.xlu1 %v2885_v53, %s3391_s6 }
  0x6e   : > { %2891 = vrot.lane.b32.xlu0 %v2890_v54, %s3391_s6 }
  0x71   : > { %2896 = vrot.lane.b32.xlu1 %v3749_v62, %s3391_s6 }
  0x72   : > { %2901 = vrot.lane.b32.xlu0 %v3757_v0, %s3391_s6 }
  0x75   : > { %2906 = vrot.lane.b32.xlu1 %v3761_v12, %s3391_s6 }
  0x76   : > { %2911 = vrot.lane.b32.xlu0 %v3768_v14, %s3391_s6 }
  0x79   : > { %2916 = vrot.lane.b32.xlu1 %v3588_v31, %s3392_s13  ;;  %v3364_v31 = vld [vmem:[%s4633_s1 + $0x20] ss:$0 sps:$4 sm:$0xff]  }
  0x7a   : > { %2921 = vrot.lane.b32.xlu0 %v3584_v24, %s3392_s13  ;;  %2701 = vmatprep.subr.msk.bf16.mxu0 %vm2135_vm3, %v3364_v31  ;;  %v2137_v20 = vsel %vm2135_vm3, %v3364_v31, 0 }
  0x7b   : > { %2702 = vmatprep.subr.msk.bf16.mxu1 %vm2135_vm3, %v3364_v31  ;;  %2658 = vmatpush3.bf16.msra.mxu0 %v2137_v20 }
  0x7c   : > { %2700 = vmatpush3.bf16.msra.mxu1 %v2137_v20 }
  0x7d   : > { %2926 = vrot.lane.b32.xlu1 %v3670_v58, %s3393_s16  ;;  %v313_v58 = vld [vmem:[%s3500_s26 + $0xf0] sm:$0xff] }
  0x7e   : > { %2931 = vrot.lane.b32.xlu0 %v3673_v59, %s3393_s16  ;;  %v352_v23 = vmul.f32 %v3492_v1, %v313_v58  ;;  %v480_v58 = vld [vmem:[#allocation2 + $0x108] sm:$0xff] }
  0x7f   : > { %v3155_v27 = vpack.i.bf16 %v481_v21, %v480_v58 }
  0x80   : > { %v391_v28 = vadd.f32 %v3505_v2, %v352_v23 }
  0x81   : > { %2936 = vrot.lane.b32.xlu1 %v2885_v53, %s3394_s21 }
  0x82   : > { %2941 = vrot.lane.b32.xlu0 %v2890_v54, %s3394_s21 }
  0x85   : > { %2946 = vrot.lane.b32.xlu1 %v3584_v24, %s3395_s22  ;;  %v423_v24 = vmax.f32 %v391_v28, 0.0  ;;  %v701_v28 = vld [vmem:[#allocation2 + $0x109] sm:$0xff] }
  0x86   : > { %2951 = vrot.lane.b32.xlu0 %v3590_v32, %s3395_s22 }
  0x87   : > { %456 = vst.msk [vmem:[#allocation2 + $0x181] sm:$0xff] %vm237_vm0, %v423_v24 }
  0x89   : > { %2956 = vrot.lane.b32.xlu1 %v3673_v59, %s3396_s24 }
  0x8a   : > { %2961 = vrot.lane.b32.xlu0 %v3677_v3, %s3396_s24 }
  0x8b   : > { %v3825_v1 = vpop.permute.xlu0 %2721 }
  0x8d   : > { %2966 = vrot.lane.b32.xlu1 %v3590_v32, %s3392_s13 }
  0x8e   : > { %2971 = vrot.lane.b32.xlu0 %v3609_v50, %s3392_s13 }
  0x91   : > { %2976 = vrot.lane.b32.xlu1 %v3677_v3, %s3393_s16 }
  0x92   : > { %2981 = vrot.lane.b32.xlu0 %v3681_v4, %s3393_s16 }
  0x95   : > { %2986 = vrot.lane.b32.xlu1 %v3749_v62, %s3394_s21 }
  0x96   : > { %2991 = vrot.lane.b32.xlu0 %v3757_v0, %s3394_s21  ;;  %v602_v0 = vld [vmem:[#allocation2 + $0xd9] sm:$0xff] }
  0x99   : > { %2996 = vrot.lane.b32.xlu1 %v3609_v50, %s3395_s22 }
  0x9a   : > { %3001 = vrot.lane.b32.xlu0 %v3622_v61, %s3395_s22 }
  0x9d   : > { %3006 = vrot.lane.b32.xlu1 %v3681_v4, %s3396_s24 }
  0x9e   : > { %3011 = vrot.lane.b32.xlu0 %v3685_v10, %s3396_s24 }
  0x9f   : > { %v3831_v2 = vpop.permute.xlu1 %2731 }
  0xa0   : > { %v3833_v32 = vpop.permute.xlu0 %2726 }
  0xa1   : > { %3016 = vrot.lane.b32.xlu1 %v3622_v61, %s3392_s13 }
  0xa2   : > { %3021 = vrot.lane.b32.xlu0 %v3632_v5, %s3392_s13 }
  0xa3   : > { %v3839_v50 = vpop.permute.xlu1 %2736 }
  0xa4   : > { %v3841_v59 = vpop.permute.xlu0 %2741 }
  0xa5   : > { %3026 = vrot.lane.b32.xlu1 %v3685_v10, %s3393_s16 }
  0xa6   : > { %3031 = vrot.lane.b32.xlu0 %v3689_v11, %s3393_s16 }
  0xa7   : > { %v3847_v3 = vpop.permute.xlu1 %2746 }
  0xa8   : > { %v3849_v4 = vpop.permute.xlu0 %2751 }
  0xa9   : > { %3036 = vrot.lane.b32.xlu1 %v3761_v12, %s3394_s21  ;;  %v3130_v12 = vpack.i.bf16 %v603_v6, %v602_v0 }
  0xaa   : > { %3041 = vrot.lane.b32.xlu0 %v3768_v14, %s3394_s21 }
  0xab   : > { %v3855_v61 = vpop.permute.xlu1 %2756 }
  0xac   : > { %v3857_v35 = vpop.permute.xlu0 %2761 }
  0xad   : > { %3046 = vrot.lane.b32.xlu1 %v3632_v5, %s3395_s22 }
  0xae   : > { %3051 = vrot.lane.b32.xlu0 %v3643_v18, %s3395_s22 }
  0xaf   : > { %v3863_v10 = vpop.permute.xlu1 %2766 }
  0xb0   : > { %4651 = vst [vmem:[#allocation3_spill] sm:$0xff] %v3863_v10  ;;  %v3865_v38 = vpop.permute.xlu0 %2771 }
  0xb1   : > { %4652 = vst [vmem:[#allocation4_spill] sm:$0xff] %v3865_v38  ;;  %3056 = vrot.lane.b32.xlu1 %v3689_v11, %s3396_s24 }
  0xb2   : > { %3061 = vrot.lane.b32.xlu0 %v3693_v16, %s3396_s24 }
  0xb3   : > { %v3871_v40 = vpop.permute.xlu1 %2776 }
  0xb4   : > { %4653 = vst [vmem:[#allocation5_spill] sm:$0xff] %v3871_v40  ;;  %v3873_v41 = vpop.permute.xlu0 %2781 }
  0xb5   : > { %4654 = vst [vmem:[#allocation6_spill] sm:$0xff] %v3873_v41  ;;  %3066 = vrot.lane.b32.xlu1 %v3065_v39, %s3391_s6  ;;  %v458_v41 = vld [vmem:[#allocation2] sm:$0xff] }
  0xb6   : > { %3071 = vrot.lane.b32.xlu0 %v3643_v18, %s3392_s13  ;;  %v3095_v18 = vpack.i.bf16 %v3888_v46, %v476_v43  ;;  %v3165_v43 = vpack.i.bf16 %v702_v29, %v701_v28 }
  0xb7   : > { %v3878_v5 = vpop.permute.xlu1 %2786 }
  0xb8   : > { %4655 = vst [vmem:[#allocation7_spill] sm:$0xff] %v3878_v5  ;;  %v3880_v42 = vpop.permute.xlu0 %2791  ;;  %v459_v5 = vld [vmem:[#allocation2 + $0x8] sm:$0xff] }
  0xb9   : > { %3076 = vrot.lane.b32.xlu1 %v3648_v22, %s3392_s13  ;;  %v2794_v24 = vunpack.i.h.bf16 %v3880_v42  ;;  %v2793_v30 = vunpack.i.l.bf16 %v3880_v42 }
  0xba   : > { %3081 = vrot.lane.b32.xlu0 %v3693_v16, %s3393_s16 }
  0xbb   : > { %v3886_v11 = vpop.permute.xlu1 %2796 }
  0xbc   : > { %v3890_v47 = vpop.permute.xlu0 %2801  ;;  %v2798_v0 = vunpack.i.l.bf16 %v3886_v11 }
  0xbd   : > { %3086 = vrot.lane.b32.xlu1 %v3697_v17, %s3393_s16 }
  0xbe   : > { %3091 = vrot.lane.b32.xlu0 %v3065_v39, %s3394_s21 }
  0xbf   : > { %v3896_v53 = vpop.permute.xlu1 %2806 }
  0xc0   : > { %v3898_v54 = vpop.permute.xlu0 %2811  ;;  %v2808_v38 = vunpack.i.l.bf16 %v3896_v53 }
  0xc1   : > { %3096 = vrot.lane.b32.xlu1 %v3095_v18, %s3394_s21 }
  0xc2   : > { %3101 = vrot.lane.b32.xlu0 %v3648_v22, %s3395_s22  ;;  %v3125_v22 = vpack.i.bf16 %v479_v8, %v478_v7  ;;  %v1799_v8 = vsel %vm237_vm0, %v3940_v36, %v2793_v30 }
  0xc3   : > { %v3903_v16 = vpop.permute.xlu1 %2816 }
  0xc4   : > { %v3905_v62 = vpop.permute.xlu0 %2821 }
  0xc5   : > { %3106 = vrot.lane.b32.xlu1 %v3657_v33, %s3395_s22  ;;  %v605_v33 = vld [vmem:[#allocation2 + $0xf9] sm:$0xff] }
  0xc6   : > { %3111 = vrot.lane.b32.xlu0 %v3697_v17, %s3396_s24  ;;  %v3135_v15 = vpack.i.bf16 %v605_v33, %v604_v13 }
  0xc7   : > { %v3911_v63 = vpop.permute.xlu1 %2826 }
  0xc8   : > { %v3913_v9 = vpop.permute.xlu0 %2831 }
  0xc9   : > { %3116 = vrot.lane.b32.xlu1 %v3701_v25, %s3396_s24 }
  0xca   : > { %3121 = vrot.lane.b32.xlu0 %v3095_v18, %s3391_s6  ;;  %v2799_v18 = vunpack.i.h.bf16 %v3886_v11 }
  0xcb   : > { %v3918_v14 = vpop.permute.xlu1 %2836 }
  0xcc   : > { %v3920_v17 = vpop.permute.xlu0 %2841 }
  0xcd   : > { %4657 = vst [vmem:[#allocation9_spill] sm:$0xff] %v3920_v17  ;;  %3126 = vrot.lane.b32.xlu1 %v3125_v22, %s3391_s6 }
  0xce   : > { %3131 = vrot.lane.b32.xlu0 %v3130_v12, %s3392_s13  ;;  %v3955_v12 = vld [vmem:[#allocation2 + $0x170] sm:$0xff] }
  0xcf   : > { %v3924_v19 = vpop.permute.xlu1 %2846  ;;  %v1802_v29 = vsel %vm237_vm0, %v3955_v12, %v2799_v18 }
  0xd0   : > { %4658 = vst [vmem:[#allocation10_spill] sm:$0xff] %v3924_v19  ;;  %v3926_v31 = vpop.permute.xlu0 %2851 }
  0xd1   : > { %4659 = vst [vmem:[#allocation11_spill] sm:$0xff] %v3926_v31  ;;  %3136 = vrot.lane.b32.xlu1 %v3135_v15, %s3392_s13  ;;  %v2803_v31 = vunpack.i.l.bf16 %v3890_v47 }
  0xd2   : > { %3141 = vrot.lane.b32.xlu0 %v3701_v25, %s3393_s16  ;;  %v3942_v25 = vld [vmem:[#allocation2 + $0x158] sm:$0xff] }
  0xd3   : > { %v3931_v20 = vpop.permute.xlu1 %2856  ;;  %v1800_v42 = vsel %vm237_vm0, %v3942_v25, %v2794_v24 }
  0xd4   : > { %4660 = vst [vmem:[#allocation12_spill] sm:$0xff] %v3931_v20  ;;  %v3933_v23 = vpop.permute.xlu0 %2861  ;;  %v2729_v20 = vunpack.i.h.bf16 %v3833_v32 }
  0xd5   : > { %4661 = vst [vmem:[#allocation13_spill] sm:$0xff] %v3933_v23  ;;  %3146 = vrot.lane.b32.xlu1 %v3705_v26, %s3393_s16  ;;  %v613_v23 = vld [vmem:[#allocation2 + $0x159] sm:$0xff] }
  0xd6   : > { %3151 = vrot.lane.b32.xlu0 %v3125_v22, %s3394_s21  ;;  %v3953_v22 = vld [vmem:[#allocation2 + $0x168] sm:$0xff] }
  0xd7   : > { %v3944_v37 = vpop.permute.xlu1 %2866  ;;  %v1801_v24 = vsel %vm237_vm0, %v3953_v22, %v2798_v0  ;;  %v608_v0 = vld [vmem:[#allocation2 + $0x121] sm:$0xff] }
  0xd8   : > { %4662 = vst [vmem:[#allocation14_spill] sm:$0xff] %v3944_v37  ;;  %v2872_v39 = vpop.permute.xlu0 %2871  ;;  %v738_v37 = vld [vmem:[#allocation2 + $0x142] sm:$0xff] }
  0xd9   : > { %v2874_v6 = vunpack.i.h.bf16 %v2872_v39  ;;  %v2873_v7 = vunpack.i.l.bf16 %v2872_v39  ;;  %3156 = vrot.lane.b32.xlu1 %v3155_v27, %s3394_s21 }
  0xda   : > { %3161 = vrot.lane.b32.xlu0 %v3135_v15, %s3395_s22 }
  0xdb   : > { %v3959_v13 = vsel %vm1803_vm4, %v1799_v8, %v2873_v7  ;;  %v3962_v11 = vsel %vm1803_vm4, %v1800_v42, %v2874_v6  ;;  %v2877_v33 = vpop.permute.xlu1 %2876  ;;  %v482_v6 = vld [vmem:[#allocation2 + $0x120] sm:$0xff]  ;;  %v483_v7 = vld [vmem:[#allocation2 + $0x128] sm:$0xff] }
  0xdc   : > { %4663 = vst [vmem:[#allocation15_spill] sm:$0xff] %v3959_v13  ;;  %4664 = vst [vmem:[#allocation16_spill] sm:$0xff] %v3962_v11  ;;  %v2879_v58 = vunpack.i.h.bf16 %v2877_v33  ;;  %v2878_v21 = vunpack.i.l.bf16 %v2877_v33  ;;  %v3964_v28 = vpop.permute.xlu0 %2881  ;;  %v3185_v18 = vpack.i.bf16 %v483_v7, %v482_v6  ;;  %v609_v8 = vld [vmem:[#allocation2 + $0x129] sm:$0xff]  ;;  %v484_v7 = vld [vmem:[#allocation2 + $0x138] sm:$0xff] }
  0xdd   : > { %3166 = vrot.lane.b32.xlu1 %v3165_v43, %s3395_s22  ;;  %v706_v11 = vld [vmem:[#allocation2 + $0x141] sm:$0xff]  ;;  %v2884_v17 = vunpack.i.h.bf16 %v3964_v28 }
  0xde   : > { %v3972_v15 = vsel %vm1803_vm4, %v1802_v29, %v2879_v58  ;;  %v3975_v30 = vsel %vm1803_vm4, %v1801_v24, %v2878_v21  ;;  %3171 = vrot.lane.b32.xlu0 %v3705_v26, %s3396_s24  ;;  %v3195_v26 = vpack.i.bf16 %v609_v8, %v608_v0  ;;  %v640_v21 = vld [vmem:[#allocation2 + $0x122] sm:$0xff]  ;;  %v641_v29 = vld [vmem:[#allocation2 + $0x12a] sm:$0xff]  ;;  %v737_v13 = vld [vmem:[#allocation2 + $0x13a] sm:$0xff] }
  0xdf   : > { %4665 = vst [vmem:[#allocation17_spill] sm:$0xff] %v3972_v15  ;;  %4666 = vst [vmem:[#allocation18_spill] sm:$0xff] %v3975_v30  ;;  %v3979_v39 = vpop.permute.xlu1 %2886  ;;  %v485_v30 = vld [vmem:[#allocation2 + $0x140] sm:$0xff]  ;;  %v4020_v19 = vpack.i.bf16 %v738_v37, %v737_v13 }
  0xe0   : > { %v3981_v42 = vpop.permute.xlu0 %2891  ;;  %v4007_v8 = vpack.i.bf16 %v485_v30, %v484_v7  ;;  %v2728_v30 = vunpack.i.l.bf16 %v3833_v32  ;;  %v2804_v7 = vunpack.i.h.bf16 %v3890_v47  ;;  %v2883_v32 = vunpack.i.l.bf16 %v3964_v28 }
  0xe1   : > { %3176 = vrot.lane.b32.xlu1 %v3709_v34, %s3396_s24  ;;  %v4028_v47 = vpack.i.bf16 %v3942_v25, %v3940_v36  ;;  %v2889_v37 = vunpack.i.h.bf16 %v3979_v39  ;;  %v2888_v13 = vunpack.i.l.bf16 %v3979_v39  ;;  %v1774_v36 = vsel %vm237_vm0, %v3718_v45, %v2729_v20 }
  0xe2   : > { %3181 = vrot.lane.b32.xlu0 %v3155_v27, %s3391_s6  ;;  %v3997_v27 = vpack.i.bf16 %v641_v29, %v640_v21  ;;  %v2724_v21 = vunpack.i.h.bf16 %v3825_v1  ;;  %v2723_v29 = vunpack.i.l.bf16 %v3825_v1  ;;  %v2809_v1 = vunpack.i.h.bf16 %v3896_v53 }
  0xe3   : > { %v3986_v33 = vpop.permute.xlu1 %2896  ;;  %v1773_v28 = vsel %vm237_vm0, %v3716_v44, %v2728_v30 }
  0xe4   : > { %v3988_v58 = vpop.permute.xlu0 %2901  ;;  %v1772_v53 = vsel %vm237_vm0, %v459_v5, %v2724_v21 }
  0xe5   : > { %3186 = vrot.lane.b32.xlu1 %v3185_v18, %s3391_s6 }
  0xe6   : > { %3191 = vrot.lane.b32.xlu0 %v3165_v43, %s3392_s13  ;;  %v705_v43 = vld [vmem:[#allocation2 + $0x139] sm:$0xff] }
  0xe7   : > { %v3992_v24 = vpop.permute.xlu1 %2906 }
  0xe8   : > { %v3994_v15 = vpop.permute.xlu0 %2911 }
  0xe9   : > { %3196 = vrot.lane.b32.xlu1 %v3195_v26, %s3392_s13 }
  0xea   : > { %3201 = vrot.lane.b32.xlu0 %v3709_v34, %s3393_s16  ;;  %v612_v34 = vld [vmem:[#allocation2 + $0x151] sm:$0xff] }
  0xeb   : > { %v4001_v6 = vpop.permute.xlu1 %2916  ;;  %v4030_v10 = vpack.i.bf16 %v613_v23, %v612_v34  ;;  %v1805_v23 = vsel %vm1803_vm4, %v1772_v53, %v2804_v7 }
  0xec   : > { %v4003_v0 = vpop.permute.xlu0 %2921  ;;  %v2919_v39 = vunpack.i.h.bf16 %v4001_v6 }
  0xed   : > { %3206 = vrot.lane.b32.xlu1 %v3997_v27, %s3393_s16  ;;  %v2924_v45 = vunpack.i.h.bf16 %v4003_v0  ;;  %v2923_v20 = vunpack.i.l.bf16 %v4003_v0 }
  0xee   : > { %3211 = vrot.lane.b32.xlu0 %v3185_v18, %s3394_s21  ;;  %v4018_v18 = vpack.i.bf16 %v706_v11, %v705_v43  ;;  %v1771_v11 = vsel %vm237_vm0, %v458_v41, %v2723_v29  ;;  %v1806_v41 = vsel %vm1803_vm4, %v1773_v28, %v2808_v38  ;;  %v1807_v43 = vsel %vm1803_vm4, %v1774_v36, %v2809_v1 }
  0xef   : > { %v2927_v40 = vpop.permute.xlu1 %2926  ;;  %v1804_v25 = vsel %vm1803_vm4, %v1771_v11, %v2803_v31  ;;  %v1838_v29 = vsel %vm1836_vm5, %v1805_v23, %v2884_v17  ;;  %v1839_v38 = vsel %vm1836_vm5, %v1806_v41, %v2888_v13  ;;  %v1840_v31 = vsel %vm1836_vm5, %v1807_v43, %v2889_v37 }
  0xf0   : > { %v2932_v46 = vpop.permute.xlu0 %2931  ;;  %v1837_v44 = vsel %vm1836_vm5, %v1804_v25, %v2883_v32  ;;  %v2929_v34 = vunpack.i.h.bf16 %v2927_v40  ;;  %v2928_v30 = vunpack.i.l.bf16 %v2927_v40  ;;  %v1871_v53 = vsel %vm1869_vm6, %v1838_v29, %v2919_v39 }
  0xf1   : > { %3216 = vrot.lane.b32.xlu1 %v4007_v8, %s3394_s21  ;;  %v2933_v7 = vunpack.i.l.bf16 %v2932_v46  ;;  %v1872_v37 = vsel %vm1869_vm6, %v1839_v38, %v2923_v20  ;;  %v1873_v40 = vsel %vm1869_vm6, %v1840_v31, %v2924_v45 }
  0xf2   : > { %3221 = vrot.lane.b32.xlu0 %v3195_v26, %s3395_s22  ;;  %v2918_v26 = vunpack.i.l.bf16 %v4001_v6  ;;  %v2934_v6 = vunpack.i.h.bf16 %v2932_v46 }
  0xf3   : > { %v2937_v5 = vpop.permute.xlu1 %2936  ;;  %v1905_v41 = vsel %vm1902_vm7, %v1872_v37, %v2933_v7 }
  0xf4   : > { %v2942_v21 = vpop.permute.xlu0 %2941  ;;  %v2939_v17 = vunpack.i.h.bf16 %v2937_v5  ;;  %v2938_v1 = vunpack.i.l.bf16 %v2937_v5  ;;  %v1870_v0 = vsel %vm1869_vm6, %v1837_v44, %v2918_v26  ;;  %v1906_v43 = vsel %vm1902_vm7, %v1873_v40, %v2934_v6 }
  0xf5   : > { %3226 = vrot.lane.b32.xlu1 %v4018_v18, %s3395_s22  ;;  %v2944_v11 = vunpack.i.h.bf16 %v2942_v21  ;;  %v2943_v28 = vunpack.i.l.bf16 %v2942_v21  ;;  %v1903_v46 = vsel %vm1902_vm7, %v1870_v0, %v2928_v30  ;;  %v645_v0 = vld [vmem:[#allocation2 + $0x15a] sm:$0xff] }
  0xf6   : > { %3231 = vrot.lane.b32.xlu0 %v3997_v27, %s3396_s24  ;;  %v1904_v27 = vsel %vm1902_vm7, %v1871_v53, %v2929_v34  ;;  %v1936_v39 = vsel %vm1935_vm8, %v1903_v46, %v2938_v1  ;;  %v741_v46 = vld [vmem:[#allocation2 + $0x16a] sm:$0xff] }
  0xf7   : > { %v2947_v32 = vpop.permute.xlu1 %2946  ;;  %v1937_v26 = vsel %vm1935_vm8, %v1904_v27, %v2939_v17  ;;  %v1938_v44 = vsel %vm1935_vm8, %v1905_v41, %v2943_v28  ;;  %v1939_v29 = vsel %vm1935_vm8, %v1906_v43, %v2944_v11  ;;  %v2734_v27 = vunpack.i.h.bf16 %v3831_v2  ;;  %v584_v41 = vld [vmem:[#allocation2 + $0x180] sm:$0xff]  ;;  %v585_v43 = vld [vmem:[#allocation2 + $0x188] sm:$0xff] }
  0xf8   : > { %v2952_v13 = vpop.permute.xlu0 %2951  ;;  %v2949_v36 = vunpack.i.h.bf16 %v2947_v32  ;;  %v2948_v23 = vunpack.i.l.bf16 %v2947_v32  ;;  %v644_v32 = vld [vmem:[#allocation2 + $0x152] sm:$0xff] }
  0xf9   : > { %3236 = vrot.lane.b32.xlu1 %v4020_v19, %s3396_s24  ;;  %v2954_v25 = vunpack.i.h.bf16 %v2952_v13  ;;  %v2953_v5 = vunpack.i.l.bf16 %v2952_v13 }
  0xfa   : > { %3241 = vrot.lane.b32.xlu0 %v4007_v8, %s3391_s6  ;;  %v1969_v8 = vsel %vm1968_vm9, %v1936_v39, %v2948_v23  ;;  %v1970_v30 = vsel %vm1968_vm9, %v1937_v26, %v2949_v36  ;;  %v709_v36 = vld [vmem:[#allocation2 + $0x169] sm:$0xff]  ;;  %v710_v23 = vld [vmem:[#allocation2 + $0x171] sm:$0xff]  ;;  %v2739_v39 = vunpack.i.h.bf16 %v3839_v50  ;;  %v2738_v26 = vunpack.i.l.bf16 %v3839_v50 }
  0xfb   : > { %v2957_v21 = vpop.permute.xlu1 %2956  ;;  %v1971_v6 = vsel %vm1968_vm9, %v1938_v44, %v2953_v5  ;;  %v1972_v7 = vsel %vm1968_vm9, %v1939_v29, %v2954_v25  ;;  %v2733_v25 = vunpack.i.l.bf16 %v3831_v2  ;;  %v742_v5 = vld [vmem:[#allocation2 + $0x172] sm:$0xff]  ;;  %v2813_v44 = vunpack.i.l.bf16 %v3898_v54 }
  0xfc   : > { %v2959_v45 = vunpack.i.h.bf16 %v2957_v21  ;;  %v2958_v20 = vunpack.i.l.bf16 %v2957_v21  ;;  %v2962_v38 = vpop.permute.xlu0 %2961  ;;  %v2814_v21 = vunpack.i.h.bf16 %v3898_v54  ;;  %v2818_v2 = vunpack.i.l.bf16 %v3903_v16 }
  0xfd   : > { %v2964_v31 = vunpack.i.h.bf16 %v2962_v38  ;;  %v2963_v34 = vunpack.i.l.bf16 %v2962_v38  ;;  %3246 = vrot.lane.b32.xlu1 %v4028_v47, %s3391_s6  ;;  %v4109_v38 = vpack.i.bf16 %v710_v23, %v709_v36  ;;  %v2893_v50 = vunpack.i.l.bf16 %v3981_v42 }
  0xfe   : > { %3251 = vrot.lane.b32.xlu0 %v4018_v18, %s3392_s13  ;;  %v2002_v17 = vsel %vm2001_vm10, %v1969_v8, %v2958_v20  ;;  %v2003_v1 = vsel %vm2001_vm10, %v1970_v30, %v2959_v45  ;;  %v4092_v18 = vpack.i.bf16 %v645_v0, %v644_v32  ;;  %v2819_v45 = vunpack.i.h.bf16 %v3903_v16 }
  0xff   : > { %v2004_v53 = vsel %vm2001_vm10, %v1971_v6, %v2963_v34  ;;  %v2005_v11 = vsel %vm2001_vm10, %v1972_v7, %v2964_v31  ;;  %v4085_v28 = vpop.permute.xlu1 %2966  ;;  %v2034_v13 = vpack.c.bf16 %v2003_v1, %v2002_v17  ;;  %v2894_v31 = vunpack.i.h.bf16 %v3981_v42 }
 0x100   : > { %v2035_v37 = vpack.c.bf16 %v2005_v11, %v2004_v53  ;;  %v4087_v40 = vpop.permute.xlu0 %2971  ;;  %v4115_v54 = vpack.i.bf16 %v742_v5, %v741_v46  ;;  %v4117_v34 = vpack.i.bf16 %v585_v43, %v584_v41  ;;  %v1775_v16 = vsel %vm237_vm0, %v3724_v48, %v2733_v25 }
 0x101   : > { %3256 = vrot.lane.b32.xlu1 %v4030_v10, %s3392_s13  ;;  %2659 = vmatprep.mubr.msk.bf16.mxu0 %vm2086_vm11, %v2034_v13  ;;  %v2898_v8 = vunpack.i.l.bf16 %v3986_v33  ;;  %v1778_v42 = vsel %vm237_vm0, %v3730_v52, %v2739_v39  ;;  %v1777_v30 = vsel %vm237_vm0, %v3728_v51, %v2738_v26  ;;  %v1808_v48 = vsel %vm1803_vm4, %v1775_v16, %v2813_v44 }
 0x102   : > { %3261 = vrot.lane.b32.xlu0 %v4020_v19, %s3393_s16  ;;  %2660 = vmatmul.mubr.msk.bf16.vlgmr.msra.gmra.mrb[0].mxu0 %vm2086_vm11, %v2035_v37  ;;  %v4107_v19 = vpack.i.bf16 %v3955_v12, %v3953_v22  ;;  %v1776_v22 = vsel %vm237_vm0, %v3726_v49, %v2734_v27  ;;  %v2899_v12 = vunpack.i.h.bf16 %v3986_v33  ;;  %v1811_v49 = vsel %vm1803_vm4, %v1778_v42, %v2819_v45 }
 0x103   : > { %v2977_v29 = vpop.permute.xlu1 %2976  ;;  %v1809_v6 = vsel %vm1803_vm4, %v1776_v22, %v2814_v21  ;;  %v1810_v17 = vsel %vm1803_vm4, %v1777_v30, %v2818_v2  ;;  %v2969_v33 = vunpack.i.h.bf16 %v4085_v28  ;;  %v2968_v1 = vunpack.i.l.bf16 %v4085_v28 }
 0x104   : > { %v2982_v20 = vpop.permute.xlu0 %2981  ;;  %v1841_v32 = vsel %vm1836_vm5, %v1808_v48, %v2893_v50  ;;  %v1842_v52 = vsel %vm1836_vm5, %v1809_v6, %v2894_v31  ;;  %v2974_v51 = vunpack.i.h.bf16 %v4087_v40  ;;  %v2973_v0 = vunpack.i.l.bf16 %v4087_v40 }
 0x105   : > { %3266 = vrot.lane.b32.xlu1 %v4092_v18, %s3393_s16  ;;  %v1843_v53 = vsel %vm1836_vm5, %v1810_v17, %v2898_v8  ;;  %v1844_v11 = vsel %vm1836_vm5, %v1811_v49, %v2899_v12  ;;  %v2979_v13 = vunpack.i.h.bf16 %v2977_v29  ;;  %v2978_v37 = vunpack.i.l.bf16 %v2977_v29 }
 0x106   : > { %3271 = vrot.lane.b32.xlu0 %v4028_v47, %s3394_s21  ;;  %v2984_v28 = vunpack.i.h.bf16 %v2982_v20  ;;  %v2983_v36 = vunpack.i.l.bf16 %v2982_v20  ;;  %v1874_v25 = vsel %vm1869_vm6, %v1841_v32, %v2968_v1  ;;  %v1875_v40 = vsel %vm1869_vm6, %v1842_v52, %v2969_v33  ;;  %v616_v32 = vld [vmem:[#allocation2 + $0x181] sm:$0xff]  ;;  %v617_v52 = vld [vmem:[#allocation2 + $0x189] sm:$0xff] }
 0x107   : > { %v2987_v7 = vpop.permute.xlu1 %2986  ;;  %v1877_v39 = vsel %vm1869_vm6, %v1844_v11, %v2974_v51  ;;  %v1876_v26 = vsel %vm1869_vm6, %v1843_v53, %v2973_v0  ;;  %v1908_v29 = vsel %vm1902_vm7, %v1875_v40, %v2979_v13  ;;  %v4191_v40 = vld [vmem:[#allocation2 + $0x199] sm:$0xff] }
 0x108   : > { %v2992_v47 = vpop.permute.xlu0 %2991  ;;  %v2989_v23 = vunpack.i.h.bf16 %v2987_v7  ;;  %v2988_v46 = vunpack.i.l.bf16 %v2987_v7  ;;  %v1909_v20 = vsel %vm1902_vm7, %v1876_v26, %v2983_v36  ;;  %v1910_v31 = vsel %vm1902_vm7, %v1877_v39, %v2984_v28  ;;  %v648_v28 = vld [vmem:[#allocation2 + $0x182] sm:$0xff] }
 0x109   : > { %3276 = vrot.lane.b32.xlu1 %v4107_v19, %s3394_s21  ;;  %v2994_v5 = vunpack.i.h.bf16 %v2992_v47  ;;  %v2993_v41 = vunpack.i.l.bf16 %v2992_v47  ;;  %v2744_v36 = vunpack.i.h.bf16 %v3841_v59  ;;  %v2824_v39 = vunpack.i.h.bf16 %v3905_v62 }
 0x10a   : > { %3281 = vrot.lane.b32.xlu0 %v4030_v10, %s3395_s22  ;;  %v1907_v10 = vsel %vm1902_vm7, %v1874_v25, %v2978_v37  ;;  %v1941_v16 = vsel %vm1935_vm8, %v1908_v29, %v2989_v23  ;;  %v649_v23 = vld [vmem:[#allocation2 + $0x18a] sm:$0xff]  ;;  %v2743_v25 = vunpack.i.l.bf16 %v3841_v59  ;;  %v2823_v26 = vunpack.i.l.bf16 %v3905_v62  ;;  %v4201_v59 = vld [vmem:[#allocation2 + $0x1a2] sm:$0xff] }
 0x10b   : > { %v2997_v27 = vpop.permute.xlu1 %2996  ;;  %v1940_v50 = vsel %vm1935_vm8, %v1907_v10, %v2988_v46  ;;  %v1942_v12 = vsel %vm1935_vm8, %v1909_v20, %v2993_v41  ;;  %v1943_v8 = vsel %vm1935_vm8, %v1910_v31, %v2994_v5  ;;  %v4185_v46 = vld [vmem:[#allocation2 + $0x198] sm:$0xff]  ;;  %v4193_v5 = vld [vmem:[#allocation2 + $0x1a1] sm:$0xff]  ;;  %v2749_v41 = vunpack.i.h.bf16 %v3847_v3 }
 0x10c   : > { %v3002_v43 = vpop.permute.xlu0 %3001  ;;  %v2999_v21 = vunpack.i.h.bf16 %v2997_v27  ;;  %v2998_v44 = vunpack.i.l.bf16 %v2997_v27  ;;  %v682_v27 = vld [vmem:[#allocation2 + $0x1a0] sm:$0xff]  ;;  %v2828_v10 = vunpack.i.l.bf16 %v3911_v63  ;;  %v2904_v20 = vunpack.i.h.bf16 %v3988_v58 }
 0x10d   : > { %3286 = vrot.lane.b32.xlu1 %v4109_v38, %s3395_s22  ;;  %v3004_v45 = vunpack.i.h.bf16 %v3002_v43  ;;  %v3003_v2 = vunpack.i.l.bf16 %v3002_v43  ;;  %v2748_v43 = vunpack.i.l.bf16 %v3847_v3  ;;  %v1780_v3 = vsel %vm237_vm0, %v3740_v56, %v2744_v36 }
 0x10e   : > { %3291 = vrot.lane.b32.xlu0 %v4092_v18, %s3396_s24  ;;  %v1973_v48 = vsel %vm1968_vm9, %v1940_v50, %v2998_v44  ;;  %v1974_v18 = vsel %vm1968_vm9, %v1941_v16, %v2999_v21  ;;  %v4199_v44 = vld [vmem:[#allocation2 + $0x19a] sm:$0xff]  ;;  %v2903_v62 = vunpack.i.l.bf16 %v3988_v58  ;;  %v3345_v31 = vpack.i.bf16 %v4193_v5, %v4191_v40 }
 0x10f   : > { %v3007_v22 = vpop.permute.xlu1 %3006  ;;  %v1975_v17 = vsel %vm1968_vm9, %v1942_v12, %v3003_v2  ;;  %v1976_v33 = vsel %vm1968_vm9, %v1943_v8, %v3004_v45  ;;  %v4205_v45 = vpack.i.bf16 %v649_v23, %v648_v28  ;;  %v3335_v2 = vpack.i.bf16 %v682_v27, %v4185_v46 }
 0x110   : > { %v3009_v42 = vunpack.i.h.bf16 %v3007_v22  ;;  %v3008_v30 = vunpack.i.l.bf16 %v3007_v22  ;;  %v3012_v6 = vpop.permute.xlu0 %3011  ;;  %v2909_v50 = vunpack.i.h.bf16 %v3992_v24  ;;  %v2908_v16 = vunpack.i.l.bf16 %v3992_v24 }
 0x111   : > { %v3014_v7 = vunpack.i.h.bf16 %v3012_v6  ;;  %v3013_v49 = vunpack.i.l.bf16 %v3012_v6  ;;  %3296 = vrot.lane.b32.xlu1 %v4115_v54, %s3396_s24  ;;  %v3355_v56 = vpack.i.bf16 %v4201_v59, %v4199_v44  ;;  %v1782_v58 = vsel %vm237_vm0, %v3744_v60, %v2749_v41 }
 0x112   : > { %v2006_v1 = vsel %vm2001_vm10, %v1973_v48, %v3008_v30  ;;  %v2007_v47 = vsel %vm2001_vm10, %v1974_v18, %v3009_v42  ;;  %3301 = vrot.lane.b32.xlu0 %v4107_v19, %s3391_s6  ;;  %v4183_v19 = vpack.i.bf16 %v617_v52, %v616_v32  ;;  %v1781_v22 = vsel %vm237_vm0, %v3742_v57, %v2748_v43 }
 0x113   : > { %v2036_v51 = vpack.c.bf16 %v2007_v47, %v2006_v1  ;;  %v2008_v0 = vsel %vm2001_vm10, %v1975_v17, %v3013_v49  ;;  %v2009_v53 = vsel %vm2001_vm10, %v1976_v33, %v3014_v7  ;;  %v4175_v11 = vpop.permute.xlu1 %3016  ;;  %v1814_v24 = vsel %vm1803_vm4, %v1781_v22, %v2828_v10 }
 0x114   : > { %v2037_v13 = vpack.c.bf16 %v2009_v53, %v2008_v0  ;;  %v4177_v37 = vpop.permute.xlu0 %3021  ;;  %v3018_v30 = vunpack.i.l.bf16 %v4175_v11  ;;  %v1847_v7 = vsel %vm1836_vm5, %v1814_v24, %v2908_v16  ;;  %v2833_v44 = vunpack.i.l.bf16 %v3913_v9 }
 0x115   : > { %3306 = vrot.lane.b32.xlu1 %v4117_v34, %s3391_s6  ;;  %2663 = vmatprep.mubr.msk.bf16.mxu0 %vm2086_vm11, %v2036_v51  ;;  %v3024_v57 = vunpack.i.h.bf16 %v4177_v37  ;;  %v3023_v18 = vunpack.i.l.bf16 %v4177_v37  ;;  %v2839_v59 = vunpack.i.h.bf16 %v3918_v14 }
 0x116   : > { %3311 = vrot.lane.b32.xlu0 %v4109_v38, %s3392_s13  ;;  %2664 = vmatmul.mubr.msk.bf16.gmra.mrb[4].mxu0 %vm2086_vm11, %v2037_v13  ;;  %v2829_v38 = vunpack.i.h.bf16 %v3911_v63  ;;  %v1779_v63 = vsel %vm237_vm0, %v3738_v55, %v2743_v25  ;;  %v1813_v55 = vsel %vm1803_vm4, %v1780_v3, %v2824_v39 }
 0x117   : > { %v3027_v21 = vpop.permute.xlu1 %3026  ;;  %v1812_v12 = vsel %vm1803_vm4, %v1779_v63, %v2823_v26  ;;  %v1846_v60 = vsel %vm1836_vm5, %v1813_v55, %v2904_v20  ;;  %v1880_v36 = vsel %vm1869_vm6, %v1847_v7, %v3023_v18  ;;  %v3365_v7 = vld [vmem:[#allocation2 + $0x98] sm:$0xff] }
 0x118   : > { %v3032_v29 = vpop.permute.xlu0 %3031  ;;  %v1815_v42 = vsel %vm1803_vm4, %v1782_v58, %v2829_v38  ;;  %v1845_v48 = vsel %vm1836_vm5, %v1812_v12, %v2903_v62  ;;  %v3029_v17 = vunpack.i.h.bf16 %v3027_v21  ;;  %v3028_v33 = vunpack.i.l.bf16 %v3027_v21 }
 0x119   : > { %3316 = vrot.lane.b32.xlu1 %v4183_v19, %s3392_s13  ;;  %v1848_v49 = vsel %vm1836_vm5, %v1815_v42, %v2909_v50  ;;  %v3034_v1 = vunpack.i.h.bf16 %v3032_v29  ;;  %v3033_v47 = vunpack.i.l.bf16 %v3032_v29  ;;  %v1878_v0 = vsel %vm1869_vm6, %v1845_v48, %v3018_v30 }
 0x11a   : > { %3321 = vrot.lane.b32.xlu0 %v4115_v54, %s3393_s16  ;;  %v3019_v54 = vunpack.i.h.bf16 %v4175_v11  ;;  %v1881_v28 = vsel %vm1869_vm6, %v1848_v49, %v3024_v57  ;;  %v2759_v30 = vunpack.i.h.bf16 %v3855_v61  ;;  %v2758_v48 = vunpack.i.l.bf16 %v3855_v61 }
 0x11b   : > { %v3037_v8 = vpop.permute.xlu1 %3036  ;;  %v1913_v5 = vsel %vm1902_vm7, %v1880_v36, %v3033_v47  ;;  %v1914_v41 = vsel %vm1902_vm7, %v1881_v28, %v3034_v1  ;;  %v2913_v57 = vunpack.i.l.bf16 %v3994_v15  ;;  %v2914_v1 = vunpack.i.h.bf16 %v3994_v15 }
 0x11c   : > { %v3042_v6 = vpop.permute.xlu0 %3041  ;;  %v3039_v32 = vunpack.i.h.bf16 %v3037_v8  ;;  %v3038_v52 = vunpack.i.l.bf16 %v3037_v8  ;;  %v1879_v53 = vsel %vm1869_vm6, %v1846_v60, %v3019_v54  ;;  %v2753_v54 = vunpack.i.l.bf16 %v3849_v4 }
 0x11d   : > { %3326 = vrot.lane.b32.xlu1 %v4205_v45, %s3393_s16  ;;  %v3044_v11 = vunpack.i.h.bf16 %v3042_v6  ;;  %v3043_v13 = vunpack.i.l.bf16 %v3042_v6  ;;  %v1912_v27 = vsel %vm1902_vm7, %v1879_v53, %v3029_v17  ;;  %v2834_v60 = vunpack.i.h.bf16 %v3913_v9 }
 0x11e   : > { %3331 = vrot.lane.b32.xlu0 %v4117_v34, %s3394_s21  ;;  %v1911_v34 = vsel %vm1902_vm7, %v1878_v0, %v3028_v33  ;;  %v1945_v39 = vsel %vm1935_vm8, %v1912_v27, %v3039_v32  ;;  %v3367_v33 = vld [vmem:[#allocation2 + $0xb0] sm:$0xff] }
 0x11f   : > { %v3047_v51 = vpop.permute.xlu1 %3046  ;;  %v1944_v43 = vsel %vm1935_vm8, %v1911_v34, %v3038_v52  ;;  %v1946_v21 = vsel %vm1935_vm8, %v1913_v5, %v3043_v13  ;;  %v1947_v38 = vsel %vm1935_vm8, %v1914_v41, %v3044_v11  ;;  %v1786_v61 = vsel %vm237_vm0, %v3367_v33, %v2759_v30 }
 0x120   : > { %v3052_v37 = vpop.permute.xlu0 %3051  ;;  %v3049_v23 = vunpack.i.h.bf16 %v3047_v51  ;;  %v3048_v46 = vunpack.i.l.bf16 %v3047_v51  ;;  %v1819_v13 = vsel %vm1803_vm4, %v1786_v61, %v2839_v59 }
 0x121   : > { %3336 = vrot.lane.b32.xlu1 %v3335_v2, %s3394_s21  ;;  %v3054_v25 = vunpack.i.h.bf16 %v3052_v37  ;;  %v3053_v40 = vunpack.i.l.bf16 %v3052_v37 }
 0x122   : > { %3341 = vrot.lane.b32.xlu0 %v4183_v19, %s3395_s22  ;;  %v1977_v3 = vsel %vm1968_vm9, %v1944_v43, %v3048_v46  ;;  %v1978_v19 = vsel %vm1968_vm9, %v1945_v39, %v3049_v23 }
 0x123   : > { %v3057_v26 = vpop.permute.xlu1 %3056  ;;  %v1979_v63 = vsel %vm1968_vm9, %v1946_v21, %v3053_v40  ;;  %v1980_v50 = vsel %vm1968_vm9, %v1947_v38, %v3054_v25 }
 0x124   : > { %v3059_v10 = vunpack.i.h.bf16 %v3057_v26  ;;  %v3058_v29 = vunpack.i.l.bf16 %v3057_v26  ;;  %v3062_v2 = vpop.permute.xlu0 %3061 }
 0x125   : > { %v3064_v20 = vunpack.i.h.bf16 %v3062_v2  ;;  %v3063_v62 = vunpack.i.l.bf16 %v3062_v2  ;;  %3346 = vrot.lane.b32.xlu1 %v3345_v31, %s3395_s22 }
 0x126   : > { %v2010_v16 = vsel %vm2001_vm10, %v1977_v3, %v3058_v29  ;;  %v2011_v58 = vsel %vm2001_vm10, %v1978_v19, %v3059_v10  ;;  %3351 = vrot.lane.b32.xlu0 %v4205_v45, %s3396_s24  ;;  %v2754_v45 = vunpack.i.h.bf16 %v3849_v4  ;;  %v3366_v4 = vld [vmem:[#allocation2 + $0x90] sm:$0xff] }
 0x127   : > { %v2038_v22 = vpack.c.bf16 %v2011_v58, %v2010_v16  ;;  %v2012_v12 = vsel %vm2001_vm10, %v1979_v63, %v3063_v62  ;;  %v2013_v55 = vsel %vm2001_vm10, %v1980_v50, %v3064_v20  ;;  %v3067_v8 = vpop.permute.xlu1 %3066  ;;  %v1783_v17 = vsel %vm237_vm0, %v3366_v4, %v2753_v54 }
 0x128   : > { %v2039_v42 = vpack.c.bf16 %v2013_v55, %v2012_v12  ;;  %v3072_v24 = vpop.permute.xlu0 %3071  ;;  %v1784_v49 = vsel %vm237_vm0, %v3365_v7, %v2754_v45  ;;  %v3069_v9 = vunpack.i.h.bf16 %v3067_v8  ;;  %v3068_v32 = vunpack.i.l.bf16 %v3067_v8 }
 0x129   : > { %3356 = vrot.lane.b32.xlu1 %v3355_v56, %s3396_s24  ;;  %2667 = vmatprep.mubr.msk.bf16.mxu0 %vm2086_vm11, %v2038_v22  ;;  %v2838_v56 = vunpack.i.l.bf16 %v3918_v14  ;;  %v3074_v52 = vunpack.i.h.bf16 %v3072_v24  ;;  %v3073_v51 = vunpack.i.l.bf16 %v3072_v24  ;;  %v3368_v14 = vld [vmem:[#allocation2 + $0xa8] sm:$0xff]  ;;  %v1816_v53 = vsel %vm1803_vm4, %v1783_v17, %v2833_v44 }
 0x12a   : > { %2668 = vmatmul.mubr.msk.bf16.gmra.mrb[8].mxu0 %vm2086_vm11, %v2039_v42  ;;  %v1785_v0 = vsel %vm237_vm0, %v3368_v14, %v2758_v48  ;;  %v1817_v11 = vsel %vm1803_vm4, %v1784_v49, %v2834_v60  ;;  %v1849_v28 = vsel %vm1836_vm5, %v1816_v53, %v2913_v57  ;;  %v1852_v41 = vsel %vm1836_vm5, %v1819_v13, %v3069_v9  ;;  %v4668_v53 = vld [vmem:[#allocation9_spill] sm:$0xff] }
 0x12b   : > { %v4276_v31 = vpop.permute.xlu1 %3076  ;;  %v1818_v37 = vsel %vm1803_vm4, %v1785_v0, %v2838_v56  ;;  %v1850_v46 = vsel %vm1836_vm5, %v1817_v11, %v2914_v1  ;;  %v1882_v43 = vsel %vm1869_vm6, %v1849_v28, %v3073_v51  ;;  %v2764_v9 = vunpack.i.h.bf16 %v3857_v35 }
 0x12c   : > { %v3082_v6 = vpop.permute.xlu0 %3081  ;;  %v3078_v34 = vunpack.i.l.bf16 %v4276_v31  ;;  %v1851_v5 = vsel %vm1836_vm5, %v1818_v37, %v3068_v32  ;;  %v1883_v39 = vsel %vm1869_vm6, %v1850_v46, %v3074_v52  ;;  %v3079_v26 = vunpack.i.h.bf16 %v4276_v31  ;;  %v4667_v52 = vld [vmem:[#allocation3_spill] sm:$0xff]  ;;  %v4669_v37 = vld [vmem:[#allocation10_spill] sm:$0xff] }
 0x12d   : > { %v3084_v36 = vunpack.i.h.bf16 %v3082_v6  ;;  %v3083_v15 = vunpack.i.l.bf16 %v3082_v6  ;;  %v2763_v32 = vunpack.i.l.bf16 %v3857_v35  ;;  %v2769_v51 = vunpack.i.h.bf16 %v4667_v52  ;;  %v3369_v46 = vld [vmem:[#allocation2 + $0xc8] sm:$0xff] }
 0x12e   : > { %v1884_v62 = vsel %vm1869_vm6, %v1851_v5, %v3078_v34  ;;  %v1885_v42 = vsel %vm1869_vm6, %v1852_v41, %v3079_v26  ;;  %v2768_v0 = vunpack.i.l.bf16 %v4667_v52  ;;  %v2844_v11 = vunpack.i.h.bf16 %v4668_v53 }
 0x12f   : > { %v3087_v18 = vpop.permute.xlu1 %3086  ;;  %v1915_v29 = vsel %vm1902_vm7, %v1882_v43, %v3083_v15  ;;  %v1916_v2 = vsel %vm1902_vm7, %v1883_v39, %v3084_v36  ;;  %v2843_v13 = vunpack.i.l.bf16 %v4668_v53  ;;  %v2849_v28 = vunpack.i.h.bf16 %v4669_v37 }
 0x130   : > { %v3092_v47 = vpop.permute.xlu0 %3091  ;;  %v3088_v21 = vunpack.i.l.bf16 %v3087_v18  ;;  %v3089_v3 = vunpack.i.h.bf16 %v3087_v18  ;;  %v2848_v36 = vunpack.i.l.bf16 %v4669_v37  ;;  %v1788_v34 = vsel %vm237_vm0, %v3369_v46, %v2764_v9 }
 0x131   : > { %v3094_v27 = vunpack.i.h.bf16 %v3092_v47  ;;  %v3093_v25 = vunpack.i.l.bf16 %v3092_v47 }
 0x132   : > { %v1917_v24 = vsel %vm1902_vm7, %v1884_v62, %v3088_v21  ;;  %v1918_v54 = vsel %vm1902_vm7, %v1885_v42, %v3089_v3 }
 0x133   : > { %v3097_v23 = vpop.permute.xlu1 %3096  ;;  %v1948_v63 = vsel %vm1935_vm8, %v1915_v29, %v3093_v25  ;;  %v1949_v50 = vsel %vm1935_vm8, %v1916_v2, %v3094_v27  ;;  %v3370_v27 = vld [vmem:[#allocation2 + $0xc0] sm:$0xff]  ;;  %v4670_v25 = vld [vmem:[#allocation8_spill] sm:$0xff]  ;;  %v1821_v2 = vsel %vm1803_vm4, %v1788_v34, %v2844_v11 }
 0x134   : > { %v3102_v40 = vpop.permute.xlu0 %3101  ;;  %v3098_v19 = vunpack.i.l.bf16 %v3097_v23  ;;  %v3099_v16 = vunpack.i.h.bf16 %v3097_v23  ;;  %v1787_v35 = vsel %vm237_vm0, %v3370_v27, %v2763_v32 }
 0x135   : > { %v3104_v38 = vunpack.i.h.bf16 %v3102_v40  ;;  %v3103_v10 = vunpack.i.l.bf16 %v3102_v40  ;;  %v1790_v40 = vsel %vm237_vm0, %v4670_v25, %v2769_v51  ;;  %v1820_v29 = vsel %vm1803_vm4, %v1787_v35, %v2843_v13 }
 0x136   : > { %v1950_v30 = vsel %vm1935_vm8, %v1917_v24, %v3098_v19  ;;  %v1951_v44 = vsel %vm1935_vm8, %v1918_v54, %v3099_v16  ;;  %v1823_v3 = vsel %vm1803_vm4, %v1790_v40, %v2849_v28 }
 0x137   : > { %v3107_v20 = vpop.permute.xlu1 %3106  ;;  %v1981_v31 = vsel %vm1968_vm9, %v1948_v63, %v3103_v10  ;;  %v1982_v45 = vsel %vm1968_vm9, %v1949_v50, %v3104_v38  ;;  %v3371_v38 = vld [vmem:[#allocation2 + $0xd8] sm:$0xff] }
 0x138   : > { %v3112_v58 = vpop.permute.xlu0 %3111  ;;  %v3109_v22 = vunpack.i.h.bf16 %v3107_v20  ;;  %v3108_v12 = vunpack.i.l.bf16 %v3107_v20  ;;  %v1789_v10 = vsel %vm237_vm0, %v3371_v38, %v2768_v0 }
 0x139   : > { %v3114_v55 = vunpack.i.h.bf16 %v3112_v58  ;;  %v3113_v8 = vunpack.i.l.bf16 %v3112_v58  ;;  %v1822_v19 = vsel %vm1803_vm4, %v1789_v10, %v2848_v36 }
 0x13a   : > { %v1983_v7 = vsel %vm1968_vm9, %v1950_v30, %v3108_v12  ;;  %v1984_v49 = vsel %vm1968_vm9, %v1951_v44, %v3109_v22 }
 0x13b   : > { %v2014_v6 = vsel %vm2001_vm10, %v1981_v31, %v3113_v8  ;;  %v2015_v48 = vsel %vm2001_vm10, %v1982_v45, %v3114_v55  ;;  %v3117_v60 = vpop.permute.xlu1 %3116 }
 0x13c   : > { %v2040_v59 = vpack.c.bf16 %v2015_v48, %v2014_v6  ;;  %v3119_v56 = vunpack.i.h.bf16 %v3117_v60  ;;  %v3118_v57 = vunpack.i.l.bf16 %v3117_v60  ;;  %v3122_v18 = vpop.permute.xlu0 %3121 }
 0x13d   : > { %v3123_v15 = vunpack.i.l.bf16 %v3122_v18  ;;  %v3124_v5 = vunpack.i.h.bf16 %v3122_v18 }
 0x13e   : > { %v2016_v4 = vsel %vm2001_vm10, %v1983_v7, %v3118_v57  ;;  %v2017_v17 = vsel %vm2001_vm10, %v1984_v49, %v3119_v56  ;;  %2671 = vmatprep.mubr.msk.bf16.mxu0 %vm2086_vm11, %v2040_v59 }
 0x13f   : > { %v2041_v33 = vpack.c.bf16 %v2017_v17, %v2016_v4  ;;  %v3127_v61 = vpop.permute.xlu1 %3126  ;;  %v1853_v20 = vsel %vm1836_vm5, %v1820_v29, %v3123_v15  ;;  %v1854_v16 = vsel %vm1836_vm5, %v1821_v2, %v3124_v5  ;;  %v4673_v29 = vld [vmem:[#allocation11_spill] sm:$0xff] }
 0x140   : > { %v3132_v1 = vpop.permute.xlu0 %3131  ;;  %v3129_v43 = vunpack.i.h.bf16 %v3127_v61  ;;  %v3128_v39 = vunpack.i.l.bf16 %v3127_v61  ;;  %v2854_v2 = vunpack.i.h.bf16 %v4673_v29 }
 0x141   : > { %2672 = vmatmul.mubr.msk.bf16.gmra.mrb[12].mxu0 %vm2086_vm11, %v2041_v33  ;;  %v3134_v26 = vunpack.i.h.bf16 %v3132_v1  ;;  %v3133_v21 = vunpack.i.l.bf16 %v3132_v1 }
 0x142   : > { %v1855_v8 = vsel %vm1836_vm5, %v1822_v19, %v3128_v39  ;;  %v1856_v42 = vsel %vm1836_vm5, %v1823_v3, %v3129_v43  ;;  %v2853_v3 = vunpack.i.l.bf16 %v4673_v29  ;;  %v4674_v19 = vld [vmem:[#allocation12_spill] sm:$0xff] }
 0x143   : > { %v3137_v47 = vpop.permute.xlu1 %3136  ;;  %v1886_v24 = vsel %vm1869_vm6, %v1853_v20, %v3133_v21  ;;  %v1887_v31 = vsel %vm1869_vm6, %v1854_v16, %v3134_v26  ;;  %v4672_v26 = vld [vmem:[#allocation5_spill] sm:$0xff]  ;;  %v2859_v20 = vunpack.i.h.bf16 %v4674_v19  ;;  %v3372_v16 = vld [vmem:[#allocation2 + $0xf8] sm:$0xff] }
 0x144   : > { %v3142_v14 = vpop.permute.xlu0 %3141  ;;  %v3138_v58 = vunpack.i.l.bf16 %v3137_v47  ;;  %v3139_v45 = vunpack.i.h.bf16 %v3137_v47  ;;  %v2779_v21 = vunpack.i.h.bf16 %v4672_v26  ;;  %v2778_v10 = vunpack.i.l.bf16 %v4672_v26 }
 0x145   : > { %v3144_v62 = vunpack.i.h.bf16 %v3142_v14  ;;  %v3143_v63 = vunpack.i.l.bf16 %v3142_v14 }
 0x146   : > { %v1888_v57 = vsel %vm1869_vm6, %v1855_v8, %v3138_v58  ;;  %v1889_v47 = vsel %vm1869_vm6, %v1856_v42, %v3139_v45 }
 0x147   : > { %v3147_v23 = vpop.permute.xlu1 %3146  ;;  %v1919_v48 = vsel %vm1902_vm7, %v1886_v24, %v3143_v63  ;;  %v1920_v60 = vsel %vm1902_vm7, %v1887_v31, %v3144_v62  ;;  %v2858_v62 = vunpack.i.l.bf16 %v4674_v19 }
 0x148   : > { %v3152_v41 = vpop.permute.xlu0 %3151  ;;  %v3148_v54 = vunpack.i.l.bf16 %v3147_v23  ;;  %v3149_v44 = vunpack.i.h.bf16 %v3147_v23 }
 0x149   : > { %v3154_v22 = vunpack.i.h.bf16 %v3152_v41  ;;  %v3153_v12 = vunpack.i.l.bf16 %v3152_v41  ;;  %v4671_v41 = vld [vmem:[#allocation4_spill] sm:$0xff] }
 0x14a   : > { %v1921_v9 = vsel %vm1902_vm7, %v1888_v57, %v3148_v54  ;;  %v1922_v51 = vsel %vm1902_vm7, %v1889_v47, %v3149_v44  ;;  %v2774_v43 = vunpack.i.h.bf16 %v4671_v41  ;;  %v2773_v39 = vunpack.i.l.bf16 %v4671_v41 }
 0x14b   : > { %v3157_v50 = vpop.permute.xlu1 %3156  ;;  %v1952_v18 = vsel %vm1935_vm8, %v1919_v48, %v3153_v12  ;;  %v1953_v7 = vsel %vm1935_vm8, %v1920_v60, %v3154_v22  ;;  %v3373_v22 = vld [vmem:[#allocation2 + $0xf0] sm:$0xff] }
 0x14c   : > { %v3162_v55 = vpop.permute.xlu0 %3161  ;;  %v3158_v59 = vunpack.i.l.bf16 %v3157_v50  ;;  %v3159_v49 = vunpack.i.h.bf16 %v3157_v50  ;;  %v1792_v58 = vsel %vm237_vm0, %v3372_v16, %v2774_v43  ;;  %v1791_v12 = vsel %vm237_vm0, %v3373_v22, %v2773_v39 }
 0x14d   : > { %v3164_v30 = vunpack.i.h.bf16 %v3162_v55  ;;  %v3163_v6 = vunpack.i.l.bf16 %v3162_v55  ;;  %v3374_v55 = vld [vmem:[#allocation2 + $0x110] sm:$0xff]  ;;  %v1824_v60 = vsel %vm1803_vm4, %v1791_v12, %v2853_v3  ;;  %v1825_v44 = vsel %vm1803_vm4, %v1792_v58, %v2854_v2 }
 0x14e   : > { %v1954_v14 = vsel %vm1935_vm8, %v1921_v9, %v3158_v59  ;;  %v1955_v13 = vsel %vm1935_vm8, %v1922_v51, %v3159_v49  ;;  %v1794_v8 = vsel %vm237_vm0, %v3374_v55, %v2779_v21 }
 0x14f   : > { %v3167_v56 = vpop.permute.xlu1 %3166  ;;  %v1985_v32 = vsel %vm1968_vm9, %v1952_v18, %v3163_v6  ;;  %v1986_v52 = vsel %vm1968_vm9, %v1953_v7, %v3164_v30  ;;  %v3375_v6 = vld [vmem:[#allocation2 + $0x108] sm:$0xff]  ;;  %v1827_v59 = vsel %vm1803_vm4, %v1794_v8, %v2859_v20 }
 0x150   : > { %v3172_v4 = vpop.permute.xlu0 %3171  ;;  %v3169_v17 = vunpack.i.h.bf16 %v3167_v56  ;;  %v3168_v33 = vunpack.i.l.bf16 %v3167_v56  ;;  %v1793_v48 = vsel %vm237_vm0, %v3375_v6, %v2778_v10 }
 0x151   : > { %v3174_v61 = vunpack.i.h.bf16 %v3172_v4  ;;  %v3173_v1 = vunpack.i.l.bf16 %v3172_v4  ;;  %v1826_v56 = vsel %vm1803_vm4, %v1793_v48, %v2858_v62 }
 0x152   : > { %v1987_v23 = vsel %vm1968_vm9, %v1954_v14, %v3168_v33  ;;  %v1988_v46 = vsel %vm1968_vm9, %v1955_v13, %v3169_v17 }
 0x153   : > { %v3177_v0 = vpop.permute.xlu1 %3176  ;;  %v2018_v53 = vsel %vm2001_vm10, %v1985_v32, %v3173_v1  ;;  %v2019_v11 = vsel %vm2001_vm10, %v1986_v52, %v3174_v61 }
 0x154   : > { %v3179_v37 = vunpack.i.h.bf16 %v3177_v0  ;;  %v3178_v28 = vunpack.i.l.bf16 %v3177_v0  ;;  %v3182_v36 = vpop.permute.xlu0 %3181  ;;  %v2042_v15 = vpack.c.bf16 %v2019_v11, %v2018_v53 }
 0x155   : > { %v3183_v63 = vunpack.i.l.bf16 %v3182_v36  ;;  %v3184_v42 = vunpack.i.h.bf16 %v3182_v36 }
 0x156   : > { %v2020_v34 = vsel %vm2001_vm10, %v1987_v23, %v3178_v28  ;;  %v2021_v27 = vsel %vm2001_vm10, %v1988_v46, %v3179_v37  ;;  %2675 = vmatprep.mubr.msk.bf16.mxu1 %vm2086_vm11, %v2042_v15 }
 0x157   : > { %v2043_v35 = vpack.c.bf16 %v2021_v27, %v2020_v34  ;;  %v3187_v25 = vpop.permute.xlu1 %3186  ;;  %v1857_v57 = vsel %vm1836_vm5, %v1824_v60, %v3183_v63  ;;  %v1858_v4 = vsel %vm1836_vm5, %v1825_v44, %v3184_v42  ;;  %v4677_v60 = vld [vmem:[#allocation13_spill] sm:$0xff] }
 0x158   : > { %v3192_v40 = vpop.permute.xlu0 %3191  ;;  %v3189_v31 = vunpack.i.h.bf16 %v3187_v25  ;;  %v3188_v45 = vunpack.i.l.bf16 %v3187_v25  ;;  %v2864_v44 = vunpack.i.h.bf16 %v4677_v60 }
 0x159   : > { %2676 = vmatmul.mubr.msk.bf16.vlgmr.msra.gmra.mrb[0].mxu1 %vm2086_vm11, %v2043_v35  ;;  %v3194_v54 = vunpack.i.h.bf16 %v3192_v40  ;;  %v3193_v30 = vunpack.i.l.bf16 %v3192_v40 }
 0x15a   : > { %v1859_v47 = vsel %vm1836_vm5, %v1826_v56, %v3188_v45  ;;  %v1860_v9 = vsel %vm1836_vm5, %v1827_v59, %v3189_v31  ;;  %v2863_v59 = vunpack.i.l.bf16 %v4677_v60  ;;  %v4678_v56 = vld [vmem:[#allocation14_spill] sm:$0xff] }
 0x15b   : > { %v4367_v5 = vpop.permute.xlu1 %3196  ;;  %v1890_v32 = vsel %vm1869_vm6, %v1857_v57, %v3193_v30  ;;  %v1891_v52 = vsel %vm1869_vm6, %v1858_v4, %v3194_v54  ;;  %v4676_v54 = vld [vmem:[#allocation7_spill] sm:$0xff]  ;;  %v2869_v57 = vunpack.i.h.bf16 %v4678_v56  ;;  %v3376_v4 = vld [vmem:[#allocation2 + $0x128] sm:$0xff] }
 0x15c   : > { %v3202_v38 = vpop.permute.xlu0 %3201  ;;  %v3198_v17 = vunpack.i.l.bf16 %v4367_v5  ;;  %v3199_v51 = vunpack.i.h.bf16 %v4367_v5  ;;  %v2789_v30 = vunpack.i.h.bf16 %v4676_v54  ;;  %v2788_v48 = vunpack.i.l.bf16 %v4676_v54 }
 0x15d   : > { %v3204_v18 = vunpack.i.h.bf16 %v3202_v38  ;;  %v3203_v7 = vunpack.i.l.bf16 %v3202_v38 }
 0x15e   : > { %v1892_v15 = vsel %vm1869_vm6, %v1859_v47, %v3198_v17  ;;  %v1893_v41 = vsel %vm1869_vm6, %v1860_v9, %v3199_v51 }
 0x15f   : > { %v3207_v50 = vpop.permute.xlu1 %3206  ;;  %v1923_v11 = vsel %vm1902_vm7, %v1890_v32, %v3203_v7  ;;  %v1924_v13 = vsel %vm1902_vm7, %v1891_v52, %v3204_v18  ;;  %v2868_v18 = vunpack.i.l.bf16 %v4678_v56 }
 0x160   : > { %v3212_v24 = vpop.permute.xlu0 %3211  ;;  %v3208_v14 = vunpack.i.l.bf16 %v3207_v50  ;;  %v3209_v37 = vunpack.i.h.bf16 %v3207_v50 }
 0x161   : > { %v3214_v33 = vunpack.i.h.bf16 %v3212_v24  ;;  %v3213_v61 = vunpack.i.l.bf16 %v3212_v24  ;;  %v4675_v24 = vld [vmem:[#allocation6_spill] sm:$0xff] }
 0x162   : > { %v1925_v43 = vsel %vm1902_vm7, %v1892_v15, %v3208_v14  ;;  %v1926_v21 = vsel %vm1902_vm7, %v1893_v41, %v3209_v37  ;;  %v2784_v31 = vunpack.i.h.bf16 %v4675_v24  ;;  %v2783_v45 = vunpack.i.l.bf16 %v4675_v24 }
 0x163   : > { %v3217_v49 = vpop.permute.xlu1 %3216  ;;  %v1956_v23 = vsel %vm1935_vm8, %v1923_v11, %v3213_v61  ;;  %v1957_v46 = vsel %vm1935_vm8, %v1924_v13, %v3214_v33  ;;  %v3377_v33 = vld [vmem:[#allocation2 + $0x120] sm:$0xff] }
 0x164   : > { %v3222_v1 = vpop.permute.xlu0 %3221  ;;  %v3218_v28 = vunpack.i.l.bf16 %v3217_v49  ;;  %v3219_v34 = vunpack.i.h.bf16 %v3217_v49  ;;  %v1796_v17 = vsel %vm237_vm0, %v3376_v4, %v2784_v31  ;;  %v1795_v61 = vsel %vm237_vm0, %v3377_v33, %v2783_v45 }
 0x165   : > { %v3224_v0 = vunpack.i.h.bf16 %v3222_v1  ;;  %v3223_v53 = vunpack.i.l.bf16 %v3222_v1  ;;  %v3378_v1 = vld [vmem:[#allocation2 + $0x140] sm:$0xff]  ;;  %v1828_v13 = vsel %vm1803_vm4, %v1795_v61, %v2863_v59  ;;  %v1829_v37 = vsel %vm1803_vm4, %v1796_v17, %v2864_v44 }
 0x166   : > { %v1958_v38 = vsel %vm1935_vm8, %v1925_v43, %v3218_v28  ;;  %v1959_v3 = vsel %vm1935_vm8, %v1926_v21, %v3219_v34  ;;  %v1798_v47 = vsel %vm237_vm0, %v3378_v1, %v2789_v30 }
 0x167   : > { %v3227_v36 = vpop.permute.xlu1 %3226  ;;  %v1989_v39 = vsel %vm1968_vm9, %v1956_v23, %v3223_v53  ;;  %v1990_v26 = vsel %vm1968_vm9, %v1957_v46, %v3224_v0  ;;  %v3379_v53 = vld [vmem:[#allocation2 + $0x138] sm:$0xff]  ;;  %v1831_v28 = vsel %vm1803_vm4, %v1798_v47, %v2869_v57 }
 0x168   : > { %v3232_v27 = vpop.permute.xlu0 %3231  ;;  %v3229_v35 = vunpack.i.h.bf16 %v3227_v36  ;;  %v3228_v25 = vunpack.i.l.bf16 %v3227_v36  ;;  %v1797_v11 = vsel %vm237_vm0, %v3379_v53, %v2788_v48 }
 0x169   : > { %v3234_v40 = vunpack.i.h.bf16 %v3232_v27  ;;  %v3233_v5 = vunpack.i.l.bf16 %v3232_v27  ;;  %v1830_v36 = vsel %vm1803_vm4, %v1797_v11, %v2868_v18 }
 0x16a   : > { %v1991_v50 = vsel %vm1968_vm9, %v1958_v38, %v3228_v25  ;;  %v1992_v16 = vsel %vm1968_vm9, %v1959_v3, %v3229_v35 }
 0x16b   : > { %v2022_v10 = vsel %vm2001_vm10, %v1989_v39, %v3233_v5  ;;  %v2023_v29 = vsel %vm2001_vm10, %v1990_v26, %v3234_v40  ;;  %v3237_v2 = vpop.permute.xlu1 %3236 }
 0x16c   : > { %v2044_v19 = vpack.c.bf16 %v2023_v29, %v2022_v10  ;;  %v3239_v20 = vunpack.i.h.bf16 %v3237_v2  ;;  %v3238_v62 = vunpack.i.l.bf16 %v3237_v2  ;;  %v3242_v63 = vpop.permute.xlu0 %3241 }
 0x16d   : > { %v3243_v7 = vunpack.i.l.bf16 %v3242_v63  ;;  %v3244_v9 = vunpack.i.h.bf16 %v3242_v63 }
 0x16e   : > { %v2024_v58 = vsel %vm2001_vm10, %v1991_v50, %v3238_v62  ;;  %v2025_v22 = vsel %vm2001_vm10, %v1992_v16, %v3239_v20  ;;  %2679 = vmatprep.mubr.msk.bf16.mxu1 %vm2086_vm11, %v2044_v19 }
 0x16f   : > { %v2045_v12 = vpack.c.bf16 %v2025_v22, %v2024_v58  ;;  %v3247_v55 = vpop.permute.xlu1 %3246  ;;  %v1861_v15 = vsel %vm1836_vm5, %v1828_v13, %v3243_v7  ;;  %v1862_v27 = vsel %vm1836_vm5, %v1829_v37, %v3244_v9 }
 0x170   : > { %v3252_v8 = vpop.permute.xlu0 %3251  ;;  %v3249_v52 = vunpack.i.h.bf16 %v3247_v55  ;;  %v3248_v51 = vunpack.i.l.bf16 %v3247_v55 }
 0x171   : > { %2680 = vmatmul.mubr.msk.bf16.gmra.mrb[4].mxu1 %vm2086_vm11, %v2045_v12  ;;  %v3254_v14 = vunpack.i.h.bf16 %v3252_v8  ;;  %v3253_v0 = vunpack.i.l.bf16 %v3252_v8 }
 0x172   : > { %v1863_v41 = vsel %vm1836_vm5, %v1830_v36, %v3248_v51  ;;  %v1864_v43 = vsel %vm1836_vm5, %v1831_v28, %v3249_v52  ;;  %v4679_v28 = vld [vmem:[#allocation15_spill] sm:$0xff] }
 0x173   : > { %v4413_v42 = vpop.permute.xlu1 %3256  ;;  %v1894_v39 = vsel %vm1869_vm6, %v1861_v15, %v3253_v0  ;;  %v1895_v26 = vsel %vm1869_vm6, %v1862_v27, %v3254_v14 }
 0x174   : > { %v3262_v6 = vpop.permute.xlu0 %3261  ;;  %v3258_v35 = vunpack.i.l.bf16 %v4413_v42  ;;  %v3259_v21 = vunpack.i.h.bf16 %v4413_v42 }
 0x175   : > { %v3264_v23 = vunpack.i.h.bf16 %v3262_v6  ;;  %v3263_v46 = vunpack.i.l.bf16 %v3262_v6 }
 0x176   : > { %v1896_v63 = vsel %vm1869_vm6, %v1863_v41, %v3258_v35  ;;  %v1897_v24 = vsel %vm1869_vm6, %v1864_v43, %v3259_v21  ;;  %v4681_v41 = vld [vmem:[#allocation18_spill] sm:$0xff] }
 0x177   : > { %v3267_v49 = vpop.permute.xlu1 %3266  ;;  %v1927_v2 = vsel %vm1902_vm7, %v1894_v39, %v3263_v46  ;;  %v1928_v3 = vsel %vm1902_vm7, %v1895_v26, %v3264_v23  ;;  %v4682_v39 = vld [vmem:[#allocation17_spill] sm:$0xff] }
 0x178   : > { %v3272_v32 = vpop.permute.xlu0 %3271  ;;  %v3268_v38 = vunpack.i.l.bf16 %v3267_v49  ;;  %v3269_v19 = vunpack.i.h.bf16 %v3267_v49 }
 0x179   : > { %v3274_v25 = vunpack.i.h.bf16 %v3272_v32  ;;  %v3273_v40 = vunpack.i.l.bf16 %v3272_v32 }
 0x17a   : > { %v1929_v31 = vsel %vm1902_vm7, %v1896_v63, %v3268_v38  ;;  %v1930_v30 = vsel %vm1902_vm7, %v1897_v24, %v3269_v19 }
 0x17b   : > { %v3277_v34 = vpop.permute.xlu1 %3276  ;;  %v1960_v50 = vsel %vm1935_vm8, %v1927_v2, %v3273_v40  ;;  %v1961_v16 = vsel %vm1935_vm8, %v1928_v3, %v3274_v25 }
 0x17c   : > { %v3282_v5 = vpop.permute.xlu0 %3281  ;;  %v3278_v20 = vunpack.i.l.bf16 %v3277_v34  ;;  %v3279_v58 = vunpack.i.h.bf16 %v3277_v34  ;;  %v4680_v34 = vld [vmem:[#allocation16_spill] sm:$0xff] }
 0x17d   : > { %v3284_v10 = vunpack.i.h.bf16 %v3282_v5  ;;  %v3283_v29 = vunpack.i.l.bf16 %v3282_v5 }
 0x17e   : > { %v1962_v6 = vsel %vm1935_vm8, %v1929_v31, %v3278_v20  ;;  %v1963_v59 = vsel %vm1935_vm8, %v1930_v30, %v3279_v58 }
 0x17f   : > { %v3287_v62 = vpop.permute.xlu1 %3286  ;;  %v1993_v45 = vsel %vm1968_vm9, %v1960_v50, %v3283_v29  ;;  %v1994_v54 = vsel %vm1968_vm9, %v1961_v16, %v3284_v10 }
 0x180   : > { %v3292_v22 = vpop.permute.xlu0 %3291  ;;  %v3289_v12 = vunpack.i.h.bf16 %v3287_v62  ;;  %v3288_v55 = vunpack.i.l.bf16 %v3287_v62 }
 0x181   : > { %v3294_v8 = vunpack.i.h.bf16 %v3292_v22  ;;  %v3293_v42 = vunpack.i.l.bf16 %v3292_v22 }
 0x182   : > { %v1995_v49 = vsel %vm1968_vm9, %v1962_v6, %v3288_v55  ;;  %v1996_v4 = vsel %vm1968_vm9, %v1963_v59, %v3289_v12 }
 0x183   : > { %v2026_v48 = vsel %vm2001_vm10, %v1993_v45, %v3293_v42  ;;  %v2027_v60 = vsel %vm2001_vm10, %v1994_v54, %v3294_v8  ;;  %v3297_v44 = vpop.permute.xlu1 %3296 }
 0x184   : > { %v2046_v56 = vpack.c.bf16 %v2027_v60, %v2026_v48  ;;  %v3299_v57 = vunpack.i.h.bf16 %v3297_v44  ;;  %v3298_v18 = vunpack.i.l.bf16 %v3297_v44  ;;  %v3302_v7 = vpop.permute.xlu0 %3301 }
 0x185   : > { %v3303_v52 = vunpack.i.l.bf16 %v3302_v7  ;;  %v3304_v14 = vunpack.i.h.bf16 %v3302_v7 }
 0x186   : > { %v2028_v17 = vsel %vm2001_vm10, %v1995_v49, %v3298_v18  ;;  %v2029_v33 = vsel %vm2001_vm10, %v1996_v4, %v3299_v57  ;;  %2683 = vmatprep.mubr.msk.bf16.mxu1 %vm2086_vm11, %v2046_v56 }
 0x187   : > { %v2047_v61 = vpack.c.bf16 %v2029_v33, %v2028_v17  ;;  %v3307_v1 = vpop.permute.xlu1 %3306  ;;  %v1865_v36 = vsel %vm1836_vm5, %v4679_v28, %v3303_v52  ;;  %v1866_v27 = vsel %vm1836_vm5, %v4680_v34, %v3304_v14 }
 0x188   : > { %v3312_v47 = vpop.permute.xlu0 %3311  ;;  %v3309_v53 = vunpack.i.h.bf16 %v3307_v1  ;;  %v3308_v11 = vunpack.i.l.bf16 %v3307_v1 }
 0x189   : > { %2684 = vmatmul.mubr.msk.bf16.gmra.mrb[8].mxu1 %vm2086_vm11, %v2047_v61  ;;  %v3314_v13 = vunpack.i.h.bf16 %v3312_v47  ;;  %v3313_v37 = vunpack.i.l.bf16 %v3312_v47 }
 0x18a   : > { %v1867_v43 = vsel %vm1836_vm5, %v4681_v41, %v3308_v11  ;;  %v1868_v26 = vsel %vm1836_vm5, %v4682_v39, %v3309_v53 }
 0x18b   : > { %v3317_v9 = vpop.permute.xlu1 %3316  ;;  %v1898_v21 = vsel %vm1869_vm6, %v1865_v36, %v3313_v37  ;;  %v1899_v38 = vsel %vm1869_vm6, %v1866_v27, %v3314_v13 }
 0x18c   : > { %v3322_v32 = vpop.permute.xlu0 %3321  ;;  %v3318_v35 = vunpack.i.l.bf16 %v3317_v9  ;;  %v3319_v10 = vunpack.i.h.bf16 %v3317_v9 }
 0x18d   : > { %v3324_v15 = vunpack.i.h.bf16 %v3322_v32  ;;  %v3323_v23 = vunpack.i.l.bf16 %v3322_v32 }
 0x18e   : > { %v1900_v16 = vsel %vm1869_vm6, %v1867_v43, %v3318_v35  ;;  %v1901_v45 = vsel %vm1869_vm6, %v1868_v26, %v3319_v10 }
 0x18f   : > { %v3327_v51 = vpop.permute.xlu1 %3326  ;;  %v1931_v19 = vsel %vm1902_vm7, %v1898_v21, %v3323_v23  ;;  %v1932_v20 = vsel %vm1902_vm7, %v1899_v38, %v3324_v15 }
 0x190   : > { %v3332_v0 = vpop.permute.xlu0 %3331  ;;  %v3328_v29 = vunpack.i.l.bf16 %v3327_v51  ;;  %v3329_v62 = vunpack.i.h.bf16 %v3327_v51 }
 0x191   : > { %v3334_v25 = vunpack.i.h.bf16 %v3332_v0  ;;  %v3333_v40 = vunpack.i.l.bf16 %v3332_v0 }
 0x192   : > { %v1933_v54 = vsel %vm1902_vm7, %v1900_v16, %v3328_v29  ;;  %v1934_v48 = vsel %vm1902_vm7, %v1901_v45, %v3329_v62 }
 0x193   : > { %v3337_v46 = vpop.permute.xlu1 %3336  ;;  %v1964_v58 = vsel %vm1935_vm8, %v1931_v19, %v3333_v40  ;;  %v1965_v22 = vsel %vm1935_vm8, %v1932_v20, %v3334_v25 }
 0x194   : > { %v3342_v5 = vpop.permute.xlu0 %3341  ;;  %v3338_v63 = vunpack.i.l.bf16 %v3337_v46  ;;  %v3339_v12 = vunpack.i.h.bf16 %v3337_v46 }
 0x195   : > { %v3344_v2 = vunpack.i.h.bf16 %v3342_v5  ;;  %v3343_v3 = vunpack.i.l.bf16 %v3342_v5 }
 0x196   : > { %v1966_v60 = vsel %vm1935_vm8, %v1933_v54, %v3338_v63  ;;  %v1967_v57 = vsel %vm1935_vm8, %v1934_v48, %v3339_v12 }
 0x197   : > { %v3347_v50 = vpop.permute.xlu1 %3346  ;;  %v1997_v30 = vsel %vm1968_vm9, %v1964_v58, %v3343_v3  ;;  %v1998_v6 = vsel %vm1968_vm9, %v1965_v22, %v3344_v2 }
 0x198   : > { %v3352_v55 = vpop.permute.xlu0 %3351  ;;  %v3349_v8 = vunpack.i.h.bf16 %v3347_v50  ;;  %v3348_v42 = vunpack.i.l.bf16 %v3347_v50 }
 0x199   : > { %v3354_v24 = vunpack.i.h.bf16 %v3352_v55  ;;  %v3353_v31 = vunpack.i.l.bf16 %v3352_v55 }
 0x19a   : > { %v1999_v4 = vsel %vm1968_vm9, %v1966_v60, %v3348_v42  ;;  %v2000_v17 = vsel %vm1968_vm9, %v1967_v57, %v3349_v8 }
 0x19b   : > { %v2030_v44 = vsel %vm2001_vm10, %v1997_v30, %v3353_v31  ;;  %v2031_v59 = vsel %vm2001_vm10, %v1998_v6, %v3354_v24  ;;  %v3357_v56 = vpop.permute.xlu1 %3356 }
 0x19c   : > { %v2048_v18 = vpack.c.bf16 %v2031_v59, %v2030_v44  ;;  %v3359_v7 = vunpack.i.h.bf16 %v3357_v56  ;;  %v3358_v49 = vunpack.i.l.bf16 %v3357_v56 }
 0x19e   : > { %v2032_v33 = vsel %vm2001_vm10, %v1999_v4, %v3358_v49  ;;  %v2033_v61 = vsel %vm2001_vm10, %v2000_v17, %v3359_v7  ;;  %2687 = vmatprep.mubr.msk.bf16.mxu1 %vm2086_vm11, %v2048_v18 }
 0x19f   : > { %v2049_v1 = vpack.c.bf16 %v2033_v61, %v2032_v33 }
 0x1a1   : > { %2688 = vmatmul.mubr.msk.bf16.gmra.mrb[12].mxu1 %vm2086_vm11, %v2049_v1 }
 0x1d5   : > { %v2661_v47 = vpop.f32.mrb[0].mxu0 }
 0x1d6   : > { %2475 = vst.msk [vmem:[%s4494_s27 + $0x10] sm:$0xff] %vm237_vm0, %v2661_v47  ;;  %v2173_v9 = vpop.f32.mrb[1].mxu0  ;;  %v2371_v14 = vmul.f32 %v2661_v47, %v2661_v47  ;;  %v2303_v37 = vsel %vm237_vm0, %v2661_v47, 0.0 }
 0x1d7   : > { %v2369_v32 = vmul.f32 %v2173_v9, %v2173_v9  ;;  %2473 = vst.msk [vmem:[%s4494_s27] sm:$0xff] %vm237_vm0, %v2173_v9  ;;  %v2662_v52 = vpop.f32.mrb[2].mxu0  ;;  %v2300_v0 = vsel %vm237_vm0, %v2173_v9, 0.0 }
 0x1d8   : > { %2476 = vst.msk [vmem:[%s4494_s27 + $0x18] sm:$0xff] %vm237_vm0, %v2662_v52  ;;  %v2176_v51 = vpop.f32.mrb[3].mxu0  ;;  %v2372_v36 = vmul.f32 %v2662_v52, %v2662_v52  ;;  %v2404_v34 = vsel %vm237_vm0, %v2371_v14, 0.0  ;;  %v2305_v27 = vsel %vm237_vm0, %v2662_v52, 0.0 }
 0x1d9   : > { %v2301_v53 = vsel %vm237_vm0, %v2176_v51, 0.0  ;;  %v2370_v11 = vmul.f32 %v2176_v51, %v2176_v51  ;;  %2474 = vst.msk [vmem:[%s4494_s27 + $0x8] sm:$0xff] %vm237_vm0, %v2176_v51  ;;  %v2401_v28 = vsel %vm237_vm0, %v2369_v32, 0.0 }
 0x1da   : > { %v2302_v13 = vadd.f32 %v2301_v53, %v2300_v0  ;;  %v2406_v40 = vsel %vm237_vm0, %v2372_v36, 0.0 }
 0x1db   : > { %v2402_v15 = vsel %vm237_vm0, %v2370_v11, 0.0 }
 0x1dc   : > { %v2304_v23 = vadd.f32 %v2303_v37, %v2302_v13  ;;  %v2403_v46 = vadd.f32 %v2402_v15, %v2401_v28 }
 0x1de   : > { %v2405_v35 = vadd.f32 %v2404_v34, %v2403_v46  ;;  %v2306_v25 = vadd.f32 %v2305_v27, %v2304_v23 }
 0x1e0   : > { %v2407_v5 = vadd.f32 %v2406_v40, %v2405_v35 }
 0x1e9   : > { %v2665_v41 = vpop.f32.mrb[4].mxu0 }
 0x1ea   : > { %2479 = vst.msk [vmem:[%s4494_s27 + $0x30] sm:$0xff] %vm237_vm0, %v2665_v41  ;;  %v2189_v43 = vpop.f32.mrb[5].mxu0  ;;  %v2375_v29 = vmul.f32 %v2665_v41, %v2665_v41  ;;  %v2311_v63 = vsel %vm237_vm0, %v2665_v41, 0.0 }
 0x1eb   : > { %v2307_v39 = vsel %vm237_vm0, %v2189_v43, 0.0  ;;  %v2373_v26 = vmul.f32 %v2189_v43, %v2189_v43  ;;  %2477 = vst.msk [vmem:[%s4494_s27 + $0x20] sm:$0xff] %vm237_vm0, %v2189_v43  ;;  %v2666_v21 = vpop.f32.mrb[6].mxu0 }
 0x1ec   : > { %v2308_v38 = vadd.f32 %v2307_v39, %v2306_v25  ;;  %2480 = vst.msk [vmem:[%s4494_s27 + $0x38] sm:$0xff] %vm237_vm0, %v2666_v21  ;;  %v2192_v10 = vpop.f32.mrb[7].mxu0  ;;  %v2376_v50 = vmul.f32 %v2666_v21, %v2666_v21  ;;  %v2412_v12 = vsel %vm237_vm0, %v2375_v29, 0.0  ;;  %v2313_v55 = vsel %vm237_vm0, %v2666_v21, 0.0 }
 0x1ed   : > { %v2408_v2 = vsel %vm237_vm0, %v2373_v26, 0.0  ;;  %v2309_v3 = vsel %vm237_vm0, %v2192_v10, 0.0  ;;  %v2374_v19 = vmul.f32 %v2192_v10, %v2192_v10  ;;  %2478 = vst.msk [vmem:[%s4494_s27 + $0x28] sm:$0xff] %vm237_vm0, %v2192_v10 }
 0x1ee   : > { %v2409_v20 = vadd.f32 %v2408_v2, %v2407_v5  ;;  %v2310_v62 = vadd.f32 %v2309_v3, %v2308_v38  ;;  %v2414_v24 = vsel %vm237_vm0, %v2376_v50, 0.0 }
 0x1ef   : > { %v2410_v16 = vsel %vm237_vm0, %v2374_v19, 0.0 }
 0x1f0   : > { %v2312_v58 = vadd.f32 %v2311_v63, %v2310_v62  ;;  %v2411_v22 = vadd.f32 %v2410_v16, %v2409_v20 }
 0x1f2   : > { %v2413_v8 = vadd.f32 %v2412_v12, %v2411_v22  ;;  %v2314_v42 = vadd.f32 %v2313_v55, %v2312_v58 }
 0x1f4   : > { %v2415_v31 = vadd.f32 %v2414_v24, %v2413_v8 }
 0x1fd   : > { %v2669_v45 = vpop.f32.mrb[8].mxu0 }
 0x1fe   : > { %2483 = vst.msk [vmem:[%s4494_s27 + $0x50] sm:$0xff] %vm237_vm0, %v2669_v45  ;;  %v2205_v54 = vpop.f32.mrb[9].mxu0  ;;  %v2379_v59 = vmul.f32 %v2669_v45, %v2669_v45  ;;  %v2319_v4 = vsel %vm237_vm0, %v2669_v45, 0.0 }
 0x1ff   : > { %v2315_v30 = vsel %vm237_vm0, %v2205_v54, 0.0  ;;  %v2377_v6 = vmul.f32 %v2205_v54, %v2205_v54  ;;  %2481 = vst.msk [vmem:[%s4494_s27 + $0x40] sm:$0xff] %vm237_vm0, %v2205_v54  ;;  %v2670_v48 = vpop.f32.mrb[10].mxu0 }
 0x200   : > { %v2316_v60 = vadd.f32 %v2315_v30, %v2314_v42  ;;  %2484 = vst.msk [vmem:[%s4494_s27 + $0x58] sm:$0xff] %vm237_vm0, %v2670_v48  ;;  %v2208_v44 = vpop.f32.mrb[11].mxu0  ;;  %v2380_v17 = vmul.f32 %v2670_v48, %v2670_v48  ;;  %v2420_v47 = vsel %vm237_vm0, %v2379_v59, 0.0  ;;  %v2321_v9 = vsel %vm237_vm0, %v2670_v48, 0.0 }
 0x201   : > { %v2416_v56 = vsel %vm237_vm0, %v2377_v6, 0.0  ;;  %v2317_v57 = vsel %vm237_vm0, %v2208_v44, 0.0  ;;  %v2378_v18 = vmul.f32 %v2208_v44, %v2208_v44  ;;  %2482 = vst.msk [vmem:[%s4494_s27 + $0x48] sm:$0xff] %vm237_vm0, %v2208_v44 }
 0x202   : > { %v2417_v7 = vadd.f32 %v2416_v56, %v2415_v31  ;;  %v2318_v49 = vadd.f32 %v2317_v57, %v2316_v60  ;;  %v2422_v51 = vsel %vm237_vm0, %v2380_v17, 0.0 }
 0x203   : > { %v2418_v33 = vsel %vm237_vm0, %v2378_v18, 0.0 }
 0x204   : > { %v2320_v61 = vadd.f32 %v2319_v4, %v2318_v49  ;;  %v2419_v1 = vadd.f32 %v2418_v33, %v2417_v7 }
 0x206   : > { %v2421_v32 = vadd.f32 %v2420_v47, %v2419_v1  ;;  %v2322_v52 = vadd.f32 %v2321_v9, %v2320_v61 }
 0x208   : > { %v2423_v14 = vadd.f32 %v2422_v51, %v2421_v32 }
 0x214   : > { %v2673_v0 = vpop.f32.mrb[12].mxu0 }
 0x215   : > { %2487 = vst.msk [vmem:[%s4494_s27 + $0x70] sm:$0xff] %vm237_vm0, %v2673_v0  ;;  %v2221_v53 = vpop.f32.mrb[13].mxu0  ;;  %v2383_v15 = vmul.f32 %v2673_v0, %v2673_v0  ;;  %v2327_v25 = vsel %vm237_vm0, %v2673_v0, 0.0 }
 0x216   : > { %v2323_v11 = vsel %vm237_vm0, %v2221_v53, 0.0  ;;  %v2381_v13 = vmul.f32 %v2221_v53, %v2221_v53  ;;  %2485 = vst.msk [vmem:[%s4494_s27 + $0x60] sm:$0xff] %vm237_vm0, %v2221_v53  ;;  %v2674_v37 = vpop.f32.mrb[14].mxu0 }
 0x217   : > { %v2324_v28 = vadd.f32 %v2323_v11, %v2322_v52  ;;  %2488 = vst.msk [vmem:[%s4494_s27 + $0x78] sm:$0xff] %vm237_vm0, %v2674_v37  ;;  %v2224_v36 = vpop.f32.mrb[15].mxu0  ;;  %v2384_v40 = vmul.f32 %v2674_v37, %v2674_v37  ;;  %v2428_v39 = vsel %vm237_vm0, %v2383_v15, 0.0  ;;  %v2329_v26 = vsel %vm237_vm0, %v2674_v37, 0.0 }
 0x218   : > { %v2424_v23 = vsel %vm237_vm0, %v2381_v13, 0.0  ;;  %v2325_v46 = vsel %vm237_vm0, %v2224_v36, 0.0  ;;  %v2382_v34 = vmul.f32 %v2224_v36, %v2224_v36  ;;  %2486 = vst.msk [vmem:[%s4494_s27 + $0x68] sm:$0xff] %vm237_vm0, %v2224_v36 }
 0x219   : > { %v2425_v27 = vadd.f32 %v2424_v23, %v2423_v14  ;;  %v2326_v35 = vadd.f32 %v2325_v46, %v2324_v28  ;;  %v2430_v10 = vsel %vm237_vm0, %v2384_v40, 0.0 }
 0x21a   : > { %v2426_v5 = vsel %vm237_vm0, %v2382_v34, 0.0 }
 0x21b   : > { %v2328_v41 = vadd.f32 %v2327_v25, %v2326_v35  ;;  %v2427_v43 = vadd.f32 %v2426_v5, %v2425_v27 }
 0x21d   : > { %v2429_v21 = vadd.f32 %v2428_v39, %v2427_v43  ;;  %v2330_v38 = vadd.f32 %v2329_v26, %v2328_v41 }
 0x21f   : > { %v2431_v29 = vadd.f32 %v2430_v10, %v2429_v21 }
 0x22c   : > { %v2677_v2 = vpop.f32.mrb[0].mxu1 }
 0x22d   : > { %2491 = vst.msk [vmem:[%s4494_s27 + $0x90] sm:$0xff] %vm237_vm0, %v2677_v2  ;;  %v2237_v3 = vpop.f32.mrb[1].mxu1  ;;  %v2387_v16 = vmul.f32 %v2677_v2, %v2677_v2  ;;  %v2335_v42 = vsel %vm237_vm0, %v2677_v2, 0.0 }
 0x22e   : > { %v2331_v19 = vsel %vm237_vm0, %v2237_v3, 0.0  ;;  %v2385_v20 = vmul.f32 %v2237_v3, %v2237_v3  ;;  %2489 = vst.msk [vmem:[%s4494_s27 + $0x80] sm:$0xff] %vm237_vm0, %v2237_v3  ;;  %v2678_v62 = vpop.f32.mrb[2].mxu1 }
 0x22f   : > { %v2332_v63 = vadd.f32 %v2331_v19, %v2330_v38  ;;  %2492 = vst.msk [vmem:[%s4494_s27 + $0x98] sm:$0xff] %vm237_vm0, %v2678_v62  ;;  %v2240_v50 = vpop.f32.mrb[3].mxu1  ;;  %v2388_v24 = vmul.f32 %v2678_v62, %v2678_v62  ;;  %v2436_v30 = vsel %vm237_vm0, %v2387_v16, 0.0  ;;  %v2337_v6 = vsel %vm237_vm0, %v2678_v62, 0.0 }
 0x230   : > { %v2432_v58 = vsel %vm237_vm0, %v2385_v20, 0.0  ;;  %v2333_v22 = vsel %vm237_vm0, %v2240_v50, 0.0  ;;  %v2386_v12 = vmul.f32 %v2240_v50, %v2240_v50  ;;  %2490 = vst.msk [vmem:[%s4494_s27 + $0x88] sm:$0xff] %vm237_vm0, %v2240_v50 }
 0x231   : > { %v2433_v55 = vadd.f32 %v2432_v58, %v2431_v29  ;;  %v2334_v8 = vadd.f32 %v2333_v22, %v2332_v63  ;;  %v2438_v44 = vsel %vm237_vm0, %v2388_v24, 0.0 }
 0x232   : > { %v2434_v31 = vsel %vm237_vm0, %v2386_v12, 0.0 }
 0x233   : > { %v2336_v45 = vadd.f32 %v2335_v42, %v2334_v8  ;;  %v2435_v54 = vadd.f32 %v2434_v31, %v2433_v55 }
 0x235   : > { %v2437_v48 = vadd.f32 %v2436_v30, %v2435_v54  ;;  %v2338_v60 = vadd.f32 %v2337_v6, %v2336_v45 }
 0x237   : > { %v2439_v59 = vadd.f32 %v2438_v44, %v2437_v48 }
 0x244   : > { %v2681_v56 = vpop.f32.mrb[4].mxu1 }
 0x245   : > { %2495 = vst.msk [vmem:[%s4494_s27 + $0xb0] sm:$0xff] %vm237_vm0, %v2681_v56  ;;  %v2253_v57 = vpop.f32.mrb[5].mxu1  ;;  %v2391_v33 = vmul.f32 %v2681_v56, %v2681_v56  ;;  %v2343_v52 = vsel %vm237_vm0, %v2681_v56, 0.0 }
 0x246   : > { %v2339_v18 = vsel %vm237_vm0, %v2253_v57, 0.0  ;;  %v2389_v7 = vmul.f32 %v2253_v57, %v2253_v57  ;;  %2493 = vst.msk [vmem:[%s4494_s27 + $0xa0] sm:$0xff] %vm237_vm0, %v2253_v57  ;;  %v2682_v49 = vpop.f32.mrb[6].mxu1 }
 0x247   : > { %v2340_v4 = vadd.f32 %v2339_v18, %v2338_v60  ;;  %2496 = vst.msk [vmem:[%s4494_s27 + $0xb8] sm:$0xff] %vm237_vm0, %v2682_v49  ;;  %v2256_v17 = vpop.f32.mrb[7].mxu1  ;;  %v2392_v51 = vmul.f32 %v2682_v49, %v2682_v49  ;;  %v2444_v11 = vsel %vm237_vm0, %v2391_v33, 0.0  ;;  %v2345_v13 = vsel %vm237_vm0, %v2682_v49, 0.0 }
 0x248   : > { %v2440_v61 = vsel %vm237_vm0, %v2389_v7, 0.0  ;;  %v2341_v1 = vsel %vm237_vm0, %v2256_v17, 0.0  ;;  %v2390_v47 = vmul.f32 %v2256_v17, %v2256_v17  ;;  %2494 = vst.msk [vmem:[%s4494_s27 + $0xa8] sm:$0xff] %vm237_vm0, %v2256_v17 }
 0x249   : > { %v2441_v9 = vadd.f32 %v2440_v61, %v2439_v59  ;;  %v2342_v32 = vadd.f32 %v2341_v1, %v2340_v4  ;;  %v2446_v36 = vsel %vm237_vm0, %v2392_v51, 0.0 }
 0x24a   : > { %v2442_v14 = vsel %vm237_vm0, %v2390_v47, 0.0 }
 0x24b   : > { %v2344_v0 = vadd.f32 %v2343_v52, %v2342_v32  ;;  %v2443_v53 = vadd.f32 %v2442_v14, %v2441_v9 }
 0x24d   : > { %v2445_v37 = vadd.f32 %v2444_v11, %v2443_v53  ;;  %v2346_v28 = vadd.f32 %v2345_v13, %v2344_v0 }
 0x24f   : > { %v2447_v15 = vadd.f32 %v2446_v36, %v2445_v37 }
 0x25c   : > { %v2685_v23 = vpop.f32.mrb[8].mxu1 }
 0x25d   : > { %2499 = vst.msk [vmem:[%s4494_s27 + $0xd0] sm:$0xff] %vm237_vm0, %v2685_v23  ;;  %v2269_v46 = vpop.f32.mrb[9].mxu1  ;;  %v2395_v5 = vmul.f32 %v2685_v23, %v2685_v23  ;;  %v2351_v38 = vsel %vm237_vm0, %v2685_v23, 0.0 }
 0x25e   : > { %v2347_v34 = vsel %vm237_vm0, %v2269_v46, 0.0  ;;  %v2393_v27 = vmul.f32 %v2269_v46, %v2269_v46  ;;  %2497 = vst.msk [vmem:[%s4494_s27 + $0xc0] sm:$0xff] %vm237_vm0, %v2269_v46  ;;  %v2686_v35 = vpop.f32.mrb[10].mxu1 }
 0x25f   : > { %v2348_v25 = vadd.f32 %v2347_v34, %v2346_v28  ;;  %2500 = vst.msk [vmem:[%s4494_s27 + $0xd8] sm:$0xff] %vm237_vm0, %v2686_v35  ;;  %v2272_v40 = vpop.f32.mrb[11].mxu1  ;;  %v2396_v10 = vmul.f32 %v2686_v35, %v2686_v35  ;;  %v2452_v19 = vsel %vm237_vm0, %v2395_v5, 0.0  ;;  %v2353_v20 = vsel %vm237_vm0, %v2686_v35, 0.0 }
 0x260   : > { %v2448_v41 = vsel %vm237_vm0, %v2393_v27, 0.0  ;;  %v2349_v43 = vsel %vm237_vm0, %v2272_v40, 0.0  ;;  %v2394_v39 = vmul.f32 %v2272_v40, %v2272_v40  ;;  %2498 = vst.msk [vmem:[%s4494_s27 + $0xc8] sm:$0xff] %vm237_vm0, %v2272_v40 }
 0x261   : > { %v2449_v26 = vadd.f32 %v2448_v41, %v2447_v15  ;;  %v2350_v21 = vadd.f32 %v2349_v43, %v2348_v25  ;;  %v2454_v50 = vsel %vm237_vm0, %v2396_v10, 0.0 }
 0x262   : > { %v2450_v29 = vsel %vm237_vm0, %v2394_v39, 0.0 }
 0x263   : > { %v2352_v2 = vadd.f32 %v2351_v38, %v2350_v21  ;;  %v2451_v3 = vadd.f32 %v2450_v29, %v2449_v26 }
 0x265   : > { %v2453_v62 = vadd.f32 %v2452_v19, %v2451_v3  ;;  %v2354_v63 = vadd.f32 %v2353_v20, %v2352_v2 }
 0x267   : > { %v2455_v16 = vadd.f32 %v2454_v50, %v2453_v62 }
 0x274   : > { %v2689_v58 = vpop.f32.mrb[12].mxu1 }
 0x275   : > { %2503 = vst.msk [vmem:[%s4494_s27 + $0xf0] sm:$0xff] %vm237_vm0, %v2689_v58  ;;  %v2285_v22 = vpop.f32.mrb[13].mxu1  ;;  %v2399_v31 = vmul.f32 %v2689_v58, %v2689_v58  ;;  %v2359_v60 = vsel %vm237_vm0, %v2689_v58, 0.0 }
 0x276   : > { %v2355_v12 = vsel %vm237_vm0, %v2285_v22, 0.0  ;;  %v2397_v55 = vmul.f32 %v2285_v22, %v2285_v22  ;;  %2501 = vst.msk [vmem:[%s4494_s27 + $0xe0] sm:$0xff] %vm237_vm0, %v2285_v22  ;;  %v2690_v8 = vpop.f32.mrb[14].mxu1 }
 0x277   : > { %v2356_v42 = vadd.f32 %v2355_v12, %v2354_v63  ;;  %2504 = vst.msk [vmem:[%s4494_s27 + $0xf8] sm:$0xff] %vm237_vm0, %v2690_v8  ;;  %v2288_v24 = vpop.f32.mrb[15].mxu1  ;;  %v2400_v44 = vmul.f32 %v2690_v8, %v2690_v8  ;;  %v2460_v18 = vsel %vm237_vm0, %v2399_v31, 0.0  ;;  %v2361_v7 = vsel %vm237_vm0, %v2690_v8, 0.0 }
 0x278   : > { %v2456_v45 = vsel %vm237_vm0, %v2397_v55, 0.0  ;;  %v2357_v54 = vsel %vm237_vm0, %v2288_v24, 0.0  ;;  %v2398_v30 = vmul.f32 %v2288_v24, %v2288_v24  ;;  %2502 = vst.msk [vmem:[%s4494_s27 + $0xe8] sm:$0xff] %vm237_vm0, %v2288_v24 }
 0x279   : > { %v2457_v6 = vadd.f32 %v2456_v45, %v2455_v16  ;;  %v2358_v48 = vadd.f32 %v2357_v54, %v2356_v42  ;;  %v2462_v17 = vsel %vm237_vm0, %v2400_v44, 0.0 }
 0x27a   : > { %v2458_v59 = vsel %vm237_vm0, %v2398_v30, 0.0 }
 0x27b   : > { %v2360_v56 = vadd.f32 %v2359_v60, %v2358_v48  ;;  %v2459_v57 = vadd.f32 %v2458_v59, %v2457_v6 }
 0x27d   : > { %v2362_v49 = vadd.f32 %v2361_v7, %v2360_v56  ;;  %v2461_v4 = vadd.f32 %v2460_v18, %v2459_v57 }
 0x27f   : > { %v2363_v33 = vrot.slane %v2362_v49, 4  ;;  %v2463_v61 = vadd.f32 %v2462_v17, %v2461_v4 }
 0x281   : > { %v2364_v1 = vadd.f32 %v2363_v33, %v2362_v49  ;;  %v2464_v47 = vrot.slane %v2463_v61, 4 }
 0x283   : > { %v2365_v9 = vrot.slane %v2364_v1, 2  ;;  %v2465_v32 = vadd.f32 %v2464_v47, %v2463_v61 }
 0x285   : > { %v2366_v52 = vadd.f32 %v2365_v9, %v2364_v1  ;;  %v2466_v51 = vrot.slane %v2465_v32, 2 }
 0x287   : > { %v2367_v14 = vrot.slane %v2366_v52, 1  ;;  %v2467_v0 = vadd.f32 %v2466_v51, %v2465_v32 }
 0x289   : > { %v2468_v53 = vrot.slane %v2467_v0, 1  ;;  %v2368_v11 = vadd.f32 %v2367_v14, %v2366_v52 }
 0x28b   : > { %v2469_v13 = vadd.f32 %v2468_v53, %v2467_v0 }
 0x28d   : > { %v2471_v37 = vsel %vm2470_vm12, %v2368_v11, %v2469_v13 }
 0x28e   : > { %2472 = vst.msk [vmem:[%s235_s30] sm:$0x3] %vm240_vm1, %v2471_v37 }
 0x28f PF: > { %s16_s18 = sadd.s32 1, %s3386_s18  }
 0x290   : > { %p13_p4 = scmp.ge.s32.totalorder %s16_s18, 4  }
 0x292   :  { %15 = sbr.rel (!%p13_p4) target bundleno = 1 (0x1), region = 81 }

</bundles_post_ra>
